<compile_context>
chip_gen: v6e
topology: v6e:2x2x1
jax: 0.10.0
libtpu: 0.0.40
codegen_flags: <defaults>
</compile_context>

<pallas_src>
import functools

import jax
import jax.numpy as jnp
from jax.experimental import pallas as pl
from jax.experimental.pallas import tpu as pltpu


# ----------------------------- in-kernel helpers -----------------------------

def _layernorm(x, gamma, beta, eps=1e-5):
    mu = jnp.mean(x, axis=-1, keepdims=True)
    xc = x - mu
    var = jnp.mean(xc * xc, axis=-1, keepdims=True)
    return xc * jax.lax.rsqrt(var + eps) * gamma + beta


def _erf(x):
    # Abramowitz & Stegun 7.1.26 rational approximation (max abs err 1.5e-7).
    # Keeps nn.GELU's exact-erf semantics to far below the test tolerance while
    # only using ops that definitely lower in Mosaic (exp, mul, div, select).
    a1, a2, a3 = 0.254829592, -0.284496736, 1.421413741
    a4, a5, p = -1.453152027, 1.061405429, 0.3275911
    z = jnp.abs(x)
    t = 1.0 / (1.0 + p * z)
    poly = ((((a5 * t + a4) * t + a3) * t + a2) * t + a1) * t
    e = 1.0 - poly * jnp.exp(-z * z)
    return jnp.where(x >= 0, e, -e)


def _gelu(x):
    return 0.5 * x * (1.0 + _erf(x * 0.7071067811865476))


# ------------------------ kernel A: depthwise pos_embed -----------------------

def _pos_embed_kernel(x_ref, wd_ref, bd_ref, o_ref, pad_ref, *, H, W, C):
    # Zero the padded scratch only once: the interior is fully rewritten every
    # grid step and the 1-pixel border is never written, so a single memset is
    # enough (the grid axis is "arbitrary", i.e. serial on one core).
    @pl.when(pl.program_id(0) == 0)
    def _():
        pad_ref[...] = jnp.zeros_like(pad_ref)

    x = x_ref[0]                                   # (H, W, C) NHWC
    pad_ref[1:H + 1, 1:W + 1, :] = x

    wd = wd_ref[...]                               # (9, C): taps, row-major (ky, kx)
    # Per-channel VPU broadcast-MACs (channels are tiny vs the MXU); seed the
    # accumulator from tap 0 instead of a zero memset + add.
    acc = pad_ref[0:H, 0:W, :] * wd[0]
    for k in range(1, 9):
        ky, kx = k // 3, k % 3
        acc = acc + pad_ref[ky:ky + H, kx:kx + W, :] * wd[k]
    acc = acc + bd_ref[...]                        # (1, C) broadcast

    o_ref[0] = (x + acc).astype(o_ref.dtype)       # residual: x + pos_embed(x)


# --------------- kernel B: per-window norm/attention/MLP block ----------------

def _window_block_kernel(x_ref, g1_ref, b1_ref, wq_ref, wk_ref, wv_ref,
                         wp_ref, bp_ref, g2_ref, b2_ref,
                         w1_ref, bf1_ref, w2_ref, bf2_ref, o_ref,
                         *, WS, C, NH, HD):
    T = WS * WS
    x = x_ref[0].reshape(T, C).astype(jnp.float32)     # (tokens, C) for one window

    # ---- LayerNorm 1 ----
    xn = _layernorm(x, g1_ref[...], b1_ref[...])

    # ---- windowed multi-head self-attention (per-head MXU matmuls) ----
    scale = HD ** -0.5
    trans_b = (((1,), (1,)), ((), ()))                  # q @ k^T
    attn_out = None
    for h in range(NH):                                 # NH is small & static
        q = jnp.dot(xn, wq_ref[h], preferred_element_type=jnp.float32) * scale
        k = jnp.dot(xn, wk_ref[h], preferred_element_type=jnp.float32)
        v = jnp.dot(xn, wv_ref[h], preferred_element_type=jnp.float32)
        s = jax.lax.dot_general(q, k, trans_b,
                                preferred_element_type=jnp.float32)   # (T, T)
        s = s - jnp.max(s, axis=-1, keepdims=True)
        p = jnp.exp(s)
        p = p / jnp.sum(p, axis=-1, keepdims=True)
        o_h = jnp.dot(p, v, preferred_element_type=jnp.float32)       # (T, HD)
        # proj_out applied per head and summed == proj_out(concat(heads));
        # avoids any lane-concatenation of narrow per-head tiles.
        contrib = jnp.dot(o_h, wp_ref[h], preferred_element_type=jnp.float32)
        attn_out = contrib if attn_out is None else attn_out + contrib
    attn_out = attn_out + bp_ref[...]

    y = x + attn_out                                    # residual 1 (shortcut = x)

    # ---- LayerNorm 2 + MLP (GELU) ----
    yn = _layernorm(y, g2_ref[...], b2_ref[...])
    hmid = jnp.dot(yn, w1_ref[...], preferred_element_type=jnp.float32) + bf1_ref[...]
    hmid = _gelu(hmid)
    y = y + jnp.dot(hmid, w2_ref[...], preferred_element_type=jnp.float32) + bf2_ref[...]

    o_ref[0] = y.reshape(WS, WS, C).astype(o_ref.dtype)


# --------------------------------- wrapper ------------------------------------

@functools.partial(jax.jit, static_argnames=("num_heads", "window_size"))
def transformer_pallas(x_nchw, params, *, num_heads=4, window_size=8):
    """Transformer block forward.  x_nchw: (N, C, H, W) f32 -> (N, C, H, W)."""
    (wd, bd, g1, b1, wq, wk, wv, wp, bp, g2, b2, w1, bf1, w2, bf2) = params
    N, C, H, W = x_nchw.shape
    ws = window_size
    nh = num_heads
    hd = C // nh
    hidden = w1.shape[1]
    # TODO(synk): general case would pad H/W to window multiples like F.pad in
    # the module; test shapes are already divisible.
    assert H % ws == 0 and W % ws == 0
    assert C % nh == 0

    # Single NCHW->NHWC transpose at the module boundary (PyTorch interface is
    # NCHW); every kernel below runs channel-last so C maps onto TPU lanes.
    x = jnp.transpose(x_nchw, (0, 2, 3, 1)).astype(jnp.float32)

    # ---- kernel A: x = x + depthwise3x3(x) -----------------------------------
    kern_a = functools.partial(_pos_embed_kernel, H=H, W=W, C=C)
    x = pl.pallas_call(
        kern_a,
        out_shape=jax.ShapeDtypeStruct((N, H, W, C), jnp.float32),
        grid_spec=pltpu.PrefetchScalarGridSpec(
            num_scalar_prefetch=0,
            grid=(N,),
            in_specs=[
                pl.BlockSpec((1, H, W, C), lambda n: (n, 0, 0, 0)),
                pl.BlockSpec((9, C), lambda n: (0, 0)),
                pl.BlockSpec((1, C), lambda n: (0, 0)),
            ],
            out_specs=pl.BlockSpec((1, H, W, C), lambda n: (n, 0, 0, 0)),
            scratch_shapes=[pltpu.VMEM((H + 2, W + 2, C), jnp.float32)],
        ),
        compiler_params=pltpu.CompilerParams(
            # Serial on purpose: the zero-once padded scratch must live on one
            # core.  The heavy, fully parallel work is in the window kernel.
            dimension_semantics=("arbitrary",)),
    )(x, wd, bd)

    # ---- kernel B: per-window  norm1 -> MSA -> +res -> norm2 -> MLP -> +res --
    kern_b = functools.partial(_window_block_kernel, WS=ws, C=C, NH=nh, HD=hd)
    rep2 = lambda n, i, j: (0, 0)
    rep3 = lambda n, i, j: (0, 0, 0)
    y = pl.pallas_call(
        kern_b,
        out_shape=jax.ShapeDtypeStruct((N, H, W, C), jnp.float32),
        grid_spec=pltpu.PrefetchScalarGridSpec(
            num_scalar_prefetch=0,
            grid=(N, H // ws, W // ws),           # window partition via BlockSpec
            in_specs=[
                pl.BlockSpec((1, ws, ws, C), lambda n, i, j: (n, i, j, 0)),
                pl.BlockSpec((1, C), rep2),        # norm1 gamma
                pl.BlockSpec((1, C), rep2),        # norm1 beta
                pl.BlockSpec((nh, C, hd), rep3),   # Wq (per head)
                pl.BlockSpec((nh, C, hd), rep3),   # Wk (per head)
                pl.BlockSpec((nh, C, hd), rep3),   # Wv (per head)
                pl.BlockSpec((nh, hd, C), rep3),   # W_proj (per head)
                pl.BlockSpec((1, C), rep2),        # b_proj
                pl.BlockSpec((1, C), rep2),        # norm2 gamma
                pl.BlockSpec((1, C), rep2),        # norm2 beta
                pl.BlockSpec((C, hidden), rep2),   # mlp fc1 weight
                pl.BlockSpec((1, hidden), rep2),   # mlp fc1 bias
                pl.BlockSpec((hidden, C), rep2),   # mlp fc2 weight
                pl.BlockSpec((1, C), rep2),        # mlp fc2 bias
            ],
            out_specs=pl.BlockSpec((1, ws, ws, C), lambda n, i, j: (n, i, j, 0)),
        ),
        compiler_params=pltpu.CompilerParams(
            dimension_semantics=("parallel", "parallel", "parallel")),
    )(x, g1, b1, wq, wk, wv, wp, bp, g2, b2, w1, bf1, w2, bf2)

    return jnp.transpose(y, (0, 3, 1, 2))


# ------------------------------ parameters ------------------------------------

def make_params(key, dim, num_heads=4, mlp_ratio=4):
    """Deterministic synthetic parameters matching the nn.Module shapes."""
    hd = dim // num_heads
    ks = jax.random.split(key, 13)
    s = 0.1
    # PyTorch-layout parameters.
    wd_t = jax.random.normal(ks[0], (dim, 1, 3, 3), jnp.float32) * s     # pos_embed
    bd_t = jax.random.normal(ks[1], (dim,), jnp.float32) * s
    g1_t = 1.0 + 0.1 * jax.random.normal(ks[2], (dim,), jnp.float32)     # norm1
    b1_t = 0.1 * jax.random.normal(ks[3], (dim,), jnp.float32)
    qkv_w = jax.random.normal(ks[4], (3 * dim, dim), jnp.float32) * s    # qkv (no bias)
    proj_w = jax.random.normal(ks[5], (dim, dim), jnp.float32) * s       # proj_out
    proj_b = jax.random.normal(ks[6], (dim,), jnp.float32) * s
    g2_t = 1.0 + 0.1 * jax.random.normal(ks[7], (dim,), jnp.float32)     # norm2
    b2_t = 0.1 * jax.random.normal(ks[8], (dim,), jnp.float32)
    fc1_w = jax.random.normal(ks[9], (dim * mlp_ratio, dim), jnp.float32) * s
    fc1_b = jax.random.normal(ks[10], (dim * mlp_ratio,), jnp.float32) * s
    fc2_w = jax.random.normal(ks[11], (dim, dim * mlp_ratio), jnp.float32) * s
    fc2_b = jax.random.normal(ks[12], (dim,), jnp.float32) * s

    torch_params = (wd_t, bd_t, g1_t, b1_t, qkv_w, proj_w, proj_b,
                    g2_t, b2_t, fc1_w, fc1_b, fc2_w, fc2_b)

    # Kernel-layout parameters (channel-last, matmul-ready, per-head split).
    wd = jnp.transpose(wd_t[:, 0], (1, 2, 0)).reshape(9, dim)            # (ky*3+kx, C)
    bd = bd_t.reshape(1, dim)
    g1, b1 = g1_t.reshape(1, dim), b1_t.reshape(1, dim)
    qkv_t = qkv_w.T                                                      # (C, 3C)
    wq = qkv_t[:, 0 * dim:1 * dim].reshape(dim, num_heads, hd).transpose(1, 0, 2)
    wk = qkv_t[:, 1 * dim:2 * dim].reshape(dim, num_heads, hd).transpose(1, 0, 2)
    wv = qkv_t[:, 2 * dim:3 * dim].reshape(dim, num_heads, hd).transpose(1, 0, 2)
    wp = proj_w.T.reshape(num_heads, hd, dim)                            # (NH, HD, C)
    bp = proj_b.reshape(1, dim)
    g2, b2 = g2_t.reshape(1, dim), b2_t.reshape(1, dim)
    w1 = fc1_w.T                                                         # (C, 4C)
    bf1 = fc1_b.reshape(1, dim * mlp_ratio)
    w2 = fc2_w.T                                                         # (4C, C)
    bf2 = fc2_b.reshape(1, dim)

    kernel_params = (wd, bd, g1, b1, wq, wk, wv, wp, bp, g2, b2, w1, bf1, w2, bf2)
    return kernel_params, torch_params


# ----------------------------- pure-JAX reference -----------------------------

def transformer_ref(x_nchw, torch_params, num_heads=4, window_size=8):
    (wd_t, bd_t, g1, b1, qkv_w, proj_w, proj_b,
     g2, b2, fc1_w, fc1_b, fc2_w, fc2_b) = torch_params
    N, C, H, W = x_nchw.shape
    hd = C // num_heads
    ws = window_size
    eps = 1e-5

    def layernorm(v, g, bt):
        mu = jnp.mean(v, axis=-1, keepdims=True)
        var = jnp.mean((v - mu) ** 2, axis=-1, keepdims=True)
        return (v - mu) / jnp.sqrt(var + eps) * g + bt

    # pos_embed (depthwise 3x3) + residual
    dn = jax.lax.conv_dimension_numbers(x_nchw.shape, wd_t.shape,
                                        ("NCHW", "OIHW", "NCHW"))
    pe = jax.lax.conv_general_dilated(x_nchw, wd_t, (1, 1), ((1, 1), (1, 1)),
                                      dimension_numbers=dn,
                                      feature_group_count=C)
    pe = pe + bd_t[None, :, None, None]
    x = x_nchw + pe
    x = jnp.transpose(x, (0, 2, 3, 1))                   # NHWC
    shortcut = x

    # window attention
    xn = layernorm(x, g1, b1)
    xw = xn.reshape(N, H // ws, ws, W // ws, ws, C)
    xw = xw.transpose(0, 1, 3, 2, 4, 5).reshape(-1, ws * ws, C)
    qkv = xw @ qkv_w.T
    q, k, v = jnp.split(qkv, 3, axis=-1)

    def to_heads(t):
        B, T, _ = t.shape
        return t.reshape(B, T, num_heads, hd).transpose(0, 2, 1, 3)

    q, k, v = to_heads(q), to_heads(k), to_heads(v)
    attn = jnp.einsum("bhqd,bhkd->bhqk", q, k) * (hd ** -0.5)
    attn = jax.nn.softmax(attn, axis=-1)
    o = jnp.einsum("bhqk,bhkd->bhqd", attn, v)
    o = o.transpose(0, 2, 1, 3).reshape(-1, ws * ws, C)
    o = o @ proj_w.T + proj_b
    o = o.reshape(N, H // ws, W // ws, ws, ws, C)
    o = o.transpose(0, 1, 3, 2, 4, 5).reshape(N, H, W, C)
    x = shortcut + o

    # MLP
    xn2 = layernorm(x, g2, b2)
    h = xn2 @ fc1_w.T + fc1_b
    h = jax.nn.gelu(h, approximate=False)
    h = h @ fc2_w.T + fc2_b
    x = x + h
    return jnp.transpose(x, (0, 3, 1, 2))


# ---------------------------------- test ---------------------------------------

if __name__ == "__main__":
    key = jax.random.PRNGKey(0)
    kx, kp = jax.random.split(key)

    N, C, H, W = 2, 64, 16, 16          # dim=64, 4 heads (head_dim=16), 8x8 windows
    NUM_HEADS, WINDOW = 4, 8

    x = jax.random.normal(kx, (N, C, H, W), jnp.float32)
    params, torch_params = make_params(kp, C, num_heads=NUM_HEADS)

    out = transformer_pallas(x, params, num_heads=NUM_HEADS, window_size=WINDOW)
    out = jax.block_until_ready(out)

    with jax.default_matmul_precision("highest"):
        ref = transformer_ref(x, torch_params, num_heads=NUM_HEADS,
                              window_size=WINDOW)

    assert out.shape == ref.shape == (N, C, H, W)
    err = float(jnp.max(jnp.abs(out - ref)))
    # Tolerance covers XLA-vs-MXU f32 matmul precision differences.
    assert jnp.allclose(out, ref, rtol=1e-2, atol=1e-2), err
    print("KERNEL_OK")
</pallas_src>

<mosaic_0001>
module attributes {stable_mosaic.version = 11 : i64} {
  func.func @_pos_embed_kernel(%arg0: i32, %arg1: memref<1x16x16x64xf32, #tpu.memory_space<vmem>>, %arg2: memref<9x64xf32, #tpu.memory_space<vmem>>, %arg3: memref<1x64xf32, #tpu.memory_space<vmem>>, %arg4: memref<1x16x16x64xf32, #tpu.memory_space<vmem>>, %arg5: memref<18x18x64xf32, #tpu.memory_space<vmem>>) attributes {dimension_semantics = [#tpu.dimension_semantics<arbitrary>], iteration_bounds = array<i64: 2>, scalar_prefetch = 0 : i64, scratch_operands = 1 : i64, tpu.core_type = #tpu.core_type<tc>, window_params = [{transform_indices = @transform_0, window_bounds = array<i64: 1, 16, 16, 64>}, {pipeline_mode = #tpu.pipeline_mode<synchronous>, transform_indices = @transform_1, window_bounds = array<i64: 9, 64>}, {pipeline_mode = #tpu.pipeline_mode<synchronous>, transform_indices = @transform_2, window_bounds = array<i64: 1, 64>}, {transform_indices = @transform_3, window_bounds = array<i64: 1, 16, 16, 64>}]} {
    %c0_i32 = arith.constant 0 : i32
    %0 = arith.cmpi eq, %arg0, %c0_i32 : i32
    %1 = arith.extui %0 : i1 to i32
    %c0_i32_0 = arith.constant 0 : i32
    %2 = arith.cmpi ne, %1, %c0_i32_0 : i32
    scf.if %2 {
      %cst = arith.constant 0.000000e+00 : f32
      %77 = vector.broadcast %cst : f32 to vector<18x18x64xf32>
      %c0_40 = arith.constant 0 : index
      %c0_41 = arith.constant 0 : index
      %c0_42 = arith.constant 0 : index
      %78 = vector.load %arg5[%c0_40, %c0_41, %c0_42] : memref<18x18x64xf32, #tpu.memory_space<vmem>>, vector<18x18x64xf32>
      tpu.vector_store %arg5[%c0_40, %c0_41, %c0_42], %77 {strides = array<i32>} : memref<18x18x64xf32, #tpu.memory_space<vmem>>, vector<18x18x64xf32>,
    } else {
    }
    %c0 = arith.constant 0 : index
    %c0_1 = arith.constant 0 : index
    %c0_2 = arith.constant 0 : index
    %c0_3 = arith.constant 0 : index
    %3 = vector.load %arg1[%c0, %c0_1, %c0_2, %c0_3] : memref<1x16x16x64xf32, #tpu.memory_space<vmem>>, vector<1x16x16x64xf32>
    %4 = vector.shape_cast %3 : vector<1x16x16x64xf32> to vector<16x16x64xf32>
    %c1 = arith.constant 1 : index
    %c1_4 = arith.constant 1 : index
    %c0_5 = arith.constant 0 : index
    %5 = vector.load %arg5[%c1, %c1_4, %c0_5] : memref<18x18x64xf32, #tpu.memory_space<vmem>>, vector<16x16x64xf32>
    tpu.vector_store %arg5[%c1, %c1_4, %c0_5], %4 {strides = array<i32>} : memref<18x18x64xf32, #tpu.memory_space<vmem>>, vector<16x16x64xf32>,
    %c0_6 = arith.constant 0 : index
    %c0_7 = arith.constant 0 : index
    %6 = vector.load %arg2[%c0_6, %c0_7] : memref<9x64xf32, #tpu.memory_space<vmem>>, vector<9x64xf32>
    %c0_8 = arith.constant 0 : index
    %c0_9 = arith.constant 0 : index
    %c0_10 = arith.constant 0 : index
    %7 = vector.load %arg5[%c0_8, %c0_9, %c0_10] : memref<18x18x64xf32, #tpu.memory_space<vmem>>, vector<16x16x64xf32>
    %8 = vector.extract_strided_slice %6 {offsets = [0, 0], sizes = [1, 64], strides = [1, 1]} : vector<9x64xf32> to vector<1x64xf32>
    %9 = vector.shape_cast %8 : vector<1x64xf32> to vector<64xf32>
    %10 = vector.shape_cast %9 : vector<64xf32> to vector<1x1x64xf32>
    %11 = vector.broadcast %10 : vector<1x1x64xf32> to vector<16x16x64xf32>
    %12 = arith.mulf %7, %11 : vector<16x16x64xf32>
    %c0_11 = arith.constant 0 : index
    %c1_12 = arith.constant 1 : index
    %c0_13 = arith.constant 0 : index
    %13 = vector.load %arg5[%c0_11, %c1_12, %c0_13] : memref<18x18x64xf32, #tpu.memory_space<vmem>>, vector<16x16x64xf32>
    %14 = vector.extract_strided_slice %6 {offsets = [1, 0], sizes = [1, 64], strides = [1, 1]} : vector<9x64xf32> to vector<1x64xf32>
    %15 = vector.shape_cast %14 : vector<1x64xf32> to vector<64xf32>
    %16 = vector.shape_cast %15 : vector<64xf32> to vector<1x1x64xf32>
    %17 = vector.broadcast %16 : vector<1x1x64xf32> to vector<16x16x64xf32>
    %18 = arith.mulf %13, %17 : vector<16x16x64xf32>
    %19 = arith.addf %12, %18 : vector<16x16x64xf32>
    %c0_14 = arith.constant 0 : index
    %c2 = arith.constant 2 : index
    %c0_15 = arith.constant 0 : index
    %20 = vector.load %arg5[%c0_14, %c2, %c0_15] : memref<18x18x64xf32, #tpu.memory_space<vmem>>, vector<16x16x64xf32>
    %21 = vector.extract_strided_slice %6 {offsets = [2, 0], sizes = [1, 64], strides = [1, 1]} : vector<9x64xf32> to vector<1x64xf32>
    %22 = vector.shape_cast %21 : vector<1x64xf32> to vector<64xf32>
    %23 = vector.shape_cast %22 : vector<64xf32> to vector<1x1x64xf32>
    %24 = vector.broadcast %23 : vector<1x1x64xf32> to vector<16x16x64xf32>
    %25 = arith.mulf %20, %24 : vector<16x16x64xf32>
    %26 = arith.addf %19, %25 : vector<16x16x64xf32>
    %c1_16 = arith.constant 1 : index
    %c0_17 = arith.constant 0 : index
    %c0_18 = arith.constant 0 : index
    %27 = vector.load %arg5[%c1_16, %c0_17, %c0_18] : memref<18x18x64xf32, #tpu.memory_space<vmem>>, vector<16x16x64xf32>
    %28 = vector.extract_strided_slice %6 {offsets = [3, 0], sizes = [1, 64], strides = [1, 1]} : vector<9x64xf32> to vector<1x64xf32>
    %29 = vector.shape_cast %28 : vector<1x64xf32> to vector<64xf32>
    %30 = vector.shape_cast %29 : vector<64xf32> to vector<1x1x64xf32>
    %31 = vector.broadcast %30 : vector<1x1x64xf32> to vector<16x16x64xf32>
    %32 = arith.mulf %27, %31 : vector<16x16x64xf32>
    %33 = arith.addf %26, %32 : vector<16x16x64xf32>
    %c1_19 = arith.constant 1 : index
    %c1_20 = arith.constant 1 : index
    %c0_21 = arith.constant 0 : index
    %34 = vector.load %arg5[%c1_19, %c1_20, %c0_21] : memref<18x18x64xf32, #tpu.memory_space<vmem>>, vector<16x16x64xf32>
    %35 = vector.extract_strided_slice %6 {offsets = [4, 0], sizes = [1, 64], strides = [1, 1]} : vector<9x64xf32> to vector<1x64xf32>
    %36 = vector.shape_cast %35 : vector<1x64xf32> to vector<64xf32>
    %37 = vector.shape_cast %36 : vector<64xf32> to vector<1x1x64xf32>
    %38 = vector.broadcast %37 : vector<1x1x64xf32> to vector<16x16x64xf32>
    %39 = arith.mulf %34, %38 : vector<16x16x64xf32>
    %40 = arith.addf %33, %39 : vector<16x16x64xf32>
    %c1_22 = arith.constant 1 : index
    %c2_23 = arith.constant 2 : index
    %c0_24 = arith.constant 0 : index
    %41 = vector.load %arg5[%c1_22, %c2_23, %c0_24] : memref<18x18x64xf32, #tpu.memory_space<vmem>>, vector<16x16x64xf32>
    %42 = vector.extract_strided_slice %6 {offsets = [5, 0], sizes = [1, 64], strides = [1, 1]} : vector<9x64xf32> to vector<1x64xf32>
    %43 = vector.shape_cast %42 : vector<1x64xf32> to vector<64xf32>
    %44 = vector.shape_cast %43 : vector<64xf32> to vector<1x1x64xf32>
    %45 = vector.broadcast %44 : vector<1x1x64xf32> to vector<16x16x64xf32>
    %46 = arith.mulf %41, %45 : vector<16x16x64xf32>
    %47 = arith.addf %40, %46 : vector<16x16x64xf32>
    %c2_25 = arith.constant 2 : index
    %c0_26 = arith.constant 0 : index
    %c0_27 = arith.constant 0 : index
    %48 = vector.load %arg5[%c2_25, %c0_26, %c0_27] : memref<18x18x64xf32, #tpu.memory_space<vmem>>, vector<16x16x64xf32>
    %49 = vector.extract_strided_slice %6 {offsets = [6, 0], sizes = [1, 64], strides = [1, 1]} : vector<9x64xf32> to vector<1x64xf32>
    %50 = vector.shape_cast %49 : vector<1x64xf32> to vector<64xf32>
    %51 = vector.shape_cast %50 : vector<64xf32> to vector<1x1x64xf32>
    %52 = vector.broadcast %51 : vector<1x1x64xf32> to vector<16x16x64xf32>
    %53 = arith.mulf %48, %52 : vector<16x16x64xf32>
    %54 = arith.addf %47, %53 : vector<16x16x64xf32>
    %c2_28 = arith.constant 2 : index
    %c1_29 = arith.constant 1 : index
    %c0_30 = arith.constant 0 : index
    %55 = vector.load %arg5[%c2_28, %c1_29, %c0_30] : memref<18x18x64xf32, #tpu.memory_space<vmem>>, vector<16x16x64xf32>
    %56 = vector.extract_strided_slice %6 {offsets = [7, 0], sizes = [1, 64], strides = [1, 1]} : vector<9x64xf32> to vector<1x64xf32>
    %57 = vector.shape_cast %56 : vector<1x64xf32> to vector<64xf32>
    %58 = vector.shape_cast %57 : vector<64xf32> to vector<1x1x64xf32>
    %59 = vector.broadcast %58 : vector<1x1x64xf32> to vector<16x16x64xf32>
    %60 = arith.mulf %55, %59 : vector<16x16x64xf32>
    %61 = arith.addf %54, %60 : vector<16x16x64xf32>
    %c2_31 = arith.constant 2 : index
    %c2_32 = arith.constant 2 : index
    %c0_33 = arith.constant 0 : index
    %62 = vector.load %arg5[%c2_31, %c2_32, %c0_33] : memref<18x18x64xf32, #tpu.memory_space<vmem>>, vector<16x16x64xf32>
    %63 = vector.extract_strided_slice %6 {offsets = [8, 0], sizes = [1, 64], strides = [1, 1]} : vector<9x64xf32> to vector<1x64xf32>
    %64 = vector.shape_cast %63 : vector<1x64xf32> to vector<64xf32>
    %65 = vector.shape_cast %64 : vector<64xf32> to vector<1x1x64xf32>
    %66 = vector.broadcast %65 : vector<1x1x64xf32> to vector<16x16x64xf32>
    %67 = arith.mulf %62, %66 : vector<16x16x64xf32>
    %68 = arith.addf %61, %67 : vector<16x16x64xf32>
    %c0_34 = arith.constant 0 : index
    %c0_35 = arith.constant 0 : index
    %69 = vector.load %arg3[%c0_34, %c0_35] : memref<1x64xf32, #tpu.memory_space<vmem>>, vector<1x64xf32>
    %70 = vector.shape_cast %69 : vector<1x64xf32> to vector<1x1x64xf32>
    %71 = vector.broadcast %70 : vector<1x1x64xf32> to vector<16x16x64xf32>
    %72 = arith.addf %68, %71 : vector<16x16x64xf32>
    %73 = arith.addf %4, %72 : vector<16x16x64xf32>
    %c0_36 = arith.constant 0 : index
    %c0_37 = arith.constant 0 : index
    %c0_38 = arith.constant 0 : index
    %c0_39 = arith.constant 0 : index
    %74 = vector.load %arg4[%c0_36, %c0_37, %c0_38, %c0_39] : memref<1x16x16x64xf32, #tpu.memory_space<vmem>>, vector<1x16x16x64xf32>
    %75 = vector.shape_cast %74 : vector<1x16x16x64xf32> to vector<16x16x64xf32>
    %76 = vector.shape_cast %73 : vector<16x16x64xf32> to vector<1x16x16x64xf32>
    tpu.vector_store %arg4[%c0_36, %c0_37, %c0_38, %c0_39], %76 {strides = array<i32>} : memref<1x16x16x64xf32, #tpu.memory_space<vmem>>, vector<1x16x16x64xf32>,
    return
  }
  func.func @transform_0(%arg0: i32) -> (i32, i32, i32, i32) {
    %c0_i32 = arith.constant 0 : i32
    %c0_i32_0 = arith.constant 0 : i32
    %c0_i32_1 = arith.constant 0 : i32
    %c0_i32_2 = arith.constant 0 : i32
    return %arg0, %c0_i32, %c0_i32_0, %c0_i32_1 : i32, i32, i32, i32
  }
  func.func @transform_1(%arg0: i32) -> (i32, i32) {
    %c0_i32 = arith.constant 0 : i32
    %c0_i32_0 = arith.constant 0 : i32
    %c0_i32_1 = arith.constant 0 : i32
    return %c0_i32, %c0_i32_0 : i32, i32
  }
  func.func @transform_2(%arg0: i32) -> (i32, i32) {
    %c0_i32 = arith.constant 0 : i32
    %c0_i32_0 = arith.constant 0 : i32
    %c0_i32_1 = arith.constant 0 : i32
    return %c0_i32, %c0_i32_0 : i32, i32
  }
  func.func @transform_3(%arg0: i32) -> (i32, i32, i32, i32) {
    %c0_i32 = arith.constant 0 : i32
    %c0_i32_0 = arith.constant 0 : i32
    %c0_i32_1 = arith.constant 0 : i32
    %c0_i32_2 = arith.constant 0 : i32
    return %arg0, %c0_i32, %c0_i32_0, %c0_i32_1 : i32, i32, i32, i32
  }
}

module attributes {stable_mosaic.version = 11 : i64} {
  func.func @_window_block_kernel(%arg0: i32, %arg1: i32, %arg2: i32, %arg3: memref<1x8x8x64xf32, #tpu.memory_space<vmem>>, %arg4: memref<1x64xf32, #tpu.memory_space<vmem>>, %arg5: memref<1x64xf32, #tpu.memory_space<vmem>>, %arg6: memref<4x64x16xf32, #tpu.memory_space<vmem>>, %arg7: memref<4x64x16xf32, #tpu.memory_space<vmem>>, %arg8: memref<4x64x16xf32, #tpu.memory_space<vmem>>, %arg9: memref<4x16x64xf32, #tpu.memory_space<vmem>>, %arg10: memref<1x64xf32, #tpu.memory_space<vmem>>, %arg11: memref<1x64xf32, #tpu.memory_space<vmem>>, %arg12: memref<1x64xf32, #tpu.memory_space<vmem>>, %arg13: memref<64x256xf32, #tpu.memory_space<vmem>>, %arg14: memref<1x256xf32, #tpu.memory_space<vmem>>, %arg15: memref<256x64xf32, #tpu.memory_space<vmem>>, %arg16: memref<1x64xf32, #tpu.memory_space<vmem>>, %arg17: memref<1x8x8x64xf32, #tpu.memory_space<vmem>>) attributes {dimension_semantics = [#tpu.dimension_semantics<parallel>, #tpu.dimension_semantics<parallel>, #tpu.dimension_semantics<parallel>], iteration_bounds = array<i64: 2, 2, 2>, scalar_prefetch = 0 : i64, scratch_operands = 0 : i64, tpu.core_type = #tpu.core_type<tc>, window_params = [{transform_indices = @transform_0, window_bounds = array<i64: 1, 8, 8, 64>}, {pipeline_mode = #tpu.pipeline_mode<synchronous>, transform_indices = @transform_1, window_bounds = array<i64: 1, 64>}, {pipeline_mode = #tpu.pipeline_mode<synchronous>, transform_indices = @transform_2, window_bounds = array<i64: 1, 64>}, {pipeline_mode = #tpu.pipeline_mode<synchronous>, transform_indices = @transform_3, window_bounds = array<i64: 4, 64, 16>}, {pipeline_mode = #tpu.pipeline_mode<synchronous>, transform_indices = @transform_4, window_bounds = array<i64: 4, 64, 16>}, {pipeline_mode = #tpu.pipeline_mode<synchronous>, transform_indices = @transform_5, window_bounds = array<i64: 4, 64, 16>}, {pipeline_mode = #tpu.pipeline_mode<synchronous>, transform_indices = @transform_6, window_bounds = array<i64: 4, 16, 64>}, {pipeline_mode = #tpu.pipeline_mode<synchronous>, transform_indices = @transform_7, window_bounds = array<i64: 1, 64>}, {pipeline_mode = #tpu.pipeline_mode<synchronous>, transform_indices = @transform_8, window_bounds = array<i64: 1, 64>}, {pipeline_mode = #tpu.pipeline_mode<synchronous>, transform_indices = @transform_9, window_bounds = array<i64: 1, 64>}, {pipeline_mode = #tpu.pipeline_mode<synchronous>, transform_indices = @transform_10, window_bounds = array<i64: 64, 256>}, {pipeline_mode = #tpu.pipeline_mode<synchronous>, transform_indices = @transform_11, window_bounds = array<i64: 1, 256>}, {pipeline_mode = #tpu.pipeline_mode<synchronous>, transform_indices = @transform_12, window_bounds = array<i64: 256, 64>}, {pipeline_mode = #tpu.pipeline_mode<synchronous>, transform_indices = @transform_13, window_bounds = array<i64: 1, 64>}, {transform_indices = @transform_14, window_bounds = array<i64: 1, 8, 8, 64>}]} {
    %c0 = arith.constant 0 : index
    %c0_0 = arith.constant 0 : index
    %c0_1 = arith.constant 0 : index
    %c0_2 = arith.constant 0 : index
    %0 = vector.load %arg3[%c0, %c0_0, %c0_1, %c0_2] : memref<1x8x8x64xf32, #tpu.memory_space<vmem>>, vector<1x8x8x64xf32>
    %1 = vector.shape_cast %0 : vector<1x8x8x64xf32> to vector<8x8x64xf32>
    %2 = vector.shape_cast %1 : vector<8x8x64xf32> to vector<64x64xf32>
    %c0_3 = arith.constant 0 : index
    %c0_4 = arith.constant 0 : index
    %3 = vector.load %arg4[%c0_3, %c0_4] : memref<1x64xf32, #tpu.memory_space<vmem>>, vector<1x64xf32>
    %c0_5 = arith.constant 0 : index
    %c0_6 = arith.constant 0 : index
    %4 = vector.load %arg5[%c0_5, %c0_6] : memref<1x64xf32, #tpu.memory_space<vmem>>, vector<1x64xf32>
    %cst = arith.constant dense<0.000000e+00> : vector<64xf32>
    %5 = vector.multi_reduction <add>, %2, %cst [1] : vector<64x64xf32> to vector<64xf32>
    %6 = vector.shape_cast %5 : vector<64xf32> to vector<64x1xf32>
    %cst_7 = arith.constant 6.400000e+01 : f32
    %7 = vector.broadcast %cst_7 : f32 to vector<64x1xf32>
    %8 = arith.divf %6, %7 : vector<64x1xf32>
    %9 = vector.broadcast %8 : vector<64x1xf32> to vector<64x64xf32>
    %10 = arith.subf %2, %9 : vector<64x64xf32>
    %11 = arith.mulf %10, %10 : vector<64x64xf32>
    %cst_8 = arith.constant dense<0.000000e+00> : vector<64xf32>
    %12 = vector.multi_reduction <add>, %11, %cst_8 [1] : vector<64x64xf32> to vector<64xf32>
    %13 = vector.shape_cast %12 : vector<64xf32> to vector<64x1xf32>
    %cst_9 = arith.constant 6.400000e+01 : f32
    %14 = vector.broadcast %cst_9 : f32 to vector<64x1xf32>
    %15 = arith.divf %13, %14 : vector<64x1xf32>
    %cst_10 = arith.constant 9.99999974E-6 : f32
    %16 = vector.broadcast %cst_10 : f32 to vector<64x1xf32>
    %17 = arith.addf %15, %16 : vector<64x1xf32>
    %18 = math.rsqrt %17 : vector<64x1xf32>
    %19 = vector.broadcast %18 : vector<64x1xf32> to vector<64x64xf32>
    %20 = arith.mulf %10, %19 : vector<64x64xf32>
    %21 = vector.broadcast %3 : vector<1x64xf32> to vector<64x64xf32>
    %22 = arith.mulf %20, %21 : vector<64x64xf32>
    %23 = vector.broadcast %4 : vector<1x64xf32> to vector<64x64xf32>
    %24 = arith.addf %22, %23 : vector<64x64xf32>
    %c0_11 = arith.constant 0 : index
    %c0_12 = arith.constant 0 : index
    %c0_13 = arith.constant 0 : index
    %25 = vector.load %arg6[%c0_11, %c0_12, %c0_13] : memref<4x64x16xf32, #tpu.memory_space<vmem>>, vector<1x64x16xf32>
    %26 = vector.shape_cast %25 : vector<1x64x16xf32> to vector<64x16xf32>
    %cst_14 = arith.constant dense<0.000000e+00> : vector<64x16xf32>
    %27 = tpu.matmul %24, %26, %cst_14 {dimension_numbers = #tpu.dot_dimension_numbers<[1], [0], [0], [1], [0, 0, 1, 1], [], []>} : vector<64x64xf32>, vector<64x16xf32>, vector<64x16xf32> -> vector<64x16xf32>
    %cst_15 = arith.constant 2.500000e-01 : f32
    %28 = vector.broadcast %cst_15 : f32 to vector<64x16xf32>
    %29 = arith.mulf %27, %28 : vector<64x16xf32>
    %c0_16 = arith.constant 0 : index
    %c0_17 = arith.constant 0 : index
    %c0_18 = arith.constant 0 : index
    %30 = vector.load %arg7[%c0_16, %c0_17, %c0_18] : memref<4x64x16xf32, #tpu.memory_space<vmem>>, vector<1x64x16xf32>
    %31 = vector.shape_cast %30 : vector<1x64x16xf32> to vector<64x16xf32>
    %cst_19 = arith.constant dense<0.000000e+00> : vector<64x16xf32>
    %32 = tpu.matmul %24, %31, %cst_19 {dimension_numbers = #tpu.dot_dimension_numbers<[1], [0], [0], [1], [0, 0, 1, 1], [], []>} : vector<64x64xf32>, vector<64x16xf32>, vector<64x16xf32> -> vector<64x16xf32>
    %c0_20 = arith.constant 0 : index
    %c0_21 = arith.constant 0 : index
    %c0_22 = arith.constant 0 : index
    %33 = vector.load %arg8[%c0_20, %c0_21, %c0_22] : memref<4x64x16xf32, #tpu.memory_space<vmem>>, vector<1x64x16xf32>
    %34 = vector.shape_cast %33 : vector<1x64x16xf32> to vector<64x16xf32>
    %cst_23 = arith.constant dense<0.000000e+00> : vector<64x16xf32>
    %35 = tpu.matmul %24, %34, %cst_23 {dimension_numbers = #tpu.dot_dimension_numbers<[1], [0], [0], [1], [0, 0, 1, 1], [], []>} : vector<64x64xf32>, vector<64x16xf32>, vector<64x16xf32> -> vector<64x16xf32>
    %cst_24 = arith.constant dense<0.000000e+00> : vector<64x64xf32>
    %36 = tpu.matmul %29, %32, %cst_24 {dimension_numbers = #tpu.dot_dimension_numbers<[1], [1], [0], [0], [0, 0, 1, 0], [], []>} : vector<64x16xf32>, vector<64x16xf32>, vector<64x64xf32> -> vector<64x64xf32>
    %cst_25 = arith.constant dense<0xFF800000> : vector<64xf32>
    %37 = vector.multi_reduction <maximumf>, %36, %cst_25 [1] : vector<64x64xf32> to vector<64xf32>
    %38 = vector.shape_cast %37 : vector<64xf32> to vector<64x1xf32>
    %39 = vector.broadcast %38 : vector<64x1xf32> to vector<64x64xf32>
    %40 = arith.subf %36, %39 : vector<64x64xf32>
    %41 = math.exp %40 : vector<64x64xf32>
    %cst_26 = arith.constant dense<0.000000e+00> : vector<64xf32>
    %42 = vector.multi_reduction <add>, %41, %cst_26 [1] : vector<64x64xf32> to vector<64xf32>
    %43 = vector.shape_cast %42 : vector<64xf32> to vector<64x1xf32>
    %44 = vector.broadcast %43 : vector<64x1xf32> to vector<64x64xf32>
    %45 = arith.divf %41, %44 : vector<64x64xf32>
    %cst_27 = arith.constant dense<0.000000e+00> : vector<64x16xf32>
    %46 = tpu.matmul %45, %35, %cst_27 {dimension_numbers = #tpu.dot_dimension_numbers<[1], [0], [0], [1], [0, 0, 1, 1], [], []>} : vector<64x64xf32>, vector<64x16xf32>, vector<64x16xf32> -> vector<64x16xf32>
    %c0_28 = arith.constant 0 : index
    %c0_29 = arith.constant 0 : index
    %c0_30 = arith.constant 0 : index
    %47 = vector.load %arg9[%c0_28, %c0_29, %c0_30] : memref<4x16x64xf32, #tpu.memory_space<vmem>>, vector<1x16x64xf32>
    %48 = vector.shape_cast %47 : vector<1x16x64xf32> to vector<16x64xf32>
    %cst_31 = arith.constant dense<0.000000e+00> : vector<64x64xf32>
    %49 = tpu.matmul %46, %48, %cst_31 {dimension_numbers = #tpu.dot_dimension_numbers<[1], [0], [0], [1], [0, 0, 1, 1], [], []>} : vector<64x16xf32>, vector<16x64xf32>, vector<64x64xf32> -> vector<64x64xf32>
    %c1 = arith.constant 1 : index
    %c0_32 = arith.constant 0 : index
    %c0_33 = arith.constant 0 : index
    %50 = vector.load %arg6[%c1, %c0_32, %c0_33] : memref<4x64x16xf32, #tpu.memory_space<vmem>>, vector<1x64x16xf32>
    %51 = vector.shape_cast %50 : vector<1x64x16xf32> to vector<64x16xf32>
    %cst_34 = arith.constant dense<0.000000e+00> : vector<64x16xf32>
    %52 = tpu.matmul %24, %51, %cst_34 {dimension_numbers = #tpu.dot_dimension_numbers<[1], [0], [0], [1], [0, 0, 1, 1], [], []>} : vector<64x64xf32>, vector<64x16xf32>, vector<64x16xf32> -> vector<64x16xf32>
    %cst_35 = arith.constant 2.500000e-01 : f32
    %53 = vector.broadcast %cst_35 : f32 to vector<64x16xf32>
    %54 = arith.mulf %52, %53 : vector<64x16xf32>
    %c1_36 = arith.constant 1 : index
    %c0_37 = arith.constant 0 : index
    %c0_38 = arith.constant 0 : index
    %55 = vector.load %arg7[%c1_36, %c0_37, %c0_38] : memref<4x64x16xf32, #tpu.memory_space<vmem>>, vector<1x64x16xf32>
    %56 = vector.shape_cast %55 : vector<1x64x16xf32> to vector<64x16xf32>
    %cst_39 = arith.constant dense<0.000000e+00> : vector<64x16xf32>
    %57 = tpu.matmul %24, %56, %cst_39 {dimension_numbers = #tpu.dot_dimension_numbers<[1], [0], [0], [1], [0, 0, 1, 1], [], []>} : vector<64x64xf32>, vector<64x16xf32>, vector<64x16xf32> -> vector<64x16xf32>
    %c1_40 = arith.constant 1 : index
    %c0_41 = arith.constant 0 : index
    %c0_42 = arith.constant 0 : index
    %58 = vector.load %arg8[%c1_40, %c0_41, %c0_42] : memref<4x64x16xf32, #tpu.memory_space<vmem>>, vector<1x64x16xf32>
    %59 = vector.shape_cast %58 : vector<1x64x16xf32> to vector<64x16xf32>
    %cst_43 = arith.constant dense<0.000000e+00> : vector<64x16xf32>
    %60 = tpu.matmul %24, %59, %cst_43 {dimension_numbers = #tpu.dot_dimension_numbers<[1], [0], [0], [1], [0, 0, 1, 1], [], []>} : vector<64x64xf32>, vector<64x16xf32>, vector<64x16xf32> -> vector<64x16xf32>
    %cst_44 = arith.constant dense<0.000000e+00> : vector<64x64xf32>
    %61 = tpu.matmul %54, %57, %cst_44 {dimension_numbers = #tpu.dot_dimension_numbers<[1], [1], [0], [0], [0, 0, 1, 0], [], []>} : vector<64x16xf32>, vector<64x16xf32>, vector<64x64xf32> -> vector<64x64xf32>
    %cst_45 = arith.constant dense<0xFF800000> : vector<64xf32>
    %62 = vector.multi_reduction <maximumf>, %61, %cst_45 [1] : vector<64x64xf32> to vector<64xf32>
    %63 = vector.shape_cast %62 : vector<64xf32> to vector<64x1xf32>
    %64 = vector.broadcast %63 : vector<64x1xf32> to vector<64x64xf32>
    %65 = arith.subf %61, %64 : vector<64x64xf32>
    %66 = math.exp %65 : vector<64x64xf32>
    %cst_46 = arith.constant dense<0.000000e+00> : vector<64xf32>
    %67 = vector.multi_reduction <add>, %66, %cst_46 [1] : vector<64x64xf32> to vector<64xf32>
    %68 = vector.shape_cast %67 : vector<64xf32> to vector<64x1xf32>
    %69 = vector.broadcast %68 : vector<64x1xf32> to vector<64x64xf32>
    %70 = arith.divf %66, %69 : vector<64x64xf32>
    %cst_47 = arith.constant dense<0.000000e+00> : vector<64x16xf32>
    %71 = tpu.matmul %70, %60, %cst_47 {dimension_numbers = #tpu.dot_dimension_numbers<[1], [0], [0], [1], [0, 0, 1, 1], [], []>} : vector<64x64xf32>, vector<64x16xf32>, vector<64x16xf32> -> vector<64x16xf32>
    %c1_48 = arith.constant 1 : index
    %c0_49 = arith.constant 0 : index
    %c0_50 = arith.constant 0 : index
    %72 = vector.load %arg9[%c1_48, %c0_49, %c0_50] : memref<4x16x64xf32, #tpu.memory_space<vmem>>, vector<1x16x64xf32>
    %73 = vector.shape_cast %72 : vector<1x16x64xf32> to vector<16x64xf32>
    %cst_51 = arith.constant dense<0.000000e+00> : vector<64x64xf32>
    %74 = tpu.matmul %71, %73, %cst_51 {dimension_numbers = #tpu.dot_dimension_numbers<[1], [0], [0], [1], [0, 0, 1, 1], [], []>} : vector<64x16xf32>, vector<16x64xf32>, vector<64x64xf32> -> vector<64x64xf32>
    %75 = arith.addf %49, %74 : vector<64x64xf32>
    %c2 = arith.constant 2 : index
    %c0_52 = arith.constant 0 : index
    %c0_53 = arith.constant 0 : index
    %76 = vector.load %arg6[%c2, %c0_52, %c0_53] : memref<4x64x16xf32, #tpu.memory_space<vmem>>, vector<1x64x16xf32>
    %77 = vector.shape_cast %76 : vector<1x64x16xf32> to vector<64x16xf32>
    %cst_54 = arith.constant dense<0.000000e+00> : vector<64x16xf32>
    %78 = tpu.matmul %24, %77, %cst_54 {dimension_numbers = #tpu.dot_dimension_numbers<[1], [0], [0], [1], [0, 0, 1, 1], [], []>} : vector<64x64xf32>, vector<64x16xf32>, vector<64x16xf32> -> vector<64x16xf32>
    %cst_55 = arith.constant 2.500000e-01 : f32
    %79 = vector.broadcast %cst_55 : f32 to vector<64x16xf32>
    %80 = arith.mulf %78, %79 : vector<64x16xf32>
    %c2_56 = arith.constant 2 : index
    %c0_57 = arith.constant 0 : index
    %c0_58 = arith.constant 0 : index
    %81 = vector.load %arg7[%c2_56, %c0_57, %c0_58] : memref<4x64x16xf32, #tpu.memory_space<vmem>>, vector<1x64x16xf32>
    %82 = vector.shape_cast %81 : vector<1x64x16xf32> to vector<64x16xf32>
    %cst_59 = arith.constant dense<0.000000e+00> : vector<64x16xf32>
    %83 = tpu.matmul %24, %82, %cst_59 {dimension_numbers = #tpu.dot_dimension_numbers<[1], [0], [0], [1], [0, 0, 1, 1], [], []>} : vector<64x64xf32>, vector<64x16xf32>, vector<64x16xf32> -> vector<64x16xf32>
    %c2_60 = arith.constant 2 : index
    %c0_61 = arith.constant 0 : index
    %c0_62 = arith.constant 0 : index
    %84 = vector.load %arg8[%c2_60, %c0_61, %c0_62] : memref<4x64x16xf32, #tpu.memory_space<vmem>>, vector<1x64x16xf32>
    %85 = vector.shape_cast %84 : vector<1x64x16xf32> to vector<64x16xf32>
    %cst_63 = arith.constant dense<0.000000e+00> : vector<64x16xf32>
    %86 = tpu.matmul %24, %85, %cst_63 {dimension_numbers = #tpu.dot_dimension_numbers<[1], [0], [0], [1], [0, 0, 1, 1], [], []>} : vector<64x64xf32>, vector<64x16xf32>, vector<64x16xf32> -> vector<64x16xf32>
    %cst_64 = arith.constant dense<0.000000e+00> : vector<64x64xf32>
    %87 = tpu.matmul %80, %83, %cst_64 {dimension_numbers = #tpu.dot_dimension_numbers<[1], [1], [0], [0], [0, 0, 1, 0], [], []>} : vector<64x16xf32>, vector<64x16xf32>, vector<64x64xf32> -> vector<64x64xf32>
    %cst_65 = arith.constant dense<0xFF800000> : vector<64xf32>
    %88 = vector.multi_reduction <maximumf>, %87, %cst_65 [1] : vector<64x64xf32> to vector<64xf32>
    %89 = vector.shape_cast %88 : vector<64xf32> to vector<64x1xf32>
    %90 = vector.broadcast %89 : vector<64x1xf32> to vector<64x64xf32>
    %91 = arith.subf %87, %90 : vector<64x64xf32>
    %92 = math.exp %91 : vector<64x64xf32>
    %cst_66 = arith.constant dense<0.000000e+00> : vector<64xf32>
    %93 = vector.multi_reduction <add>, %92, %cst_66 [1] : vector<64x64xf32> to vector<64xf32>
    %94 = vector.shape_cast %93 : vector<64xf32> to vector<64x1xf32>
    %95 = vector.broadcast %94 : vector<64x1xf32> to vector<64x64xf32>
    %96 = arith.divf %92, %95 : vector<64x64xf32>
    %cst_67 = arith.constant dense<0.000000e+00> : vector<64x16xf32>
    %97 = tpu.matmul %96, %86, %cst_67 {dimension_numbers = #tpu.dot_dimension_numbers<[1], [0], [0], [1], [0, 0, 1, 1], [], []>} : vector<64x64xf32>, vector<64x16xf32>, vector<64x16xf32> -> vector<64x16xf32>
    %c2_68 = arith.constant 2 : index
    %c0_69 = arith.constant 0 : index
    %c0_70 = arith.constant 0 : index
    %98 = vector.load %arg9[%c2_68, %c0_69, %c0_70] : memref<4x16x64xf32, #tpu.memory_space<vmem>>, vector<1x16x64xf32>
    %99 = vector.shape_cast %98 : vector<1x16x64xf32> to vector<16x64xf32>
    %cst_71 = arith.constant dense<0.000000e+00> : vector<64x64xf32>
    %100 = tpu.matmul %97, %99, %cst_71 {dimension_numbers = #tpu.dot_dimension_numbers<[1], [0], [0], [1], [0, 0, 1, 1], [], []>} : vector<64x16xf32>, vector<16x64xf32>, vector<64x64xf32> -> vector<64x64xf32>
    %101 = arith.addf %75, %100 : vector<64x64xf32>
    %c3 = arith.constant 3 : index
    %c0_72 = arith.constant 0 : index
    %c0_73 = arith.constant 0 : index
    %102 = vector.load %arg6[%c3, %c0_72, %c0_73] : memref<4x64x16xf32, #tpu.memory_space<vmem>>, vector<1x64x16xf32>
    %103 = vector.shape_cast %102 : vector<1x64x16xf32> to vector<64x16xf32>
    %cst_74 = arith.constant dense<0.000000e+00> : vector<64x16xf32>
    %104 = tpu.matmul %24, %103, %cst_74 {dimension_numbers = #tpu.dot_dimension_numbers<[1], [0], [0], [1], [0, 0, 1, 1], [], []>} : vector<64x64xf32>, vector<64x16xf32>, vector<64x16xf32> -> vector<64x16xf32>
    %cst_75 = arith.constant 2.500000e-01 : f32
    %105 = vector.broadcast %cst_75 : f32 to vector<64x16xf32>
    %106 = arith.mulf %104, %105 : vector<64x16xf32>
    %c3_76 = arith.constant 3 : index
    %c0_77 = arith.constant 0 : index
    %c0_78 = arith.constant 0 : index
    %107 = vector.load %arg7[%c3_76, %c0_77, %c0_78] : memref<4x64x16xf32, #tpu.memory_space<vmem>>, vector<1x64x16xf32>
    %108 = vector.shape_cast %107 : vector<1x64x16xf32> to vector<64x16xf32>
    %cst_79 = arith.constant dense<0.000000e+00> : vector<64x16xf32>
    %109 = tpu.matmul %24, %108, %cst_79 {dimension_numbers = #tpu.dot_dimension_numbers<[1], [0], [0], [1], [0, 0, 1, 1], [], []>} : vector<64x64xf32>, vector<64x16xf32>, vector<64x16xf32> -> vector<64x16xf32>
    %c3_80 = arith.constant 3 : index
    %c0_81 = arith.constant 0 : index
    %c0_82 = arith.constant 0 : index
    %110 = vector.load %arg8[%c3_80, %c0_81, %c0_82] : memref<4x64x16xf32, #tpu.memory_space<vmem>>, vector<1x64x16xf32>
    %111 = vector.shape_cast %110 : vector<1x64x16xf32> to vector<64x16xf32>
    %cst_83 = arith.constant dense<0.000000e+00> : vector<64x16xf32>
    %112 = tpu.matmul %24, %111, %cst_83 {dimension_numbers = #tpu.dot_dimension_numbers<[1], [0], [0], [1], [0, 0, 1, 1], [], []>} : vector<64x64xf32>, vector<64x16xf32>, vector<64x16xf32> -> vector<64x16xf32>
    %cst_84 = arith.constant dense<0.000000e+00> : vector<64x64xf32>
    %113 = tpu.matmul %106, %109, %cst_84 {dimension_numbers = #tpu.dot_dimension_numbers<[1], [1], [0], [0], [0, 0, 1, 0], [], []>} : vector<64x16xf32>, vector<64x16xf32>, vector<64x64xf32> -> vector<64x64xf32>
    %cst_85 = arith.constant dense<0xFF800000> : vector<64xf32>
    %114 = vector.multi_reduction <maximumf>, %113, %cst_85 [1] : vector<64x64xf32> to vector<64xf32>
    %115 = vector.shape_cast %114 : vector<64xf32> to vector<64x1xf32>
    %116 = vector.broadcast %115 : vector<64x1xf32> to vector<64x64xf32>
    %117 = arith.subf %113, %116 : vector<64x64xf32>
    %118 = math.exp %117 : vector<64x64xf32>
    %cst_86 = arith.constant dense<0.000000e+00> : vector<64xf32>
    %119 = vector.multi_reduction <add>, %118, %cst_86 [1] : vector<64x64xf32> to vector<64xf32>
    %120 = vector.shape_cast %119 : vector<64xf32> to vector<64x1xf32>
    %121 = vector.broadcast %120 : vector<64x1xf32> to vector<64x64xf32>
    %122 = arith.divf %118, %121 : vector<64x64xf32>
    %cst_87 = arith.constant dense<0.000000e+00> : vector<64x16xf32>
    %123 = tpu.matmul %122, %112, %cst_87 {dimension_numbers = #tpu.dot_dimension_numbers<[1], [0], [0], [1], [0, 0, 1, 1], [], []>} : vector<64x64xf32>, vector<64x16xf32>, vector<64x16xf32> -> vector<64x16xf32>
    %c3_88 = arith.constant 3 : index
    %c0_89 = arith.constant 0 : index
    %c0_90 = arith.constant 0 : index
    %124 = vector.load %arg9[%c3_88, %c0_89, %c0_90] : memref<4x16x64xf32, #tpu.memory_space<vmem>>, vector<1x16x64xf32>
    %125 = vector.shape_cast %124 : vector<1x16x64xf32> to vector<16x64xf32>
    %cst_91 = arith.constant dense<0.000000e+00> : vector<64x64xf32>
    %126 = tpu.matmul %123, %125, %cst_91 {dimension_numbers = #tpu.dot_dimension_numbers<[1], [0], [0], [1], [0, 0, 1, 1], [], []>} : vector<64x16xf32>, vector<16x64xf32>, vector<64x64xf32> -> vector<64x64xf32>
    %127 = arith.addf %101, %126 : vector<64x64xf32>
    %c0_92 = arith.constant 0 : index
    %c0_93 = arith.constant 0 : index
    %128 = vector.load %arg10[%c0_92, %c0_93] : memref<1x64xf32, #tpu.memory_space<vmem>>, vector<1x64xf32>
    %129 = vector.broadcast %128 : vector<1x64xf32> to vector<64x64xf32>
    %130 = arith.addf %127, %129 : vector<64x64xf32>
    %131 = arith.addf %2, %130 : vector<64x64xf32>
    %c0_94 = arith.constant 0 : index
    %c0_95 = arith.constant 0 : index
    %132 = vector.load %arg11[%c0_94, %c0_95] : memref<1x64xf32, #tpu.memory_space<vmem>>, vector<1x64xf32>
    %c0_96 = arith.constant 0 : index
    %c0_97 = arith.constant 0 : index
    %133 = vector.load %arg12[%c0_96, %c0_97] : memref<1x64xf32, #tpu.memory_space<vmem>>, vector<1x64xf32>
    %cst_98 = arith.constant dense<0.000000e+00> : vector<64xf32>
    %134 = vector.multi_reduction <add>, %131, %cst_98 [1] : vector<64x64xf32> to vector<64xf32>
    %135 = vector.shape_cast %134 : vector<64xf32> to vector<64x1xf32>
    %cst_99 = arith.constant 6.400000e+01 : f32
    %136 = vector.broadcast %cst_99 : f32 to vector<64x1xf32>
    %137 = arith.divf %135, %136 : vector<64x1xf32>
    %138 = vector.broadcast %137 : vector<64x1xf32> to vector<64x64xf32>
    %139 = arith.subf %131, %138 : vector<64x64xf32>
    %140 = arith.mulf %139, %139 : vector<64x64xf32>
    %cst_100 = arith.constant dense<0.000000e+00> : vector<64xf32>
    %141 = vector.multi_reduction <add>, %140, %cst_100 [1] : vector<64x64xf32> to vector<64xf32>
    %142 = vector.shape_cast %141 : vector<64xf32> to vector<64x1xf32>
    %cst_101 = arith.constant 6.400000e+01 : f32
    %143 = vector.broadcast %cst_101 : f32 to vector<64x1xf32>
    %144 = arith.divf %142, %143 : vector<64x1xf32>
    %cst_102 = arith.constant 9.99999974E-6 : f32
    %145 = vector.broadcast %cst_102 : f32 to vector<64x1xf32>
    %146 = arith.addf %144, %145 : vector<64x1xf32>
    %147 = math.rsqrt %146 : vector<64x1xf32>
    %148 = vector.broadcast %147 : vector<64x1xf32> to vector<64x64xf32>
    %149 = arith.mulf %139, %148 : vector<64x64xf32>
    %150 = vector.broadcast %132 : vector<1x64xf32> to vector<64x64xf32>
    %151 = arith.mulf %149, %150 : vector<64x64xf32>
    %152 = vector.broadcast %133 : vector<1x64xf32> to vector<64x64xf32>
    %153 = arith.addf %151, %152 : vector<64x64xf32>
    %c0_103 = arith.constant 0 : index
    %c0_104 = arith.constant 0 : index
    %154 = vector.load %arg13[%c0_103, %c0_104] : memref<64x256xf32, #tpu.memory_space<vmem>>, vector<64x256xf32>
    %cst_105 = arith.constant dense<0.000000e+00> : vector<64x256xf32>
    %155 = tpu.matmul %153, %154, %cst_105 {dimension_numbers = #tpu.dot_dimension_numbers<[1], [0], [0], [1], [0, 0, 1, 1], [], []>} : vector<64x64xf32>, vector<64x256xf32>, vector<64x256xf32> -> vector<64x256xf32>
    %c0_106 = arith.constant 0 : index
    %c0_107 = arith.constant 0 : index
    %156 = vector.load %arg14[%c0_106, %c0_107] : memref<1x256xf32, #tpu.memory_space<vmem>>, vector<1x256xf32>
    %157 = vector.broadcast %156 : vector<1x256xf32> to vector<64x256xf32>
    %158 = arith.addf %155, %157 : vector<64x256xf32>
    %cst_108 = arith.constant 5.000000e-01 : f32
    %159 = vector.broadcast %cst_108 : f32 to vector<64x256xf32>
    %160 = arith.mulf %159, %158 : vector<64x256xf32>
    %cst_109 = arith.constant 0.707106769 : f32
    %161 = vector.broadcast %cst_109 : f32 to vector<64x256xf32>
    %162 = arith.mulf %158, %161 : vector<64x256xf32>
    %163 = math.absf %162 : vector<64x256xf32>
    %cst_110 = arith.constant 0.327591091 : f32
    %164 = vector.broadcast %cst_110 : f32 to vector<64x256xf32>
    %165 = arith.mulf %164, %163 : vector<64x256xf32>
    %cst_111 = arith.constant 1.000000e+00 : f32
    %166 = vector.broadcast %cst_111 : f32 to vector<64x256xf32>
    %167 = arith.addf %166, %165 : vector<64x256xf32>
    %cst_112 = arith.constant 1.000000e+00 : f32
    %168 = vector.broadcast %cst_112 : f32 to vector<64x256xf32>
    %169 = arith.divf %168, %167 : vector<64x256xf32>
    %cst_113 = arith.constant 1.06140542 : f32
    %170 = vector.broadcast %cst_113 : f32 to vector<64x256xf32>
    %171 = arith.mulf %170, %169 : vector<64x256xf32>
    %cst_114 = arith.constant -1.45315206 : f32
    %172 = vector.broadcast %cst_114 : f32 to vector<64x256xf32>
    %173 = arith.addf %171, %172 : vector<64x256xf32>
    %174 = arith.mulf %173, %169 : vector<64x256xf32>
    %cst_115 = arith.constant 1.42141378 : f32
    %175 = vector.broadcast %cst_115 : f32 to vector<64x256xf32>
    %176 = arith.addf %174, %175 : vector<64x256xf32>
    %177 = arith.mulf %176, %169 : vector<64x256xf32>
    %cst_116 = arith.constant -0.284496725 : f32
    %178 = vector.broadcast %cst_116 : f32 to vector<64x256xf32>
    %179 = arith.addf %177, %178 : vector<64x256xf32>
    %180 = arith.mulf %179, %169 : vector<64x256xf32>
    %cst_117 = arith.constant 0.254829586 : f32
    %181 = vector.broadcast %cst_117 : f32 to vector<64x256xf32>
    %182 = arith.addf %180, %181 : vector<64x256xf32>
    %183 = arith.mulf %182, %169 : vector<64x256xf32>
    %cst_118 = arith.constant 0.000000e+00 : f32
    %184 = vector.broadcast %cst_118 : f32 to vector<64x256xf32>
    %185 = arith.subf %184, %163 : vector<64x256xf32>
    %186 = arith.mulf %185, %163 : vector<64x256xf32>
    %187 = math.exp %186 : vector<64x256xf32>
    %188 = arith.mulf %183, %187 : vector<64x256xf32>
    %cst_119 = arith.constant 1.000000e+00 : f32
    %189 = vector.broadcast %cst_119 : f32 to vector<64x256xf32>
    %190 = arith.subf %189, %188 : vector<64x256xf32>
    %cst_120 = arith.constant 0.000000e+00 : f32
    %191 = vector.broadcast %cst_120 : f32 to vector<64x256xf32>
    %192 = arith.cmpf oge, %162, %191 : vector<64x256xf32>
    %cst_121 = arith.constant 0.000000e+00 : f32
    %193 = vector.broadcast %cst_121 : f32 to vector<64x256xf32>
    %194 = arith.subf %193, %190 : vector<64x256xf32>
    %195 = arith.select %192, %190, %194 : vector<64x256xi1>, vector<64x256xf32>
    %cst_122 = arith.constant 1.000000e+00 : f32
    %196 = vector.broadcast %cst_122 : f32 to vector<64x256xf32>
    %197 = arith.addf %196, %195 : vector<64x256xf32>
    %198 = arith.mulf %160, %197 : vector<64x256xf32>
    %c0_123 = arith.constant 0 : index
    %c0_124 = arith.constant 0 : index
    %199 = vector.load %arg15[%c0_123, %c0_124] : memref<256x64xf32, #tpu.memory_space<vmem>>, vector<256x64xf32>
    %cst_125 = arith.constant dense<0.000000e+00> : vector<64x64xf32>
    %200 = tpu.matmul %198, %199, %cst_125 {dimension_numbers = #tpu.dot_dimension_numbers<[1], [0], [0], [1], [0, 0, 1, 1], [], []>} : vector<64x256xf32>, vector<256x64xf32>, vector<64x64xf32> -> vector<64x64xf32>
    %201 = arith.addf %131, %200 : vector<64x64xf32>
    %c0_126 = arith.constant 0 : index
    %c0_127 = arith.constant 0 : index
    %202 = vector.load %arg16[%c0_126, %c0_127] : memref<1x64xf32, #tpu.memory_space<vmem>>, vector<1x64xf32>
    %203 = vector.broadcast %202 : vector<1x64xf32> to vector<64x64xf32>
    %204 = arith.addf %201, %203 : vector<64x64xf32>
    %205 = vector.shape_cast %204 : vector<64x64xf32> to vector<8x8x64xf32>
    %c0_128 = arith.constant 0 : index
    %c0_129 = arith.constant 0 : index
    %c0_130 = arith.constant 0 : index
    %c0_131 = arith.constant 0 : index
    %206 = vector.load %arg17[%c0_128, %c0_129, %c0_130, %c0_131] : memref<1x8x8x64xf32, #tpu.memory_space<vmem>>, vector<1x8x8x64xf32>
    %207 = vector.shape_cast %206 : vector<1x8x8x64xf32> to vector<8x8x64xf32>
    %208 = vector.shape_cast %205 : vector<8x8x64xf32> to vector<1x8x8x64xf32>
    tpu.vector_store %arg17[%c0_128, %c0_129, %c0_130, %c0_131], %208 {strides = array<i32>} : memref<1x8x8x64xf32, #tpu.memory_space<vmem>>, vector<1x8x8x64xf32>,
    return
  }
  func.func @transform_0(%arg0: i32, %arg1: i32, %arg2: i32) -> (i32, i32, i32, i32) {
    %c0_i32 = arith.constant 0 : i32
    %c0_i32_0 = arith.constant 0 : i32
    return %arg0, %arg1, %arg2, %c0_i32 : i32, i32, i32, i32
  }
  func.func @transform_1(%arg0: i32, %arg1: i32, %arg2: i32) -> (i32, i32) {
    %c0_i32 = arith.constant 0 : i32
    %c0_i32_0 = arith.constant 0 : i32
    %c0_i32_1 = arith.constant 0 : i32
    return %c0_i32, %c0_i32_0 : i32, i32
  }
  func.func @transform_2(%arg0: i32, %arg1: i32, %arg2: i32) -> (i32, i32) {
    %c0_i32 = arith.constant 0 : i32
    %c0_i32_0 = arith.constant 0 : i32
    %c0_i32_1 = arith.constant 0 : i32
    return %c0_i32, %c0_i32_0 : i32, i32
  }
  func.func @transform_3(%arg0: i32, %arg1: i32, %arg2: i32) -> (i32, i32, i32) {
    %c0_i32 = arith.constant 0 : i32
    %c0_i32_0 = arith.constant 0 : i32
    %c0_i32_1 = arith.constant 0 : i32
    %c0_i32_2 = arith.constant 0 : i32
    return %c0_i32, %c0_i32_0, %c0_i32_1 : i32, i32, i32
  }
  func.func @transform_4(%arg0: i32, %arg1: i32, %arg2: i32) -> (i32, i32, i32) {
    %c0_i32 = arith.constant 0 : i32
    %c0_i32_0 = arith.constant 0 : i32
    %c0_i32_1 = arith.constant 0 : i32
    %c0_i32_2 = arith.constant 0 : i32
    return %c0_i32, %c0_i32_0, %c0_i32_1 : i32, i32, i32
  }
  func.func @transform_5(%arg0: i32, %arg1: i32, %arg2: i32) -> (i32, i32, i32) {
    %c0_i32 = arith.constant 0 : i32
    %c0_i32_0 = arith.constant 0 : i32
    %c0_i32_1 = arith.constant 0 : i32
    %c0_i32_2 = arith.constant 0 : i32
    return %c0_i32, %c0_i32_0, %c0_i32_1 : i32, i32, i32
  }
  func.func @transform_6(%arg0: i32, %arg1: i32, %arg2: i32) -> (i32, i32, i32) {
    %c0_i32 = arith.constant 0 : i32
    %c0_i32_0 = arith.constant 0 : i32
    %c0_i32_1 = arith.constant 0 : i32
    %c0_i32_2 = arith.constant 0 : i32
    return %c0_i32, %c0_i32_0, %c0_i32_1 : i32, i32, i32
  }
  func.func @transform_7(%arg0: i32, %arg1: i32, %arg2: i32) -> (i32, i32) {
    %c0_i32 = arith.constant 0 : i32
    %c0_i32_0 = arith.constant 0 : i32
    %c0_i32_1 = arith.constant 0 : i32
    return %c0_i32, %c0_i32_0 : i32, i32
  }
  func.func @transform_8(%arg0: i32, %arg1: i32, %arg2: i32) -> (i32, i32) {
    %c0_i32 = arith.constant 0 : i32
    %c0_i32_0 = arith.constant 0 : i32
    %c0_i32_1 = arith.constant 0 : i32
    return %c0_i32, %c0_i32_0 : i32, i32
  }
  func.func @transform_9(%arg0: i32, %arg1: i32, %arg2: i32) -> (i32, i32) {
    %c0_i32 = arith.constant 0 : i32
    %c0_i32_0 = arith.constant 0 : i32
    %c0_i32_1 = arith.constant 0 : i32
    return %c0_i32, %c0_i32_0 : i32, i32
  }
  func.func @transform_10(%arg0: i32, %arg1: i32, %arg2: i32) -> (i32, i32) {
    %c0_i32 = arith.constant 0 : i32
    %c0_i32_0 = arith.constant 0 : i32
    %c0_i32_1 = arith.constant 0 : i32
    return %c0_i32, %c0_i32_0 : i32, i32
  }
  func.func @transform_11(%arg0: i32, %arg1: i32, %arg2: i32) -> (i32, i32) {
    %c0_i32 = arith.constant 0 : i32
    %c0_i32_0 = arith.constant 0 : i32
    %c0_i32_1 = arith.constant 0 : i32
    return %c0_i32, %c0_i32_0 : i32, i32
  }
  func.func @transform_12(%arg0: i32, %arg1: i32, %arg2: i32) -> (i32, i32) {
    %c0_i32 = arith.constant 0 : i32
    %c0_i32_0 = arith.constant 0 : i32
    %c0_i32_1 = arith.constant 0 : i32
    return %c0_i32, %c0_i32_0 : i32, i32
  }
  func.func @transform_13(%arg0: i32, %arg1: i32, %arg2: i32) -> (i32, i32) {
    %c0_i32 = arith.constant 0 : i32
    %c0_i32_0 = arith.constant 0 : i32
    %c0_i32_1 = arith.constant 0 : i32
    return %c0_i32, %c0_i32_0 : i32, i32
  }
  func.func @transform_14(%arg0: i32, %arg1: i32, %arg2: i32) -> (i32, i32, i32, i32) {
    %c0_i32 = arith.constant 0 : i32
    %c0_i32_0 = arith.constant 0 : i32
    return %arg0, %arg1, %arg2, %c0_i32 : i32, i32, i32, i32
  }
}

</mosaic_0001>

<bundles_post_ra>
// kernel: transformer_pallas.2
= control target key start
LH: loop header
LB: loop body
LE: loop exit
PB: predicated region body
PF: predicated region fallthrough
CT: control target
= control target key end

     0   :  { %s1382_s12 = smov 0   ;;  %s2327_s0 = inlined_call_operand.vmem [shape: f32[2,16,16,64], index: 0, kind: input, shape index: {}]   ;;  %s2328_s1 = inlined_call_operand.vmem [shape: f32[9,64], index: 1, kind: input, shape index: {}]   ;;  %s2329_s2 = inlined_call_operand.vmem [shape: f32[1,64], index: 2, kind: input, shape index: {}]   ;;  %s2330_s3 = inlined_call_operand.vmem [shape: f32[2,16,16,64], index: 3, kind: output, shape index: {}]  }
   0x1 LB: > { %s1326_s13 = sadd.s32 4294967295, %s1359_s12   ;;  %p1330_p0 = scmp.ge.s32.totalorder %s1359_s12, 1  ;;  %s1359_s12 = sphi %s1382_s12, %s13_s12  }
   0x2   : > { %p137_p1 = scmp.lt.s32.totalorder %s1359_s12, 3 }
   0x4   : > { %p138_p2 = pnand %p1330_p0, %p137_p1 }
   0x6   : > { %141 = sbr.rel (%p138_p2) target bundleno = 231 (0xe7), region = 32 }
   0xb   : > { %p161_p3 = scmp.lt.s32.totalorder %s1326_s13, 1  ;;  %p1335_p4 = scmp.ne.s32.totalorder %s1326_s13, 0 }
   0xd   : > { %s162_s14 = scalar_select %p161_p3, %s1326_s13, 1 }
   0xe   : > { %174 = sbr.rel (%p1335_p4) target bundleno = 47 (0x2f), region = 36 }
   0xf   : > { %s1340_s15 = sshll.u32 %s162_s14, 8 }
  0x10   : > { %s1393_s18 = scalar_lea.vmem %s2327_s0, %s1340_s15  ;;  %s1398_s21 = scalar_lea.vmem %s2330_s3, %s1340_s15 }
  0x13   : > { %vm175_vm0 = vcmask 523264   ;;  %vm178_vm1 = vcmask 517120   ;;  %v1361_v0 = vmov 0.0  }
  0x14   : > { %176 = vst.msk [vmem:[#allocation2] sm:$0xff] %vm175_vm0, %v1361_v0  ;;  %177 = vst.msk [vmem:[#allocation2 + $0x8] sm:$0xff] %vm175_vm0, %v1361_v0 }
  0x15   : > { %180 = vst.msk [vmem:[#allocation2 + $0x18] sm:$0xff] %vm175_vm0, %v1361_v0  ;;  %181 = vst.msk [vmem:[#allocation2 + $0x20] sm:$0xff] %vm175_vm0, %v1361_v0 }
  0x16   : > { %183 = vst.msk [vmem:[#allocation2 + $0x30] sm:$0xff] %vm175_vm0, %v1361_v0  ;;  %184 = vst.msk [vmem:[#allocation2 + $0x38] sm:$0xff] %vm175_vm0, %v1361_v0 }
  0x17   : > { %186 = vst.msk [vmem:[#allocation2 + $0x48] sm:$0xff] %vm175_vm0, %v1361_v0  ;;  %187 = vst.msk [vmem:[#allocation2 + $0x50] sm:$0xff] %vm175_vm0, %v1361_v0 }
  0x18   : > { %189 = vst.msk [vmem:[#allocation2 + $0x60] sm:$0xff] %vm175_vm0, %v1361_v0  ;;  %190 = vst.msk [vmem:[#allocation2 + $0x68] sm:$0xff] %vm175_vm0, %v1361_v0 }
  0x19   : > { %192 = vst.msk [vmem:[#allocation2 + $0x78] sm:$0xff] %vm175_vm0, %v1361_v0  ;;  %193 = vst.msk [vmem:[#allocation2 + $0x80] sm:$0xff] %vm175_vm0, %v1361_v0 }
  0x1a   : > { %195 = vst.msk [vmem:[#allocation2 + $0x90] sm:$0xff] %vm175_vm0, %v1361_v0  ;;  %196 = vst.msk [vmem:[#allocation2 + $0x98] sm:$0xff] %vm175_vm0, %v1361_v0 }
  0x1b   : > { %198 = vst.msk [vmem:[#allocation2 + $0xa8] sm:$0xff] %vm175_vm0, %v1361_v0  ;;  %199 = vst.msk [vmem:[#allocation2 + $0xb0] sm:$0xff] %vm175_vm0, %v1361_v0 }
  0x1c   : > { %201 = vst.msk [vmem:[#allocation2 + $0xc0] sm:$0xff] %vm175_vm0, %v1361_v0  ;;  %202 = vst.msk [vmem:[#allocation2 + $0xc8] sm:$0xff] %vm175_vm0, %v1361_v0 }
  0x1d   : > { %204 = vst.msk [vmem:[#allocation2 + $0xd8] sm:$0xff] %vm175_vm0, %v1361_v0  ;;  %205 = vst.msk [vmem:[#allocation2 + $0xe0] sm:$0xff] %vm175_vm0, %v1361_v0 }
  0x1e   : > { %207 = vst.msk [vmem:[#allocation2 + $0xf0] sm:$0xff] %vm175_vm0, %v1361_v0  ;;  %208 = vst.msk [vmem:[#allocation2 + $0xf8] sm:$0xff] %vm175_vm0, %v1361_v0 }
  0x1f   : > { %210 = vst.msk [vmem:[#allocation2 + $0x108] sm:$0xff] %vm175_vm0, %v1361_v0  ;;  %211 = vst.msk [vmem:[#allocation2 + $0x110] sm:$0xff] %vm175_vm0, %v1361_v0 }
  0x20   : > { %213 = vst.msk [vmem:[#allocation2 + $0x120] sm:$0xff] %vm175_vm0, %v1361_v0  ;;  %214 = vst.msk [vmem:[#allocation2 + $0x128] sm:$0xff] %vm175_vm0, %v1361_v0 }
  0x21   : > { %216 = vst.msk [vmem:[#allocation2 + $0x138] sm:$0xff] %vm175_vm0, %v1361_v0  ;;  %217 = vst.msk [vmem:[#allocation2 + $0x140] sm:$0xff] %vm175_vm0, %v1361_v0 }
  0x22   : > { %219 = vst.msk [vmem:[#allocation2 + $0x150] sm:$0xff] %vm175_vm0, %v1361_v0  ;;  %220 = vst.msk [vmem:[#allocation2 + $0x158] sm:$0xff] %vm175_vm0, %v1361_v0 }
  0x23   : > { %222 = vst.msk [vmem:[#allocation2 + $0x168] sm:$0xff] %vm175_vm0, %v1361_v0  ;;  %223 = vst.msk [vmem:[#allocation2 + $0x170] sm:$0xff] %vm175_vm0, %v1361_v0 }
  0x24   : > { %225 = vst.msk [vmem:[#allocation2 + $0x180] sm:$0xff] %vm175_vm0, %v1361_v0  ;;  %226 = vst.msk [vmem:[#allocation2 + $0x188] sm:$0xff] %vm175_vm0, %v1361_v0 }
  0x25   : > { %228 = vst.msk [vmem:[#allocation2 + $0x198] sm:$0xff] %vm175_vm0, %v1361_v0  ;;  %229 = vst.msk [vmem:[#allocation2 + $0x1a0] sm:$0xff] %vm175_vm0, %v1361_v0 }
  0x26   : > { %179 = vst.msk [vmem:[#allocation2 + $0x10] sm:$0x3] %vm178_vm1, %v1361_v0  ;;  %182 = vst.msk [vmem:[#allocation2 + $0x28] sm:$0x3] %vm178_vm1, %v1361_v0 }
  0x27   : > { %185 = vst.msk [vmem:[#allocation2 + $0x40] sm:$0x3] %vm178_vm1, %v1361_v0  ;;  %188 = vst.msk [vmem:[#allocation2 + $0x58] sm:$0x3] %vm178_vm1, %v1361_v0 }
  0x28   : > { %191 = vst.msk [vmem:[#allocation2 + $0x70] sm:$0x3] %vm178_vm1, %v1361_v0  ;;  %194 = vst.msk [vmem:[#allocation2 + $0x88] sm:$0x3] %vm178_vm1, %v1361_v0 }
  0x29   : > { %197 = vst.msk [vmem:[#allocation2 + $0xa0] sm:$0x3] %vm178_vm1, %v1361_v0  ;;  %200 = vst.msk [vmem:[#allocation2 + $0xb8] sm:$0x3] %vm178_vm1, %v1361_v0 }
  0x2a   : > { %203 = vst.msk [vmem:[#allocation2 + $0xd0] sm:$0x3] %vm178_vm1, %v1361_v0  ;;  %206 = vst.msk [vmem:[#allocation2 + $0xe8] sm:$0x3] %vm178_vm1, %v1361_v0 }
  0x2b   : > { %209 = vst.msk [vmem:[#allocation2 + $0x100] sm:$0x3] %vm178_vm1, %v1361_v0  ;;  %212 = vst.msk [vmem:[#allocation2 + $0x118] sm:$0x3] %vm178_vm1, %v1361_v0 }
  0x2c   : > { %215 = vst.msk [vmem:[#allocation2 + $0x130] sm:$0x3] %vm178_vm1, %v1361_v0  ;;  %218 = vst.msk [vmem:[#allocation2 + $0x148] sm:$0x3] %vm178_vm1, %v1361_v0 }
  0x2d   : > { %221 = vst.msk [vmem:[#allocation2 + $0x160] sm:$0x3] %vm178_vm1, %v1361_v0  ;;  %224 = vst.msk [vmem:[#allocation2 + $0x178] sm:$0x3] %vm178_vm1, %v1361_v0 }
  0x2e   : > { %227 = vst.msk [vmem:[#allocation2 + $0x190] sm:$0x3] %vm178_vm1, %v1361_v0  ;;  %230 = vst.msk [vmem:[#allocation2 + $0x1a8] sm:$0x3] %vm178_vm1, %v1361_v0 }
  0x2f PF: > { %v1455_v1 = vld [vmem:[%s1393_s18] sm:$0xff]  ;;  %vm264_vm2 = vcmask 523264   ;;  %v1458_v2 = vld [vmem:[%s1393_s18 + $0x8] sm:$0xff]  ;;  %v1461_v3 = vld [vmem:[%s1393_s18 + $0x10] sm:$0xff]  ;;  %v331_v4 = vlaneseq }
  0x30   : > { %265 = vst.msk [vmem:[#allocation2 + $0x19] sm:$0xff] %vm264_vm2, %v1455_v1  ;;  %266 = vst.msk [vmem:[#allocation2 + $0x21] sm:$0xff] %vm264_vm2, %v1458_v2  ;;  %v1470_v5 = vld [vmem:[%s1393_s18 + $0x18] sm:$0xff]  ;;  %v1473_v6 = vld [vmem:[%s1393_s18 + $0x20] sm:$0xff] }
  0x31   : > { %267 = vst.msk [vmem:[#allocation2 + $0x31] sm:$0xff] %vm264_vm2, %v1461_v3  ;;  %v1476_v7 = vld [vmem:[%s1393_s18 + $0x28] sm:$0xff]  ;;  %268 = vst.msk [vmem:[#allocation2 + $0x39] sm:$0xff] %vm264_vm2, %v1470_v5  ;;  %v1485_v8 = vld [vmem:[%s1393_s18 + $0x30] sm:$0xff]  ;;  %v1508_v14 = vshrl.u32 %v331_v4, 7 }
  0x32   : > { %269 = vst.msk [vmem:[#allocation2 + $0x49] sm:$0xff] %vm264_vm2, %v1473_v6  ;;  %270 = vst.msk [vmem:[#allocation2 + $0x51] sm:$0xff] %vm264_vm2, %v1476_v7  ;;  %v1488_v9 = vld [vmem:[%s1393_s18 + $0x38] sm:$0xff]  ;;  %v1491_v10 = vld [vmem:[%s1393_s18 + $0x40] sm:$0xff] }
  0x33   : > { %271 = vst.msk [vmem:[#allocation2 + $0x61] sm:$0xff] %vm264_vm2, %v1485_v8  ;;  %272 = vst.msk [vmem:[#allocation2 + $0x69] sm:$0xff] %vm264_vm2, %v1488_v9  ;;  %v1500_v11 = vld [vmem:[%s1393_s18 + $0x48] sm:$0xff]  ;;  %v1503_v12 = vld [vmem:[%s1393_s18 + $0x50] sm:$0xff]  ;;  %v333_v27 = vsub.s32 0, %v1508_v14  ;;  %v401_v28 = vsub.s32 1, %v1508_v14 }
  0x34   : > { %273 = vst.msk [vmem:[#allocation2 + $0x79] sm:$0xff] %vm264_vm2, %v1491_v10  ;;  %v1506_v13 = vld [vmem:[%s1393_s18 + $0x58] sm:$0xff]  ;;  %274 = vst.msk [vmem:[#allocation2 + $0x81] sm:$0xff] %vm264_vm2, %v1500_v11  ;;  %v1517_v15 = vld [vmem:[%s1393_s18 + $0x60] sm:$0xff]  ;;  %v501_v29 = vsub.s32 2, %v1508_v14  ;;  %v601_v33 = vsub.s32 3, %v1508_v14 }
  0x35   : > { %275 = vst.msk [vmem:[#allocation2 + $0x91] sm:$0xff] %vm264_vm2, %v1503_v12  ;;  %276 = vst.msk [vmem:[#allocation2 + $0x99] sm:$0xff] %vm264_vm2, %v1506_v13  ;;  %v1520_v16 = vld [vmem:[%s1393_s18 + $0x68] sm:$0xff]  ;;  %v1523_v17 = vld [vmem:[%s1393_s18 + $0x70] sm:$0xff]  ;;  %v701_v34 = vsub.s32 4, %v1508_v14  ;;  %v801_v35 = vsub.s32 5, %v1508_v14 }
  0x36   : > { %277 = vst.msk [vmem:[#allocation2 + $0xa9] sm:$0xff] %vm264_vm2, %v1517_v15  ;;  %278 = vst.msk [vmem:[#allocation2 + $0xb1] sm:$0xff] %vm264_vm2, %v1520_v16  ;;  %v1532_v18 = vld [vmem:[%s1393_s18 + $0x78] sm:$0xff]  ;;  %v1535_v19 = vld [vmem:[%s1393_s18 + $0x80] sm:$0xff]  ;;  %v902_v39 = vsub.s32 6, %v1508_v14  ;;  %v1002_v43 = vsub.s32 7, %v1508_v14 }
  0x37   : > { %279 = vst.msk [vmem:[#allocation2 + $0xc1] sm:$0xff] %vm264_vm2, %v1523_v17  ;;  %v1538_v20 = vld [vmem:[%s1393_s18 + $0x88] sm:$0xff]  ;;  %280 = vst.msk [vmem:[#allocation2 + $0xc9] sm:$0xff] %vm264_vm2, %v1532_v18  ;;  %v1547_v21 = vld [vmem:[%s1393_s18 + $0x90] sm:$0xff] }
  0x38   : > { %2346 = vst [vmem:[#allocation3_spill] sm:$0xff] %v1538_v20  ;;  %281 = vst.msk [vmem:[#allocation2 + $0xd9] sm:$0xff] %vm264_vm2, %v1535_v19  ;;  %v1550_v22 = vld [vmem:[%s1393_s18 + $0x98] sm:$0xff]  ;;  %v1553_v23 = vld [vmem:[%s1393_s18 + $0xa0] sm:$0xff] }
  0x39   : > { %282 = vst.msk [vmem:[#allocation2 + $0xe1] sm:$0xff] %vm264_vm2, %v1538_v20  ;;  %2347 = vst [vmem:[#allocation4_spill] sm:$0xff] %v1547_v21  ;;  %v1562_v24 = vld [vmem:[%s1393_s18 + $0xa8] sm:$0xff]  ;;  %v1565_v25 = vld [vmem:[%s1393_s18 + $0xb0] sm:$0xff] }
  0x3a   : > { %2348 = vst [vmem:[#allocation5_spill] sm:$0xff] %v1550_v22  ;;  %2349 = vst [vmem:[#allocation6_spill] sm:$0xff] %v1553_v23  ;;  %v1568_v26 = vld [vmem:[%s1393_s18 + $0xb8] sm:$0xff]  ;;  %v1580_v30 = vld [vmem:[%s1393_s18 + $0xc0] sm:$0xff] }
  0x3b   : > { %283 = vst.msk [vmem:[#allocation2 + $0xf1] sm:$0xff] %vm264_vm2, %v1547_v21  ;;  %284 = vst.msk [vmem:[#allocation2 + $0xf9] sm:$0xff] %vm264_vm2, %v1550_v22  ;;  %v1583_v31 = vld [vmem:[%s1393_s18 + $0xc8] sm:$0xff]  ;;  %v1586_v32 = vld [vmem:[%s1393_s18 + $0xd0] sm:$0xff] }
  0x3c   : > { %285 = vst.msk [vmem:[#allocation2 + $0x109] sm:$0xff] %vm264_vm2, %v1553_v23  ;;  %2350 = vst [vmem:[#allocation7_spill] sm:$0xff] %v1562_v24  ;;  %v1598_v36 = vld [vmem:[%s1393_s18 + $0xd8] sm:$0xff]  ;;  %v1601_v37 = vld [vmem:[%s1393_s18 + $0xe0] sm:$0xff] }
  0x3d   : > { %2351 = vst [vmem:[#allocation8_spill] sm:$0xff] %v1565_v25  ;;  %2352 = vst [vmem:[#allocation9_spill] sm:$0xff] %v1568_v26  ;;  %v1604_v38 = vld [vmem:[%s1393_s18 + $0xe8] sm:$0xff]  ;;  %v1614_v40 = vld [vmem:[%s1393_s18 + $0xf0] sm:$0xff] }
  0x3e   : > { %286 = vst.msk [vmem:[#allocation2 + $0x111] sm:$0xff] %vm264_vm2, %v1562_v24  ;;  %287 = vst.msk [vmem:[#allocation2 + $0x121] sm:$0xff] %vm264_vm2, %v1565_v25  ;;  %v1617_v41 = vld [vmem:[%s1393_s18 + $0xf8] sm:$0xff]  ;;  %v297_v42 = vld [vmem:[%s2328_s1] sm:$0xff] }
  0x3f   : > { %288 = vst.msk [vmem:[#allocation2 + $0x129] sm:$0xff] %vm264_vm2, %v1568_v26  ;;  %2353 = vst [vmem:[#allocation10_spill] sm:$0xff] %v1580_v30  ;;  %v299_v44 = vld [vmem:[#allocation2] sm:$0xff]  ;;  %v1627_v45 = vrot.slane %v297_v42, %v333_v27  ;;  %v1629_v47 = vrot.slane %v297_v42, %v401_v28  ;;  %v1631_v48 = vrot.slane %v297_v42, %v501_v29  ;;  %v567_v50 = vld [vmem:[#allocation2 + $0x18] sm:$0xff] }
  0x40   : > { %2354 = vst [vmem:[#allocation11_spill] sm:$0xff] %v1583_v31  ;;  %2355 = vst [vmem:[#allocation12_spill] sm:$0xff] %v1586_v32  ;;  %v367_v46 = vld [vmem:[#allocation2 + $0x1] sm:$0xff]  ;;  %v1633_v51 = vrot.slane %v297_v42, %v601_v33  ;;  %v1635_v52 = vrot.slane %v297_v42, %v701_v34  ;;  %v1637_v53 = vrot.slane %v297_v42, %v801_v35  ;;  %v667_v58 = vld [vmem:[#allocation2 + $0x19] sm:$0xff] }
  0x41   : > { %289 = vst.msk [vmem:[#allocation2 + $0x139] sm:$0xff] %vm264_vm2, %v1580_v30  ;;  %290 = vst.msk [vmem:[#allocation2 + $0x141] sm:$0xff] %vm264_vm2, %v1583_v31  ;;  %v467_v49 = vld [vmem:[#allocation2 + $0x2] sm:$0xff]  ;;  %v335_v55 = vmul.f32 %v1627_v45, %v299_v44  ;;  %v403_v56 = vmul.f32 %v1629_v47, %v367_v46  ;;  %v767_v59 = vld [vmem:[#allocation2 + $0x1a] sm:$0xff]  ;;  %v1647_v60 = vrot.slane %v297_v42, %v902_v39 }
  0x42   : > { %291 = vst.msk [vmem:[#allocation2 + $0x151] sm:$0xff] %vm264_vm2, %v1586_v32  ;;  %2356 = vst [vmem:[#allocation13_spill] sm:$0xff] %v1598_v36  ;;  %v1642_v54 = vld [vmem:[%s2328_s1 + $0x8] ss:$0 sm:$0xff]  ;;  %v503_v57 = vmul.f32 %v1631_v48, %v467_v49  ;;  %v868_v61 = vld [vmem:[#allocation2 + $0x30] sm:$0xff]  ;;  %v1651_v63 = vrot.slane %v297_v42, %v1002_v43  ;;  %v337_v33 = vmul.f32 %v567_v50, %v1627_v45 }
  0x43   : > { %2357 = vst [vmem:[#allocation14_spill] sm:$0xff] %v1601_v37  ;;  %2358 = vst [vmem:[#allocation15_spill] sm:$0xff] %v1604_v38  ;;  %v1649_v62 = vld [vmem:[#allocation2 + $0x31] sm:$0xff]  ;;  %v300_v0 = vld [vmem:[#allocation2 + $0x8] sm:$0xff]  ;;  %v435_v4 = vadd.f32 %v403_v56, %v335_v55  ;;  %v603_v34 = vmul.f32 %v1633_v51, %v567_v50  ;;  %v405_v42 = vmul.f32 %v667_v58, %v1629_v47 }
  0x44   : > { %292 = vst.msk [vmem:[#allocation2 + $0x159] sm:$0xff] %vm264_vm2, %v1598_v36  ;;  %293 = vst.msk [vmem:[#allocation2 + $0x169] sm:$0xff] %vm264_vm2, %v1601_v37  ;;  %v1653_v14 = vld [vmem:[#allocation2 + $0x32] sm:$0xff]  ;;  %v336_v27 = vmul.f32 %v1627_v45, %v300_v0  ;;  %v368_v28 = vld [vmem:[#allocation2 + $0x9] sm:$0xff]  ;;  %v703_v49 = vmul.f32 %v1635_v52, %v667_v58  ;;  %v803_v55 = vmul.f32 %v1637_v53, %v767_v59 }
  0x45   : > { %294 = vst.msk [vmem:[#allocation2 + $0x171] sm:$0xff] %vm264_vm2, %v1604_v38  ;;  %2359 = vst [vmem:[#allocation16_spill] sm:$0xff] %v1614_v40  ;;  %v468_v29 = vld [vmem:[#allocation2 + $0xa] sm:$0xff]  ;;  %v404_v35 = vmul.f32 %v1629_v47, %v368_v28  ;;  %v568_v44 = vld [vmem:[#allocation2 + $0x20] sm:$0xff]  ;;  %v535_v43 = vadd.f32 %v503_v57, %v435_v4  ;;  %v904_v56 = vmul.f32 %v1647_v60, %v868_v61 }
  0x46   : > { %2360 = vst [vmem:[#allocation17_spill] sm:$0xff] %v1617_v41  ;;  %295 = vst.msk [vmem:[#allocation2 + $0x181] sm:$0xff] %vm264_vm2, %v1614_v40  ;;  %v504_v39 = vmul.f32 %v1631_v48, %v468_v29  ;;  %v668_v46 = vld [vmem:[#allocation2 + $0x21] sm:$0xff]  ;;  %v1666_v40 = vld [vmem:[#allocation2 + $0x39] sm:$0xff]  ;;  %v1004_v50 = vmul.f32 %v1651_v63, %v1649_v62  ;;  %v1104_v28 = vmul.f32 %v1642_v54, %v1653_v14 }
  0x47   : > { %296 = vst.msk [vmem:[#allocation2 + $0x189] sm:$0xff] %vm264_vm2, %v1617_v41  ;;  %v768_v0 = vld [vmem:[#allocation2 + $0x22] sm:$0xff]  ;;  %v1664_v41 = vld [vmem:[#allocation2 + $0x38] sm:$0xff]  ;;  %v436_v29 = vadd.f32 %v404_v35, %v336_v27  ;;  %v437_v38 = vadd.f32 %v405_v42, %v337_v33  ;;  %v635_v57 = vadd.f32 %v603_v34, %v535_v43  ;;  %v604_v58 = vmul.f32 %v1633_v51, %v568_v44  ;;  %v1692_v25 = vld [vmem:[#allocation2 + $0x4a] sm:$0xff] }
  0x48   : > { %v704_v4 = vmul.f32 %v1635_v52, %v668_v46  ;;  %v1674_v37 = vld [vmem:[#allocation2 + $0x3a] sm:$0xff]  ;;  %v505_v36 = vmul.f32 %v767_v59, %v1631_v48  ;;  %v804_v31 = vmul.f32 %v1637_v53, %v768_v0  ;;  %v905_v30 = vmul.f32 %v1647_v60, %v1664_v41  ;;  %v1682_v27 = vld [vmem:[#allocation2 + $0x48] sm:$0xff]  ;;  %v1707_v20 = vld [vmem:[#allocation2 + $0x50] sm:$0xff] }
  0x49   : > { %v536_v32 = vadd.f32 %v504_v39, %v436_v29  ;;  %v1005_v26 = vmul.f32 %v1651_v63, %v1666_v40  ;;  %v735_v33 = vadd.f32 %v703_v49, %v635_v57  ;;  %v605_v35 = vmul.f32 %v868_v61, %v1633_v51  ;;  %v1685_v42 = vld [vmem:[#allocation2 + $0x49] sm:$0xff] }
  0x4a   : > { %v537_v34 = vadd.f32 %v505_v36, %v437_v38  ;;  %v338_v43 = vmul.f32 %v568_v44, %v1627_v45  ;;  %v1105_v39 = vmul.f32 %v1642_v54, %v1674_v37  ;;  %v705_v29 = vmul.f32 %v1649_v62, %v1635_v52 }
  0x4b   : > { %v636_v59 = vadd.f32 %v604_v58, %v536_v32  ;;  %v406_v24 = vmul.f32 %v668_v46, %v1629_v47  ;;  %v835_v23 = vadd.f32 %v803_v55, %v735_v33  ;;  %v805_v36 = vmul.f32 %v1653_v14, %v1637_v53 }
  0x4c   : > { %v637_v49 = vadd.f32 %v605_v35, %v537_v34  ;;  %v906_v38 = vmul.f32 %v1647_v60, %v1682_v27  ;;  %v1006_v32 = vmul.f32 %v1651_v63, %v1685_v42  ;;  %v506_v58 = vmul.f32 %v768_v0, %v1631_v48 }
  0x4d   : > { %v736_v44 = vadd.f32 %v704_v4, %v636_v59  ;;  %v438_v57 = vadd.f32 %v406_v24, %v338_v43  ;;  %v936_v22 = vadd.f32 %v904_v56, %v835_v23  ;;  %v1106_v46 = vmul.f32 %v1642_v54, %v1692_v25  ;;  %v1709_v4 = vld [vmem:[#allocation2 + $0x51] sm:$0xff] }
  0x4e   : > { %v737_v21 = vadd.f32 %v705_v29, %v637_v49  ;;  %v339_v55 = vmul.f32 %v868_v61, %v1627_v45  ;;  %v606_v35 = vmul.f32 %v1664_v41, %v1633_v51  ;;  %v407_v24 = vmul.f32 %v1649_v62, %v1629_v47 }
  0x4f   : > { %v836_v33 = vadd.f32 %v804_v31, %v736_v44  ;;  %v538_v34 = vadd.f32 %v506_v58, %v438_v57  ;;  %v1036_v0 = vadd.f32 %v1004_v50, %v936_v22  ;;  %v706_v56 = vmul.f32 %v1666_v40, %v1635_v52  ;;  %v1720_v31 = vld [vmem:[%s2329_s2] ss:$0 sm:$0xff] }
  0x50   : > { %v837_v23 = vadd.f32 %v805_v36, %v737_v21  ;;  %v806_v61 = vmul.f32 %v1674_v37, %v1637_v53  ;;  %v439_v29 = vadd.f32 %v407_v24, %v339_v55  ;;  %v507_v49 = vmul.f32 %v1653_v14, %v1631_v48 }
  0x51   : > { %v937_v43 = vadd.f32 %v905_v30, %v836_v33  ;;  %v638_v59 = vadd.f32 %v606_v35, %v538_v34  ;;  %v1136_v62 = vadd.f32 %v1104_v28, %v1036_v0  ;;  %v907_v21 = vmul.f32 %v1647_v60, %v1707_v20  ;;  %v1071_v34 = vld [vmem:[#allocation2 + $0x52] sm:$0xff] }
  0x52   : > { %v938_v22 = vadd.f32 %v906_v38, %v837_v23  ;;  %v1007_v50 = vmul.f32 %v1651_v63, %v1709_v4  ;;  %v539_v57 = vadd.f32 %v507_v49, %v439_v29  ;;  %v607_v58 = vmul.f32 %v1682_v27, %v1633_v51  ;;  %v1738_v23 = vld [vmem:[#allocation2 + $0x60] sm:$0xff] }
  0x53   : > { %v1037_v36 = vadd.f32 %v1005_v26, %v937_v43  ;;  %v738_v44 = vadd.f32 %v706_v56, %v638_v59  ;;  %v1175_v30 = vadd.f32 %v1720_v31, %v1136_v62  ;;  %v340_v14 = vmul.f32 %v1664_v41, %v1627_v45 }
  0x54   : > { %v1038_v55 = vadd.f32 %v1006_v32, %v938_v22  ;;  %v408_v28 = vmul.f32 %v1666_v40, %v1629_v47  ;;  %v639_v35 = vadd.f32 %v607_v58, %v539_v57  ;;  %v707_v26 = vmul.f32 %v1685_v42, %v1635_v52 }
  0x55   : > { %v1137_v38 = vadd.f32 %v1105_v39, %v1037_v36  ;;  %v838_v33 = vadd.f32 %v806_v61, %v738_v44  ;;  %v1207_v24 = vadd.f32 %v1175_v30, %v1455_v1  ;;  %v508_v41 = vmul.f32 %v1674_v37, %v1631_v48 }
  0x56   : > { %v1138_v0 = vadd.f32 %v1106_v46, %v1038_v55  ;;  %v440_v32 = vadd.f32 %v408_v28, %v340_v14  ;;  %v739_v40 = vadd.f32 %v707_v26, %v639_v35  ;;  %v807_v39 = vmul.f32 %v1692_v25, %v1637_v53  ;;  %v972_v46 = vld [vmem:[#allocation2 + $0x61] sm:$0xff]  ;;  %v973_v35 = vld [vmem:[#allocation2 + $0x69] sm:$0xff] }
  0x57   : > { %v1176_v56 = vadd.f32 %v1720_v31, %v1137_v38  ;;  %v939_v43 = vadd.f32 %v907_v21, %v838_v33  ;;  %1239 = vst.msk [vmem:[%s1398_s21] sm:$0xff] %vm264_vm2, %v1207_v24  ;;  %v1107_v1 = vmul.f32 %v1642_v54, %v1071_v34  ;;  %v608_v29 = vmul.f32 %v1707_v20, %v1633_v51  ;;  %v1754_v21 = vld [vmem:[#allocation2 + $0x62] sm:$0xff]  ;;  %v1772_v26 = vld [vmem:[#allocation2 + $0x6a] sm:$0xff] }
  0x58   : > { %v1177_v61 = vadd.f32 %v1720_v31, %v1138_v0  ;;  %v540_v59 = vadd.f32 %v508_v41, %v440_v32  ;;  %v839_v62 = vadd.f32 %v807_v39, %v739_v40  ;;  %v908_v22 = vmul.f32 %v1647_v60, %v1738_v23  ;;  %v873_v55 = vld [vmem:[#allocation2 + $0x68] sm:$0xff] }
  0x59   : > { %v1208_v37 = vadd.f32 %v1176_v56, %v1458_v2  ;;  %v1039_v49 = vadd.f32 %v1007_v50, %v939_v43  ;;  %v708_v57 = vmul.f32 %v1709_v4, %v1635_v52  ;;  %v341_v58 = vmul.f32 %v1682_v27, %v1627_v45 }
  0x5a   : > { %v1209_v36 = vadd.f32 %v1177_v61, %v1461_v3  ;;  %v640_v44 = vadd.f32 %v608_v29, %v540_v59  ;;  %v940_v2 = vadd.f32 %v908_v22, %v839_v62  ;;  %v1008_v50 = vmul.f32 %v1651_v63, %v972_v46  ;;  %v1782_v61 = vld [vmem:[#allocation2 + $0x78] sm:$0xff] }
  0x5b   : > { %1240 = vst.msk [vmem:[%s1398_s21 + $0x8] sm:$0xff] %vm264_vm2, %v1208_v37  ;;  %v1139_v30 = vadd.f32 %v1107_v1, %v1039_v49  ;;  %v409_v14 = vmul.f32 %v1685_v42, %v1629_v47  ;;  %v1108_v3 = vmul.f32 %v1642_v54, %v1754_v21  ;;  %v808_v38 = vmul.f32 %v1071_v34, %v1637_v53  ;;  %v974_v49 = vld [vmem:[#allocation2 + $0x79] sm:$0xff] }
  0x5c   : > { %1241 = vst.msk [vmem:[%s1398_s21 + $0x10] sm:$0xff] %vm264_vm2, %v1209_v36  ;;  %v740_v28 = vadd.f32 %v708_v57, %v640_v44  ;;  %v1040_v33 = vadd.f32 %v1008_v50, %v940_v2  ;;  %v509_v0 = vmul.f32 %v1692_v25, %v1631_v48  ;;  %v909_v32 = vmul.f32 %v1647_v60, %v873_v55  ;;  %v1793_v62 = vld [vmem:[#allocation2 + $0x7a] sm:$0xff] }
  0x5d   : > { %v1178_v27 = vadd.f32 %v1720_v31, %v1139_v30  ;;  %v441_v24 = vadd.f32 %v409_v14, %v341_v58  ;;  %v609_v41 = vmul.f32 %v1738_v23, %v1633_v51  ;;  %v342_v56 = vmul.f32 %v1707_v20, %v1627_v45  ;;  %v1802_v14 = vld [vmem:[#allocation2 + $0x80] sm:$0xff] }
  0x5e   : > { %v840_v42 = vadd.f32 %v808_v38, %v740_v28  ;;  %v1140_v40 = vadd.f32 %v1108_v3, %v1040_v33  ;;  %v410_v1 = vmul.f32 %v1709_v4, %v1629_v47  ;;  %v1009_v25 = vmul.f32 %v1651_v63, %v973_v35 }
  0x5f   : > { %v1210_v43 = vadd.f32 %v1178_v27, %v1470_v5  ;;  %v541_v39 = vadd.f32 %v509_v0, %v441_v24  ;;  %v1109_v29 = vmul.f32 %v1642_v54, %v1772_v26  ;;  %v709_v37 = vmul.f32 %v972_v46, %v1635_v52  ;;  %v975_v27 = vld [vmem:[#allocation2 + $0x81] sm:$0xff] }
  0x60   : > { %v941_v59 = vadd.f32 %v909_v32, %v840_v42  ;;  %v1179_v20 = vadd.f32 %v1720_v31, %v1140_v40  ;;  %v442_v22 = vadd.f32 %v410_v1, %v342_v56  ;;  %v510_v4 = vmul.f32 %v1071_v34, %v1631_v48 }
  0x61   : > { %1242 = vst.msk [vmem:[%s1398_s21 + $0x18] sm:$0xff] %vm264_vm2, %v1210_v43  ;;  %v641_v5 = vadd.f32 %v609_v41, %v541_v39  ;;  %v809_v44 = vmul.f32 %v1754_v21, %v1637_v53  ;;  %v910_v57 = vmul.f32 %v1647_v60, %v1782_v61  ;;  %v610_v58 = vmul.f32 %v873_v55, %v1633_v51  ;;  %v1818_v41 = vld [vmem:[#allocation2 + $0x82] sm:$0xff] }
  0x62   : > { %v1041_v36 = vadd.f32 %v1009_v25, %v941_v59  ;;  %v1211_v30 = vadd.f32 %v1179_v20, %v1473_v6  ;;  %v542_v50 = vadd.f32 %v510_v4, %v442_v22  ;;  %v343_v3 = vmul.f32 %v1738_v23, %v1627_v45 }
  0x63   : > { %v741_v2 = vadd.f32 %v709_v37, %v641_v5  ;;  %v1010_v34 = vmul.f32 %v1651_v63, %v974_v49  ;;  %v1110_v38 = vmul.f32 %v1642_v54, %v1793_v62  ;;  %v411_v33 = vmul.f32 %v972_v46, %v1629_v47  ;;  %v1827_v37 = vld [vmem:[#allocation2 + $0x90] sm:$0xff] }
  0x64   : > { %v1141_v28 = vadd.f32 %v1109_v29, %v1041_v36  ;;  %1243 = vst.msk [vmem:[%s1398_s21 + $0x20] sm:$0xff] %vm264_vm2, %v1211_v30  ;;  %v642_v6 = vadd.f32 %v610_v58, %v542_v50  ;;  %v710_v0 = vmul.f32 %v973_v35, %v1635_v52  ;;  %v810_v42 = vmul.f32 %v1772_v26, %v1637_v53  ;;  %v1837_v36 = vld [vmem:[#allocation2 + $0x91] sm:$0xff] }
  0x65   : > { %v841_v24 = vadd.f32 %v809_v44, %v741_v2  ;;  %v911_v32 = vmul.f32 %v1647_v60, %v1802_v14  ;;  %v443_v56 = vadd.f32 %v411_v33, %v343_v3  ;;  %v511_v46 = vmul.f32 %v1754_v21, %v1631_v48  ;;  %v1845_v3 = vld [vmem:[#allocation2 + $0x92] sm:$0xff] }
  0x66   : > { %v1180_v23 = vadd.f32 %v1720_v31, %v1141_v28  ;;  %v742_v40 = vadd.f32 %v710_v0, %v642_v6  ;;  %v1011_v39 = vmul.f32 %v1651_v63, %v975_v27  ;;  %v344_v1 = vmul.f32 %v873_v55, %v1627_v45 }
  0x67   : > { %v942_v43 = vadd.f32 %v910_v57, %v841_v24  ;;  %v543_v25 = vadd.f32 %v511_v46, %v443_v56  ;;  %v611_v29 = vmul.f32 %v1782_v61, %v1633_v51  ;;  %v412_v20 = vmul.f32 %v973_v35, %v1629_v47 }
  0x68   : > { %v1212_v59 = vadd.f32 %v1180_v23, %v1476_v7  ;;  %v842_v22 = vadd.f32 %v810_v42, %v742_v40  ;;  %v1111_v21 = vmul.f32 %v1642_v54, %v1818_v41  ;;  %v711_v4 = vmul.f32 %v974_v49, %v1635_v52  ;;  %v1854_v23 = vld [vmem:[#allocation2 + $0x98] sm:$0xff] }
  0x69   : > { %v1042_v5 = vadd.f32 %v1010_v34, %v942_v43  ;;  %v643_v55 = vadd.f32 %v611_v29, %v543_v25  ;;  %v811_v7 = vmul.f32 %v1793_v62, %v1637_v53  ;;  %v444_v44 = vadd.f32 %v412_v20, %v344_v1  ;;  %v977_v1 = vld [vmem:[#allocation2 + $0x99] sm:$0xff] }
  0x6a   : > { %1244 = vst.msk [vmem:[%s1398_s21 + $0x28] sm:$0xff] %vm264_vm2, %v1212_v59  ;;  %v512_v57 = vmul.f32 %v1772_v26, %v1631_v48  ;;  %v943_v58 = vadd.f32 %v911_v32, %v842_v22  ;;  %v912_v30 = vmul.f32 %v1647_v60, %v1827_v37  ;;  %v612_v2 = vmul.f32 %v1802_v14, %v1633_v51 }
  0x6b   : > { %v1142_v35 = vadd.f32 %v1110_v38, %v1042_v5  ;;  %v743_v50 = vadd.f32 %v711_v4, %v643_v55  ;;  %v345_v34 = vmul.f32 %v1782_v61, %v1627_v45  ;;  %v413_v33 = vmul.f32 %v974_v49, %v1629_v47 }
  0x6c   : > { %v544_v28 = vadd.f32 %v512_v57, %v444_v44  ;;  %v1043_v26 = vadd.f32 %v1011_v39, %v943_v58  ;;  %v1012_v38 = vmul.f32 %v1651_v63, %v1837_v36  ;;  %v712_v6 = vmul.f32 %v975_v27, %v1635_v52 }
  0x6d   : > { %v1181_v24 = vadd.f32 %v1720_v31, %v1142_v35  ;;  %v843_v0 = vadd.f32 %v811_v7, %v743_v50  ;;  %v445_v32 = vadd.f32 %v413_v33, %v345_v34  ;;  %v513_v56 = vmul.f32 %v1793_v62, %v1631_v48  ;;  %v1875_v7 = vld [vmem:[#allocation2 + $0xa8] sm:$0xff] }
  0x6e   : > { %v644_v42 = vadd.f32 %v612_v2, %v544_v28  ;;  %v1143_v49 = vadd.f32 %v1111_v21, %v1043_v26  ;;  %v1112_v46 = vmul.f32 %v1642_v54, %v1845_v3  ;;  %v812_v43 = vmul.f32 %v1818_v41, %v1637_v53  ;;  %v1077_v21 = vld [vmem:[#allocation2 + $0x9a] sm:$0xff]  ;;  %v978_v50 = vld [vmem:[#allocation2 + $0xa9] sm:$0xff] }
  0x6f   : > { %v1213_v61 = vadd.f32 %v1181_v24, %v1485_v8  ;;  %v944_v40 = vadd.f32 %v912_v30, %v843_v0  ;;  %v545_v59 = vadd.f32 %v513_v56, %v445_v32  ;;  %v613_v25 = vmul.f32 %v1827_v37, %v1633_v51  ;;  %v1888_v34 = vld [vmem:[#allocation2 + $0xaa] sm:$0xff] }
  0x70   : > { %v744_v39 = vadd.f32 %v712_v6, %v644_v42  ;;  %v1182_v62 = vadd.f32 %v1720_v31, %v1143_v49  ;;  %v913_v8 = vmul.f32 %v1647_v60, %v1854_v23  ;;  %v346_v29 = vmul.f32 %v1802_v14, %v1627_v45  ;;  %v1897_v56 = vld [vmem:[#allocation2 + $0xb0] sm:$0xff] }
  0x71   : > { %1245 = vst.msk [vmem:[%s1398_s21 + $0x30] sm:$0xff] %vm264_vm2, %v1213_v61  ;;  %v414_v20 = vmul.f32 %v975_v27, %v1629_v47  ;;  %v1044_v5 = vadd.f32 %v1012_v38, %v944_v40  ;;  %v645_v4 = vadd.f32 %v613_v25, %v545_v59  ;;  %v713_v55 = vmul.f32 %v1837_v36, %v1635_v52  ;;  %v979_v59 = vld [vmem:[#allocation2 + $0xb1] sm:$0xff] }
  0x72   : > { %v844_v22 = vadd.f32 %v812_v43, %v744_v39  ;;  %v1214_v44 = vadd.f32 %v1182_v62, %v1488_v9  ;;  %v1013_v57 = vmul.f32 %v1651_v63, %v977_v1  ;;  %v514_v14 = vmul.f32 %v1818_v41, %v1631_v48 }
  0x73   : > { %v446_v35 = vadd.f32 %v414_v20, %v346_v29  ;;  %v1144_v58 = vadd.f32 %v1112_v46, %v1044_v5  ;;  %v745_v30 = vadd.f32 %v713_v55, %v645_v4  ;;  %v813_v2 = vmul.f32 %v1845_v3, %v1637_v53  ;;  %v1079_v5 = vld [vmem:[#allocation2 + $0xb2] sm:$0xff]  ;;  %v1914_v4 = vld [vmem:[#allocation2 + $0xc0] sm:$0xff] }
  0x74   : > { %v945_v27 = vadd.f32 %v913_v8, %v844_v22  ;;  %1246 = vst.msk [vmem:[%s1398_s21 + $0x38] sm:$0xff] %vm264_vm2, %v1214_v44  ;;  %v1113_v28 = vmul.f32 %v1642_v54, %v1077_v21  ;;  %v914_v9 = vmul.f32 %v1647_v60, %v1875_v7  ;;  %v614_v41 = vmul.f32 %v1854_v23, %v1633_v51 }
  0x75   : > { %v546_v33 = vadd.f32 %v514_v14, %v446_v35  ;;  %v1183_v24 = vadd.f32 %v1720_v31, %v1144_v58  ;;  %v845_v38 = vadd.f32 %v813_v2, %v745_v30  ;;  %v347_v6 = vmul.f32 %v1827_v37, %v1627_v45  ;;  %v980_v30 = vld [vmem:[#allocation2 + $0xc1] sm:$0xff] }
  0x76   : > { %v1045_v26 = vadd.f32 %v1013_v57, %v945_v27  ;;  %v1014_v0 = vmul.f32 %v1651_v63, %v978_v50  ;;  %v714_v32 = vmul.f32 %v977_v1, %v1635_v52  ;;  %v415_v61 = vmul.f32 %v1837_v36, %v1629_v47 }
  0x77   : > { %v646_v42 = vadd.f32 %v614_v41, %v546_v33  ;;  %v1215_v49 = vadd.f32 %v1183_v24, %v1491_v10  ;;  %v946_v43 = vadd.f32 %v914_v9, %v845_v38  ;;  %v1114_v40 = vmul.f32 %v1642_v54, %v1888_v34  ;;  %v1080_v24 = vld [vmem:[#allocation2 + $0xc2] sm:$0xff] }
  0x78   : > { %v1145_v46 = vadd.f32 %v1113_v28, %v1045_v26  ;;  %v814_v37 = vmul.f32 %v1077_v21, %v1637_v53  ;;  %v447_v25 = vadd.f32 %v415_v61, %v347_v6  ;;  %v515_v62 = vmul.f32 %v1845_v3, %v1631_v48 }
  0x79   : > { %v746_v39 = vadd.f32 %v714_v32, %v646_v42  ;;  %1247 = vst.msk [vmem:[%s1398_s21 + $0x40] sm:$0xff] %vm264_vm2, %v1215_v49  ;;  %v1046_v36 = vadd.f32 %v1014_v0, %v946_v43  ;;  %v915_v10 = vmul.f32 %v1647_v60, %v1897_v56  ;;  %v615_v29 = vmul.f32 %v1875_v7, %v1633_v51  ;;  %v1935_v0 = vld [vmem:[#allocation2 + $0xc8] sm:$0xff] }
  0x7a   : > { %v1184_v8 = vadd.f32 %v1720_v31, %v1145_v46  ;;  %v547_v22 = vadd.f32 %v515_v62, %v447_v25  ;;  %v348_v3 = vmul.f32 %v1854_v23, %v1627_v45  ;;  %v416_v55 = vmul.f32 %v977_v1, %v1629_v47 }
  0x7b   : > { %v846_v20 = vadd.f32 %v814_v37, %v746_v39  ;;  %v1146_v57 = vadd.f32 %v1114_v40, %v1046_v36  ;;  %v1015_v35 = vmul.f32 %v1651_v63, %v979_v59  ;;  %v715_v14 = vmul.f32 %v978_v50, %v1635_v52  ;;  %v981_v39 = vld [vmem:[#allocation2 + $0xc9] sm:$0xff] }
  0x7c   : > { %v1216_v44 = vadd.f32 %v1184_v8, %v1500_v11  ;;  %v647_v27 = vadd.f32 %v615_v29, %v547_v22  ;;  %v448_v2 = vadd.f32 %v416_v55, %v348_v3  ;;  %v516_v28 = vmul.f32 %v1077_v21, %v1631_v48  ;;  %v1081_v36 = vld [vmem:[#allocation2 + $0xca] sm:$0xff] }
  0x7d   : > { %v947_v58 = vadd.f32 %v915_v10, %v846_v20  ;;  %v1185_v9 = vadd.f32 %v1720_v31, %v1146_v57  ;;  %v1115_v23 = vmul.f32 %v1642_v54, %v1079_v5  ;;  %v815_v11 = vmul.f32 %v1888_v34, %v1637_v53  ;;  %v1957_v57 = vld [vmem:[#allocation2 + $0xd8] sm:$0xff] }
  0x7e   : > { %1248 = vst.msk [vmem:[%s1398_s21 + $0x48] sm:$0xff] %vm264_vm2, %v1216_v44  ;;  %v916_v1 = vmul.f32 %v1647_v60, %v1914_v4  ;;  %v747_v41 = vadd.f32 %v715_v14, %v647_v27  ;;  %v548_v26 = vadd.f32 %v516_v28, %v448_v2  ;;  %v616_v21 = vmul.f32 %v1897_v56, %v1633_v51  ;;  %v982_v28 = vld [vmem:[#allocation2 + $0xd9] sm:$0xff] }
  0x7f   : > { %v1047_v33 = vadd.f32 %v1015_v35, %v947_v58  ;;  %v1217_v38 = vadd.f32 %v1185_v9, %v1503_v12  ;;  %v1016_v6 = vmul.f32 %v1651_v63, %v980_v30  ;;  %v349_v42 = vmul.f32 %v1875_v7, %v1627_v45 }
  0x80   : > { %v417_v32 = vmul.f32 %v978_v50, %v1629_v47  ;;  %v847_v49 = vadd.f32 %v815_v11, %v747_v41  ;;  %v648_v46 = vadd.f32 %v616_v21, %v548_v26  ;;  %v716_v43 = vmul.f32 %v979_v59, %v1635_v52  ;;  %v1082_v41 = vld [vmem:[#allocation2 + $0xda] sm:$0xff] }
  0x81   : > { %v1147_v61 = vadd.f32 %v1115_v23, %v1047_v33  ;;  %1249 = vst.msk [vmem:[%s1398_s21 + $0x50] sm:$0xff] %vm264_vm2, %v1217_v38  ;;  %v1116_v40 = vmul.f32 %v1642_v54, %v1080_v24  ;;  %v816_v12 = vmul.f32 %v1079_v5, %v1637_v53  ;;  %v517_v25 = vmul.f32 %v1888_v34, %v1631_v48 }
  0x82   : > { %v449_v37 = vadd.f32 %v417_v32, %v349_v42  ;;  %v948_v62 = vadd.f32 %v916_v1, %v847_v49  ;;  %v748_v50 = vadd.f32 %v716_v43, %v648_v46  ;;  %v917_v8 = vmul.f32 %v1647_v60, %v1935_v0 }
  0x83   : > { %v1186_v7 = vadd.f32 %v1720_v31, %v1147_v61  ;;  %v617_v29 = vmul.f32 %v1914_v4, %v1633_v51  ;;  %v350_v20 = vmul.f32 %v1897_v56, %v1627_v45  ;;  %v418_v22 = vmul.f32 %v979_v59, %v1629_v47  ;;  %v1975_v61 = vld [vmem:[#allocation2 + $0xe0] sm:$0xff] }
  0x84   : > { %v549_v10 = vadd.f32 %v517_v25, %v449_v37  ;;  %v1048_v3 = vadd.f32 %v1016_v6, %v948_v62  ;;  %v848_v55 = vadd.f32 %v816_v12, %v748_v50  ;;  %v1017_v44 = vmul.f32 %v1651_v63, %v981_v39  ;;  %v983_v25 = vld [vmem:[#allocation2 + $0xe1] sm:$0xff] }
  0x85   : > { %v1218_v34 = vadd.f32 %v1186_v7, %v1506_v13  ;;  %v717_v14 = vmul.f32 %v980_v30, %v1635_v52  ;;  %v450_v58 = vadd.f32 %v418_v22, %v350_v20  ;;  %v518_v27 = vmul.f32 %v1079_v5, %v1631_v48 }
  0x86   : > { %v649_v35 = vadd.f32 %v617_v29, %v549_v10  ;;  %v1148_v2 = vadd.f32 %v1116_v40, %v1048_v3  ;;  %v949_v56 = vadd.f32 %v917_v8, %v848_v55  ;;  %v1117_v59 = vmul.f32 %v1642_v54, %v1081_v36  ;;  %v1083_v10 = vld [vmem:[#allocation2 + $0xe2] sm:$0xff]  ;;  %v1988_v29 = vld [vmem:[#allocation2 + $0xf0] sm:$0xff] }
  0x87   : > { %1250 = vst.msk [vmem:[%s1398_s21 + $0x58] sm:$0xff] %vm264_vm2, %v1218_v34  ;;  %v817_v13 = vmul.f32 %v1080_v24, %v1637_v53  ;;  %v918_v23 = vmul.f32 %v1647_v60, %v1957_v57  ;;  %v550_v11 = vadd.f32 %v518_v27, %v450_v58  ;;  %v618_v1 = vmul.f32 %v1935_v0, %v1633_v51  ;;  %v984_v58 = vld [vmem:[#allocation2 + $0xf1] sm:$0xff] }
  0x88   : > { %v749_v9 = vadd.f32 %v717_v14, %v649_v35  ;;  %v1187_v33 = vadd.f32 %v1720_v31, %v1148_v2  ;;  %v1049_v5 = vadd.f32 %v1017_v44, %v949_v56  ;;  %v351_v26 = vmul.f32 %v1914_v4, %v1627_v45 }
  0x89   : > { %v419_v21 = vmul.f32 %v980_v30, %v1629_v47  ;;  %v1018_v6 = vmul.f32 %v1651_v63, %v982_v28  ;;  %v650_v42 = vadd.f32 %v618_v1, %v550_v11  ;;  %v718_v32 = vmul.f32 %v981_v39, %v1635_v52 }
  0x8a   : > { %v849_v38 = vadd.f32 %v817_v13, %v749_v9  ;;  %v1219_v49 = vadd.f32 %v1187_v33, %v1517_v15  ;;  %v1149_v46 = vadd.f32 %v1117_v59, %v1049_v5  ;;  %v519_v40 = vmul.f32 %v1080_v24, %v1631_v48  ;;  %v1084_v9 = vld [vmem:[#allocation2 + $0xf2] sm:$0xff] }
  0x8b   : > { %v451_v43 = vadd.f32 %v419_v21, %v351_v26  ;;  %v1118_v4 = vmul.f32 %v1642_v54, %v1082_v41  ;;  %v750_v37 = vadd.f32 %v718_v32, %v650_v42  ;;  %v818_v30 = vmul.f32 %v1081_v36, %v1637_v53  ;;  %v2007_v33 = vld [vmem:[#allocation2 + $0xf8] sm:$0xff] }
  0x8c   : > { %v950_v12 = vadd.f32 %v918_v23, %v849_v38  ;;  %1251 = vst.msk [vmem:[%s1398_s21 + $0x60] sm:$0xff] %vm264_vm2, %v1219_v49  ;;  %v1188_v7 = vadd.f32 %v1720_v31, %v1149_v46  ;;  %v919_v62 = vmul.f32 %v1647_v60, %v1975_v61  ;;  %v619_v15 = vmul.f32 %v1957_v57, %v1633_v51  ;;  %v985_v46 = vld [vmem:[#allocation2 + $0xf9] sm:$0xff] }
  0x8d   : > { %v551_v50 = vadd.f32 %v519_v40, %v451_v43  ;;  %v850_v8 = vadd.f32 %v818_v30, %v750_v37  ;;  %v352_v20 = vmul.f32 %v1935_v0, %v1627_v45  ;;  %v420_v22 = vmul.f32 %v981_v39, %v1629_v47 }
  0x8e   : > { %v1050_v24 = vadd.f32 %v1018_v6, %v950_v12  ;;  %v1220_v34 = vadd.f32 %v1188_v7, %v1520_v16  ;;  %v1019_v3 = vmul.f32 %v1651_v63, %v983_v25  ;;  %v719_v44 = vmul.f32 %v982_v28, %v1635_v52 }
  0x8f   : > { %v651_v55 = vadd.f32 %v619_v15, %v551_v50  ;;  %v951_v14 = vadd.f32 %v919_v62, %v850_v8  ;;  %v452_v27 = vadd.f32 %v420_v22, %v352_v20  ;;  %v520_v2 = vmul.f32 %v1081_v36, %v1631_v48 }
  0x90   : > { %v1150_v35 = vadd.f32 %v1118_v4, %v1050_v24  ;;  %1252 = vst.msk [vmem:[%s1398_s21 + $0x68] sm:$0xff] %vm264_vm2, %v1220_v34  ;;  %v1119_v56 = vmul.f32 %v1642_v54, %v1083_v10  ;;  %v819_v39 = vmul.f32 %v1082_v41, %v1637_v53  ;;  %v920_v16 = vmul.f32 %v1647_v60, %v1988_v29  ;;  %v1085_v4 = vld [vmem:[#allocation2 + $0xfa] sm:$0xff]  ;;  %v2028_v24 = vld [vmem:[#allocation2 + $0x108] sm:$0xff] }
  0x91   : > { %v751_v0 = vadd.f32 %v719_v44, %v651_v55  ;;  %v1051_v13 = vadd.f32 %v1019_v3, %v951_v14  ;;  %v552_v23 = vadd.f32 %v520_v2, %v452_v27  ;;  %v620_v11 = vmul.f32 %v1975_v61, %v1633_v51  ;;  %v986_v44 = vld [vmem:[#allocation2 + $0x109] sm:$0xff] }
  0x92   : > { %v1189_v59 = vadd.f32 %v1720_v31, %v1150_v35  ;;  %v1020_v1 = vmul.f32 %v1651_v63, %v984_v58  ;;  %v353_v5 = vmul.f32 %v1957_v57, %v1627_v45  ;;  %v421_v26 = vmul.f32 %v982_v28, %v1629_v47 }
  0x93   : > { %v851_v36 = vadd.f32 %v819_v39, %v751_v0  ;;  %v1151_v38 = vadd.f32 %v1119_v56, %v1051_v13  ;;  %v652_v6 = vadd.f32 %v620_v11, %v552_v23  ;;  %v720_v42 = vmul.f32 %v983_v25, %v1635_v52  ;;  %v1086_v0 = vld [vmem:[#allocation2 + $0x10a] sm:$0xff] }
  0x94   : > { %v1221_v21 = vadd.f32 %v1189_v59, %v1523_v17  ;;  %v1120_v49 = vmul.f32 %v1642_v54, %v1084_v9  ;;  %v453_v43 = vadd.f32 %v421_v26, %v353_v5  ;;  %v521_v40 = vmul.f32 %v1082_v41, %v1631_v48  ;;  %v2050_v26 = vld [vmem:[#allocation2 + $0x111] sm:$0xff] }
  0x95   : > { %v952_v32 = vadd.f32 %v920_v16, %v851_v36  ;;  %v1190_v12 = vadd.f32 %v1720_v31, %v1151_v38  ;;  %v752_v57 = vadd.f32 %v720_v42, %v652_v6  ;;  %v820_v28 = vmul.f32 %v1083_v10, %v1637_v53  ;;  %v2042_v16 = vld [vmem:[#allocation2 + $0x110] sm:$0xff] }
  0x96   : > { %1253 = vst.msk [vmem:[%s1398_s21 + $0x70] sm:$0xff] %vm264_vm2, %v1221_v21  ;;  %v921_v17 = vmul.f32 %v1647_v60, %v2007_v33  ;;  %v553_v30 = vadd.f32 %v521_v40, %v453_v43  ;;  %v621_v7 = vmul.f32 %v1988_v29, %v1633_v51  ;;  %v354_v41 = vmul.f32 %v1975_v61, %v1627_v45 }
  0x97   : > { %v1052_v37 = vadd.f32 %v1020_v1, %v952_v32  ;;  %v1222_v62 = vadd.f32 %v1190_v12, %v1532_v18  ;;  %v852_v50 = vadd.f32 %v820_v28, %v752_v57  ;;  %v1021_v15 = vmul.f32 %v1651_v63, %v985_v46  ;;  %v2066_v57 = vld [vmem:[#allocation2 + $0x120] sm:$0xff] }
  0x98   : > { %v422_v8 = vmul.f32 %v983_v25, %v1629_v47  ;;  %v1121_v22 = vmul.f32 %v1642_v54, %v1085_v4  ;;  %v653_v34 = vadd.f32 %v621_v7, %v553_v30  ;;  %v721_v3 = vmul.f32 %v984_v58, %v1635_v52 }
  0x99   : > { %v1152_v20 = vadd.f32 %v1120_v49, %v1052_v37  ;;  %1254 = vst.msk [vmem:[%s1398_s21 + $0x78] sm:$0xff] %vm264_vm2, %v1222_v62  ;;  %v953_v55 = vadd.f32 %v921_v17, %v852_v50  ;;  %v821_v61 = vmul.f32 %v1084_v9, %v1637_v53  ;;  %v522_v35 = vmul.f32 %v1083_v10, %v1631_v48  ;;  %v2060_v49 = vld [vmem:[#allocation2 + $0x112] sm:$0xff] }
  0x9a   : > { %v454_v18 = vadd.f32 %v422_v8, %v354_v41  ;;  %v753_v27 = vadd.f32 %v721_v3, %v653_v34  ;;  %v922_v25 = vmul.f32 %v1647_v60, %v2028_v24  ;;  %v622_v2 = vmul.f32 %v2007_v33, %v1633_v51  ;;  %v2361_v37 = vld [vmem:[#allocation3_spill] sm:$0xff]  ;;  %v988_v8 = vld [vmem:[#allocation2 + $0x121] sm:$0xff] }
  0x9b   : > { %v1191_v14 = vadd.f32 %v1720_v31, %v1152_v20  ;;  %v1053_v56 = vadd.f32 %v1021_v15, %v953_v55  ;;  %v355_v59 = vmul.f32 %v1988_v29, %v1627_v45  ;;  %v423_v10 = vmul.f32 %v984_v58, %v1629_v47  ;;  %v2081_v55 = vld [vmem:[#allocation2 + $0x122] sm:$0xff] }
  0x9c   : > { %v554_v39 = vadd.f32 %v522_v35, %v454_v18  ;;  %v853_v23 = vadd.f32 %v821_v61, %v753_v27  ;;  %v1022_v11 = vmul.f32 %v1651_v63, %v986_v44  ;;  %v722_v36 = vmul.f32 %v985_v46, %v1635_v52 }
  0x9d   : > { %v1223_v13 = vadd.f32 %v1191_v14, %v1535_v19  ;;  %v1153_v1 = vadd.f32 %v1121_v22, %v1053_v56  ;;  %v455_v21 = vadd.f32 %v423_v10, %v355_v59  ;;  %v523_v38 = vmul.f32 %v1084_v9, %v1631_v48 }
  0x9e   : > { %v654_v5 = vadd.f32 %v622_v2, %v554_v39  ;;  %v954_v6 = vadd.f32 %v922_v25, %v853_v23  ;;  %v1122_v29 = vmul.f32 %v1642_v54, %v1086_v0  ;;  %v822_v58 = vmul.f32 %v1085_v4, %v1637_v53  ;;  %v2089_v2 = vld [vmem:[#allocation2 + $0x128] sm:$0xff]  ;;  %v2362_v39 = vld [vmem:[#allocation4_spill] sm:$0xff] }
  0x9f   : > { %1255 = vst.msk [vmem:[%s1398_s21 + $0x80] sm:$0xff] %vm264_vm2, %v1223_v13  ;;  %v923_v19 = vmul.f32 %v1647_v60, %v2042_v16  ;;  %v1192_v42 = vadd.f32 %v1720_v31, %v1153_v1  ;;  %v555_v43 = vadd.f32 %v523_v38, %v455_v21  ;;  %v623_v9 = vmul.f32 %v2028_v24, %v1633_v51  ;;  %v2097_v1 = vld [vmem:[#allocation2 + $0x12a] sm:$0xff] }
  0xa0   : > { %v754_v32 = vadd.f32 %v722_v36, %v654_v5  ;;  %v1054_v40 = vadd.f32 %v1022_v11, %v954_v6  ;;  %v1023_v12 = vmul.f32 %v1651_v63, %v2050_v26  ;;  %v356_v28 = vmul.f32 %v2007_v33, %v1627_v45  ;;  %v989_v36 = vld [vmem:[#allocation2 + $0x129] sm:$0xff] }
  0xa1   : > { %v424_v17 = vmul.f32 %v985_v46, %v1629_v47  ;;  %v1224_v30 = vadd.f32 %v1192_v42, %v2361_v37  ;;  %v655_v41 = vadd.f32 %v623_v9, %v555_v43  ;;  %v723_v62 = vmul.f32 %v986_v44, %v1635_v52  ;;  %v2115_v43 = vld [vmem:[%s2328_s1 + $0x8] ss:$0 sm:$0xff] }
  0xa2   : > { %v854_v7 = vadd.f32 %v822_v58, %v754_v32  ;;  %v1154_v50 = vadd.f32 %v1122_v29, %v1054_v40  ;;  %v1123_v15 = vmul.f32 %v1642_v54, %v2060_v49  ;;  %v524_v22 = vmul.f32 %v1085_v4, %v1631_v48  ;;  %v2119_v40 = vld [vmem:[#allocation2 + $0x138] sm:$0xff] }
  0xa3   : > { %v456_v20 = vadd.f32 %v424_v17, %v356_v28  ;;  %1256 = vst.msk [vmem:[%s1398_s21 + $0x88] sm:$0xff] %vm264_vm2, %v1224_v30  ;;  %v755_v33 = vadd.f32 %v723_v62, %v655_v41  ;;  %v823_v46 = vmul.f32 %v1086_v0, %v1637_v53  ;;  %v924_v3 = vmul.f32 %v1647_v60, %v2066_v57  ;;  %v2363_v28 = vld [vmem:[#allocation5_spill] sm:$0xff] }
  0xa4   : > { %v955_v34 = vadd.f32 %v923_v19, %v854_v7  ;;  %v1193_v61 = vadd.f32 %v1720_v31, %v1154_v50  ;;  %v624_v35 = vmul.f32 %v2042_v16, %v1633_v51  ;;  %v357_v4 = vmul.f32 %v2028_v24, %v1627_v45  ;;  %v990_v62 = vld [vmem:[#allocation2 + $0x139] sm:$0xff] }
  0xa5   : > { %v556_v18 = vadd.f32 %v524_v22, %v456_v20  ;;  %v855_v27 = vadd.f32 %v823_v46, %v755_v33  ;;  %v1024_v25 = vmul.f32 %v1651_v63, %v988_v8  ;;  %v425_v56 = vmul.f32 %v986_v44, %v1629_v47  ;;  %v1090_v46 = vld [vmem:[#allocation2 + $0x13a] sm:$0xff] }
  0xa6   : > { %v1055_v14 = vadd.f32 %v1023_v12, %v955_v34  ;;  %v1225_v59 = vadd.f32 %v1193_v61, %v2362_v39  ;;  %v1124_v10 = vmul.f32 %v1642_v54, %v2081_v55  ;;  %v724_v23 = vmul.f32 %v2050_v26, %v1635_v52  ;;  %v2136_v61 = vld [vmem:[#allocation2 + $0x140] sm:$0xff] }
  0xa7   : > { %v656_v13 = vadd.f32 %v624_v35, %v556_v18  ;;  %v956_v24 = vadd.f32 %v924_v3, %v855_v27  ;;  %v457_v5 = vadd.f32 %v425_v56, %v357_v4  ;;  %v525_v21 = vmul.f32 %v1086_v0, %v1631_v48  ;;  %v2364_v35 = vld [vmem:[#allocation6_spill] sm:$0xff] }
  0xa8   : > { %v1155_v11 = vadd.f32 %v1123_v15, %v1055_v14  ;;  %1257 = vst.msk [vmem:[%s1398_s21 + $0x90] sm:$0xff] %vm264_vm2, %v1225_v59  ;;  %v824_v38 = vmul.f32 %v2060_v49, %v1637_v53  ;;  %v925_v54 = vmul.f32 %v1647_v60, %v2089_v2  ;;  %v625_v6 = vmul.f32 %v2066_v57, %v1633_v51  ;;  %v2144_v59 = vld [vmem:[#allocation2 + $0x141] sm:$0xff] }
  0xa9   : > { %v756_v44 = vadd.f32 %v724_v23, %v656_v13  ;;  %v1056_v58 = vadd.f32 %v1024_v25, %v956_v24  ;;  %v557_v19 = vadd.f32 %v525_v21, %v457_v5  ;;  %v358_v42 = vmul.f32 %v2042_v16, %v1627_v45  ;;  %v2156_v21 = vld [vmem:[#allocation2 + $0x142] sm:$0xff] }
  0xaa   : > { %v1194_v29 = vadd.f32 %v1720_v31, %v1155_v11  ;;  %v1025_v32 = vmul.f32 %v1651_v63, %v989_v36  ;;  %v1125_v9 = vmul.f32 %v2115_v43, %v2097_v1  ;;  %v426_v12 = vmul.f32 %v2050_v26, %v1629_v47 }
  0xab   : > { %v856_v0 = vadd.f32 %v824_v38, %v756_v44  ;;  %v1156_v16 = vadd.f32 %v1124_v10, %v1056_v58  ;;  %v657_v37 = vadd.f32 %v625_v6, %v557_v19  ;;  %v725_v30 = vmul.f32 %v988_v8, %v1635_v52  ;;  %v2162_v6 = vld [vmem:[#allocation2 + $0x150] sm:$0xff] }
  0xac   : > { %v1226_v17 = vadd.f32 %v1194_v29, %v2363_v28  ;;  %v825_v41 = vmul.f32 %v2081_v55, %v1637_v53  ;;  %v458_v50 = vadd.f32 %v426_v12, %v358_v42  ;;  %v526_v15 = vmul.f32 %v2060_v49, %v1631_v48  ;;  %v2365_v19 = vld [vmem:[#allocation7_spill] sm:$0xff] }
  0xad   : > { %v957_v7 = vadd.f32 %v925_v54, %v856_v0  ;;  %v1195_v20 = vadd.f32 %v1720_v31, %v1156_v16  ;;  %v757_v26 = vadd.f32 %v725_v30, %v657_v37  ;;  %v926_v22 = vmul.f32 %v1647_v60, %v2119_v40 }
  0xae   : > { %1258 = vst.msk [vmem:[%s1398_s21 + $0x98] sm:$0xff] %vm264_vm2, %v1226_v17  ;;  %v626_v34 = vmul.f32 %v2089_v2, %v1633_v51  ;;  %v558_v3 = vadd.f32 %v526_v15, %v458_v50  ;;  %v359_v49 = vmul.f32 %v2066_v57, %v1627_v45  ;;  %v427_v18 = vmul.f32 %v988_v8, %v1629_v47  ;;  %v992_v17 = vld [vmem:[#allocation2 + $0x151] sm:$0xff] }
  0xaf   : > { %v1057_v33 = vadd.f32 %v1025_v32, %v957_v7  ;;  %v1227_v4 = vadd.f32 %v1195_v20, %v2364_v35  ;;  %v857_v14 = vadd.f32 %v825_v41, %v757_v26  ;;  %v1026_v27 = vmul.f32 %v1651_v63, %v990_v62  ;;  %v2178_v41 = vld [vmem:[#allocation2 + $0x152] sm:$0xff] }
  0xb0   : > { %v726_v25 = vmul.f32 %v989_v36, %v1635_v52  ;;  %v658_v39 = vadd.f32 %v626_v34, %v558_v3  ;;  %v459_v10 = vadd.f32 %v427_v18, %v359_v49  ;;  %v527_v13 = vmul.f32 %v2081_v55, %v1631_v48  ;;  %v2366_v49 = vld [vmem:[#allocation8_spill] sm:$0xff] }
  0xb1   : > { %v1157_v56 = vadd.f32 %v1125_v9, %v1057_v33  ;;  %1259 = vst.msk [vmem:[%s1398_s21 + $0xa0] sm:$0xff] %vm264_vm2, %v1227_v4  ;;  %v958_v57 = vadd.f32 %v926_v22, %v857_v14  ;;  %v1126_v8 = vmul.f32 %v2115_v43, %v1090_v46  ;;  %v826_v23 = vmul.f32 %v2097_v1, %v1637_v53  ;;  %v2186_v33 = vld [vmem:[#allocation2 + $0x158] sm:$0xff] }
  0xb2   : > { %v927_v11 = vmul.f32 %v1647_v60, %v2136_v61  ;;  %v758_v5 = vadd.f32 %v726_v25, %v658_v39  ;;  %v559_v44 = vadd.f32 %v527_v13, %v459_v10  ;;  %v627_v55 = vmul.f32 %v2119_v40, %v1633_v51  ;;  %v2194_v25 = vld [vmem:[#allocation2 + $0x15a] sm:$0xff] }
  0xb3   : > { %v1196_v24 = vadd.f32 %v1720_v31, %v1157_v56  ;;  %v1058_v38 = vadd.f32 %v1026_v27, %v958_v57  ;;  %v1027_v54 = vmul.f32 %v1651_v63, %v2144_v59  ;;  %v360_v29 = vmul.f32 %v2089_v2, %v1627_v45  ;;  %v993_v27 = vld [vmem:[#allocation2 + $0x159] sm:$0xff] }
  0xb4   : > { %v428_v58 = vmul.f32 %v989_v36, %v1629_v47  ;;  %v858_v0 = vadd.f32 %v826_v23, %v758_v5  ;;  %v659_v32 = vadd.f32 %v627_v55, %v559_v44  ;;  %v727_v9 = vmul.f32 %v990_v62, %v1635_v52 }
  0xb5   : > { %v1228_v42 = vadd.f32 %v1196_v24, %v2365_v19  ;;  %v1158_v12 = vadd.f32 %v1126_v8, %v1058_v38  ;;  %v1127_v28 = vmul.f32 %v2115_v43, %v2156_v21  ;;  %v528_v37 = vmul.f32 %v2097_v1, %v1631_v48  ;;  %v2208_v8 = vld [vmem:[%s2329_s2] ss:$0 sm:$0xff]  ;;  %v2216_v38 = vld [vmem:[#allocation2 + $0x168] sm:$0xff] }
  0xb6   : > { %v460_v16 = vadd.f32 %v428_v58, %v360_v29  ;;  %v959_v2 = vadd.f32 %v927_v11, %v858_v0  ;;  %v759_v30 = vadd.f32 %v727_v9, %v659_v32  ;;  %v827_v36 = vmul.f32 %v1090_v46, %v1637_v53  ;;  %v2367_v29 = vld [vmem:[#allocation9_spill] sm:$0xff]  ;;  %v994_v9 = vld [vmem:[#allocation2 + $0x169] sm:$0xff] }
  0xb7   : > { %1260 = vst.msk [vmem:[%s1398_s21 + $0xa8] sm:$0xff] %vm264_vm2, %v1228_v42  ;;  %v928_v7 = vmul.f32 %v1647_v60, %v2162_v6  ;;  %v1197_v50 = vadd.f32 %v1720_v31, %v1158_v12  ;;  %v628_v20 = vmul.f32 %v2136_v61, %v1633_v51  ;;  %v361_v1 = vmul.f32 %v2119_v40, %v1627_v45 }
  0xb8   : > { %v560_v15 = vadd.f32 %v528_v37, %v460_v16  ;;  %v1059_v26 = vadd.f32 %v1027_v54, %v959_v2  ;;  %v859_v22 = vadd.f32 %v827_v36, %v759_v30  ;;  %v1028_v34 = vmul.f32 %v1651_v63, %v992_v17  ;;  %v1094_v36 = vld [vmem:[#allocation2 + $0x16a] sm:$0xff] }
  0xb9   : > { %v429_v3 = vmul.f32 %v990_v62, %v1629_v47  ;;  %v1229_v18 = vadd.f32 %v1197_v50, %v2366_v49  ;;  %v1128_v31 = vmul.f32 %v2115_v43, %v2178_v41  ;;  %v728_v4 = vmul.f32 %v2144_v59, %v1635_v52  ;;  %v2233_v50 = vld [vmem:[#allocation2 + $0x170] sm:$0xff] }
  0xba   : > { %v660_v35 = vadd.f32 %v628_v20, %v560_v15  ;;  %v1159_v14 = vadd.f32 %v1127_v28, %v1059_v26  ;;  %v960_v40 = vadd.f32 %v928_v7, %v859_v22  ;;  %v529_v39 = vmul.f32 %v1090_v46, %v1631_v48  ;;  %v2368_v20 = vld [vmem:[#allocation10_spill] sm:$0xff] }
  0xbb   : > { %v461_v56 = vadd.f32 %v429_v3, %v361_v1  ;;  %1261 = vst.msk [vmem:[%s1398_s21 + $0xb0] sm:$0xff] %vm264_vm2, %v1229_v18  ;;  %v828_v10 = vmul.f32 %v2156_v21, %v1637_v53  ;;  %v929_v13 = vmul.f32 %v1647_v60, %v2186_v33  ;;  %v629_v57 = vmul.f32 %v2162_v6, %v1633_v51  ;;  %v2241_v18 = vld [vmem:[#allocation2 + $0x171] sm:$0xff] }
  0xbc   : > { %v760_v62 = vadd.f32 %v728_v4, %v660_v35  ;;  %v1198_v23 = vadd.f32 %v2208_v8, %v1159_v14  ;;  %v1060_v46 = vadd.f32 %v1028_v34, %v960_v40  ;;  %v362_v24 = vmul.f32 %v2136_v61, %v1627_v45 }
  0xbd   : > { %v561_v11 = vadd.f32 %v529_v39, %v461_v56  ;;  %v1029_v44 = vmul.f32 %v1651_v63, %v993_v27  ;;  %v1129_v55 = vmul.f32 %v2115_v43, %v2194_v25  ;;  %v430_v54 = vmul.f32 %v2144_v59, %v1629_v47  ;;  %v1095_v39 = vld [vmem:[#allocation2 + $0x172] sm:$0xff] }
  0xbe   : > { %v860_v5 = vadd.f32 %v828_v10, %v760_v62  ;;  %v1230_v58 = vadd.f32 %v1198_v23, %v2367_v29  ;;  %v1160_v19 = vadd.f32 %v1128_v31, %v1060_v46  ;;  %v729_v0 = vmul.f32 %v992_v17, %v1635_v52 }
  0xbf   : > { %v661_v42 = vadd.f32 %v629_v57, %v561_v11  ;;  %v829_v61 = vmul.f32 %v2178_v41, %v1637_v53  ;;  %v462_v12 = vadd.f32 %v430_v54, %v362_v24  ;;  %v530_v28 = vmul.f32 %v2156_v21, %v1631_v48  ;;  %v896_v57 = vld [vmem:[#allocation2 + $0x180] sm:$0xff]  ;;  %v2369_v11 = vld [vmem:[#allocation11_spill] sm:$0xff] }
  0xc0   : > { %v961_v32 = vadd.f32 %v929_v13, %v860_v5  ;;  %1262 = vst.msk [vmem:[%s1398_s21 + $0xb8] sm:$0xff] %vm264_vm2, %v1230_v58  ;;  %v1199_v16 = vadd.f32 %v2208_v8, %v1160_v19  ;;  %v930_v37 = vmul.f32 %v1647_v60, %v2216_v38  ;;  %v630_v2 = vmul.f32 %v2186_v33, %v1633_v51  ;;  %v996_v58 = vld [vmem:[#allocation2 + $0x181] sm:$0xff] }
  0xc1   : > { %v761_v59 = vadd.f32 %v729_v0, %v661_v42  ;;  %v562_v7 = vadd.f32 %v530_v28, %v462_v12  ;;  %v363_v21 = vmul.f32 %v2162_v6, %v1627_v45  ;;  %v431_v15 = vmul.f32 %v992_v17, %v1629_v47 }
  0xc2   : > { %v1061_v30 = vadd.f32 %v1029_v44, %v961_v32  ;;  %v1231_v1 = vadd.f32 %v1199_v16, %v2368_v20  ;;  %v1030_v22 = vmul.f32 %v1651_v63, %v994_v9  ;;  %v730_v34 = vmul.f32 %v993_v27, %v1635_v52 }
  0xc3   : > { %v861_v26 = vadd.f32 %v829_v61, %v761_v59  ;;  %v662_v49 = vadd.f32 %v630_v2, %v562_v7  ;;  %v463_v31 = vadd.f32 %v431_v15, %v363_v21  ;;  %v531_v35 = vmul.f32 %v2178_v41, %v1631_v48  ;;  %v1096_v2 = vld [vmem:[#allocation2 + $0x182] sm:$0xff]  ;;  %v2370_v7 = vld [vmem:[#allocation12_spill] sm:$0xff] }
  0xc4   : > { %v1161_v3 = vadd.f32 %v1129_v55, %v1061_v30  ;;  %1263 = vst.msk [vmem:[%s1398_s21 + $0xc0] sm:$0xff] %vm264_vm2, %v1231_v1  ;;  %v1130_v17 = vmul.f32 %v2115_v43, %v1094_v36  ;;  %v830_v4 = vmul.f32 %v2194_v25, %v1637_v53  ;;  %v931_v14 = vmul.f32 %v1647_v60, %v2233_v50 }
  0xc5   : > { %v962_v6 = vadd.f32 %v930_v37, %v861_v26  ;;  %v762_v56 = vadd.f32 %v730_v34, %v662_v49  ;;  %v563_v62 = vadd.f32 %v531_v35, %v463_v31  ;;  %v631_v41 = vmul.f32 %v2216_v38, %v1633_v51  ;;  %v897_v34 = vld [vmem:[#allocation2 + $0x188] sm:$0xff] }
  0xc6   : > { %v1200_v40 = vadd.f32 %v2208_v8, %v1161_v3  ;;  %v1031_v13 = vmul.f32 %v1651_v63, %v2241_v18  ;;  %v364_v23 = vmul.f32 %v2186_v33, %v1627_v45  ;;  %v432_v46 = vmul.f32 %v993_v27, %v1629_v47 }
  0xc7   : > { %v1062_v10 = vadd.f32 %v1030_v22, %v962_v6  ;;  %v862_v5 = vadd.f32 %v830_v4, %v762_v56  ;;  %v663_v44 = vadd.f32 %v631_v41, %v563_v62  ;;  %v731_v55 = vmul.f32 %v994_v9, %v1635_v52  ;;  %v898_v62 = vld [vmem:[#allocation2 + $0x198] sm:$0xff] }
  0xc8   : > { %v1232_v24 = vadd.f32 %v1200_v40, %v2369_v11  ;;  %v1131_v29 = vmul.f32 %v2115_v43, %v1095_v39  ;;  %v464_v19 = vadd.f32 %v432_v46, %v364_v23  ;;  %v532_v42 = vmul.f32 %v2194_v25, %v1631_v48  ;;  %v1097_v23 = vld [vmem:[#allocation2 + $0x18a] sm:$0xff] }
  0xc9   : > { %v1162_v54 = vadd.f32 %v1130_v17, %v1062_v10  ;;  %v963_v0 = vadd.f32 %v931_v14, %v862_v5  ;;  %v763_v33 = vadd.f32 %v731_v55, %v663_v44  ;;  %v831_v27 = vmul.f32 %v1094_v36, %v1637_v53  ;;  %v2371_v10 = vld [vmem:[#allocation13_spill] sm:$0xff] }
  0xca   : > { %1264 = vst.msk [vmem:[%s1398_s21 + $0xc8] sm:$0xff] %vm264_vm2, %v1232_v24  ;;  %v932_v32 = vmul.f32 %v1647_v60, %v896_v57  ;;  %v564_v12 = vadd.f32 %v532_v42, %v464_v19  ;;  %v632_v28 = vmul.f32 %v2233_v50, %v1633_v51  ;;  %v365_v16 = vmul.f32 %v2216_v38, %v1627_v45  ;;  %v997_v38 = vld [vmem:[#allocation2 + $0x189] sm:$0xff]  ;;  %v998_v5 = vld [vmem:[#allocation2 + $0x199] sm:$0xff] }
  0xcb   : > { %v1201_v61 = vadd.f32 %v2208_v8, %v1162_v54  ;;  %v1063_v59 = vadd.f32 %v1031_v13, %v963_v0  ;;  %v863_v25 = vadd.f32 %v831_v27, %v763_v33  ;;  %v1032_v37 = vmul.f32 %v1651_v63, %v996_v58  ;;  %v1098_v19 = vld [vmem:[#allocation2 + $0x19a] sm:$0xff]  ;;  %v2372_v0 = vld [vmem:[#allocation14_spill] sm:$0xff] }
  0xcc   : > { %v433_v30 = vmul.f32 %v994_v9, %v1629_v47  ;;  %v664_v15 = vadd.f32 %v632_v28, %v564_v12  ;;  %v732_v20 = vmul.f32 %v2241_v18, %v1635_v52  ;;  %v533_v1 = vmul.f32 %v1094_v36, %v1631_v48 }
  0xcd   : > { %v1233_v21 = vadd.f32 %v1201_v61, %v2370_v7  ;;  %v1163_v26 = vadd.f32 %v1131_v29, %v1063_v59  ;;  %v964_v22 = vadd.f32 %v932_v32, %v863_v25  ;;  %v633_v49 = vmul.f32 %v896_v57, %v1633_v51  ;;  %v1099_v7 = vld [vmem:[#allocation2 + $0x1a2] sm:$0xff] }
  0xce   : > { %v465_v3 = vadd.f32 %v433_v30, %v365_v16  ;;  %v1132_v31 = vmul.f32 %v2115_v43, %v1096_v2  ;;  %v764_v9 = vadd.f32 %v732_v20, %v664_v15  ;;  %v832_v35 = vmul.f32 %v1095_v39, %v1637_v53  ;;  %v999_v16 = vld [vmem:[#allocation2 + $0x1a1] sm:$0xff] }
  0xcf   : > { %1265 = vst.msk [vmem:[%s1398_s21 + $0xd0] sm:$0xff] %vm264_vm2, %v1233_v21  ;;  %v1202_v6 = vadd.f32 %v2208_v8, %v1163_v26  ;;  %v1064_v17 = vadd.f32 %v1032_v37, %v964_v22  ;;  %v366_v36 = vmul.f32 %v2233_v50, %v1627_v45  ;;  %v933_v40 = vmul.f32 %v1647_v60, %v897_v34  ;;  %v2373_v21 = vld [vmem:[#allocation15_spill] sm:$0xff] }
  0xd0   : > { %v565_v4 = vadd.f32 %v533_v1, %v465_v3  ;;  %v864_v14 = vadd.f32 %v832_v35, %v764_v9  ;;  %v1033_v56 = vmul.f32 %v1651_v63, %v997_v38  ;;  %v434_v41 = vmul.f32 %v2241_v18, %v1629_v47 }
  0xd1   : > { %v1234_v13 = vadd.f32 %v1202_v6, %v2371_v10  ;;  %v1164_v57 = vadd.f32 %v1132_v31, %v1064_v17  ;;  %v733_v11 = vmul.f32 %v996_v58, %v1635_v52  ;;  %v534_v50 = vmul.f32 %v1095_v39, %v1631_v48  ;;  %v899_v39 = vld [vmem:[#allocation2 + $0x1a0] sm:$0xff] }
  0xd2   : > { %v665_v46 = vadd.f32 %v633_v49, %v565_v4  ;;  %v965_v24 = vadd.f32 %v933_v40, %v864_v14  ;;  %v466_v45 = vadd.f32 %v434_v41, %v366_v36  ;;  %v634_v44 = vmul.f32 %v897_v34, %v1633_v51  ;;  %v2375_v31 = vld [vmem:[#allocation17_spill] sm:$0xff] }
  0xd3   : > { %1266 = vst.msk [vmem:[%s1398_s21 + $0xd8] sm:$0xff] %vm264_vm2, %v1234_v13  ;;  %v1203_v55 = vadd.f32 %v2208_v8, %v1164_v57  ;;  %v833_v18 = vmul.f32 %v1096_v2, %v1637_v53  ;;  %v934_v54 = vmul.f32 %v1647_v60, %v898_v62  ;;  %v1133_v58 = vmul.f32 %v2115_v43, %v1097_v23 }
  0xd4   : > { %v765_v47 = vadd.f32 %v733_v11, %v665_v46  ;;  %v1065_v29 = vadd.f32 %v1033_v56, %v965_v24  ;;  %v566_v42 = vadd.f32 %v534_v50, %v466_v45  ;;  %v1034_v51 = vmul.f32 %v1651_v63, %v998_v5 }
  0xd5   : > { %v1235_v33 = vadd.f32 %v1203_v55, %v2372_v0  ;;  %v734_v61 = vmul.f32 %v997_v38, %v1635_v52  ;;  %v1134_v28 = vmul.f32 %v2115_v43, %v1098_v19  ;;  %v834_v37 = vmul.f32 %v1097_v23, %v1637_v53  ;;  %v2374_v53 = vld [vmem:[#allocation16_spill] sm:$0xff] }
  0xd6   : > { %v865_v48 = vadd.f32 %v833_v18, %v765_v47  ;;  %v1165_v27 = vadd.f32 %v1133_v58, %v1065_v29  ;;  %v666_v32 = vadd.f32 %v634_v44, %v566_v42  ;;  %v935_v2 = vmul.f32 %v1647_v60, %v899_v39 }
  0xd7   : > { %1267 = vst.msk [vmem:[%s1398_s21 + $0xe0] sm:$0xff] %vm264_vm2, %v1235_v33  ;;  %v1035_v20 = vmul.f32 %v1651_v63, %v999_v16  ;;  %v1135_v22 = vmul.f32 %v2115_v43, %v1099_v7 }
  0xd8   : > { %v966_v12 = vadd.f32 %v934_v54, %v865_v48  ;;  %v1204_v59 = vadd.f32 %v2208_v8, %v1165_v27  ;;  %v766_v25 = vadd.f32 %v734_v61, %v666_v32 }
  0xda   : > { %v1066_v30 = vadd.f32 %v1034_v51, %v966_v12  ;;  %v1236_v15 = vadd.f32 %v1204_v59, %v2373_v21  ;;  %v866_v52 = vadd.f32 %v834_v37, %v766_v25 }
  0xdc   : > { %v1166_v1 = vadd.f32 %v1134_v28, %v1066_v30  ;;  %1268 = vst.msk [vmem:[%s1398_s21 + $0xe8] sm:$0xff] %vm264_vm2, %v1236_v15  ;;  %v967_v26 = vadd.f32 %v935_v2, %v866_v52 }
  0xde   : > { %v1205_v34 = vadd.f32 %v2208_v8, %v1166_v1  ;;  %v1067_v38 = vadd.f32 %v1035_v20, %v967_v26 }
  0xe0   : > { %v1237_v3 = vadd.f32 %v1205_v34, %v2374_v53  ;;  %v1167_v60 = vadd.f32 %v1135_v22, %v1067_v38 }
  0xe2   : > { %1269 = vst.msk [vmem:[%s1398_s21 + $0xf0] sm:$0xff] %vm264_vm2, %v1237_v3  ;;  %v1206_v49 = vadd.f32 %v2208_v8, %v1167_v60 }
  0xe4   : > { %v1238_v9 = vadd.f32 %v1206_v49, %v2375_v31 }
  0xe6   : > { %1270 = vst.msk [vmem:[%s1398_s21 + $0xf8] sm:$0xff] %vm264_vm2, %v1238_v9 }
  0xe7 PF: > { %s13_s12 = sadd.s32 1, %s1359_s12  }
  0xe8   : > { %p10_p5 = scmp.ge.s32.totalorder %s13_s12, 4  }
  0xea   :  { %12 = sbr.rel (!%p10_p5) target bundleno = 1 (0x1), region = 68 }

// kernel: transformer_pallas.3
= control target key start
LH: loop header
LB: loop body
LE: loop exit
PB: predicated region body
PF: predicated region fallthrough
CT: control target
= control target key end

     0   :  { %s8891_s0 = inlined_call_operand.vmem [shape: f32[2,16,16,64], index: 0, kind: input, shape index: {}]   ;;  %s8892_s1 = inlined_call_operand.vmem [shape: f32[1,64], index: 1, kind: input, shape index: {}]   ;;  %s8893_s2 = inlined_call_operand.vmem [shape: f32[1,64], index: 2, kind: input, shape index: {}]   ;;  %s8894_s3 = inlined_call_operand.vmem [shape: f32[4,64,16], index: 3, kind: input, shape index: {}]   ;;  %s8895_s4 = inlined_call_operand.vmem [shape: f32[4,64,16], index: 4, kind: input, shape index: {}]   ;;  %s8896_s5 = inlined_call_operand.vmem [shape: f32[4,64,16], index: 5, kind: input, shape index: {}]   ;;  %s8897_s6 = inlined_call_operand.vmem [shape: f32[4,16,64], index: 6, kind: input, shape index: {}]   ;;  %s8898_s7 = inlined_call_operand.vmem [shape: f32[1,64], index: 7, kind: input, shape index: {}]   ;;  %s8899_s8 = inlined_call_operand.vmem [shape: f32[1,64], index: 8, kind: input, shape index: {}]   ;;  %s8900_s9 = inlined_call_operand.vmem [shape: f32[1,64], index: 9, kind: input, shape index: {}]   ;;  %s8901_s10 = inlined_call_operand.vmem [shape: f32[64,256], index: 10, kind: input, shape index: {}]   ;;  %s8902_s11 = inlined_call_operand.vmem [shape: f32[1,256], index: 11, kind: input, shape index: {}]   ;;  %s8903_s12 = inlined_call_operand.vmem [shape: f32[256,64], index: 12, kind: input, shape index: {}]   ;;  %s8904_s13 = inlined_call_operand.vmem [shape: f32[1,64], index: 13, kind: input, shape index: {}]   ;;  %s8905_s14 = inlined_call_operand.hbm [shape: f32[2,16,16,64], index: 14, kind: output, shape index: {}]  }
   0x1   :  { %8928 = sst [smem:[#allocation28_spill]] %s8891_s0 }
   0x2   :  { %8929 = sst [smem:[#allocation29_spill]] %s8892_s1 }
   0x3   :  { %8930 = sst [smem:[#allocation30_spill]] %s8893_s2 }
   0x4   :  { %8931 = sst [smem:[#allocation31_spill]] %s8900_s9 }
   0x5   :  { %8932 = sst [smem:[#allocation32_spill]] %s8902_s11 }
   0x6   :  { %8933 = sst [smem:[#allocation33_spill]] %s8903_s12 }
   0x7   :  { %8934 = sst [smem:[#allocation34_spill]] %s8904_s13 }
   0x8   :  { %8935 = sst [smem:[#allocation35_spill]] %s8905_s14 }
   0x9   :  { %19 = vsyncpa [#allocation4], 0 }
   0xa   :  { %21 = vsyncpa [#allocation4 + $0x1], 0  ;;  %s7107_s29 = smov 0   ;;  %s7109_s30 = smov 0  }
   0xb   :  { %s7111_s15 = smov 0   ;;  %s7113_s16 = smov 0  }
   0xc   :  { %s7115_s17 = smov 0   ;;  %s7117_s18 = smov 0  }
   0xd   :  { %s7119_s19 = smov 0   ;;  %s7121_s20 = smov 0  }
   0xe   :  { %s7123_s21 = smov 0   ;;  %s7125_s22 = smov 0  }
   0xf LB: > { %8936 = sst [smem:[#allocation6_spill]] %s7001_s16  ;;  %s39_s23 = sadd.s32 1, %s7013_s19  ;;  %s7025_s22 = sphi %s7125_s22, %s27_s22   ;;  %s7021_s21 = sphi %s7123_s21, %s9000_s21   ;;  %s7017_s20 = sphi %s7121_s20, %s8999_s20   ;;  %s7013_s19 = sphi %s7119_s19, %s8998_s19   ;;  %s7009_s18 = sphi %s7117_s18, %s8997_s18   ;;  %s7005_s17 = sphi %s7115_s17, %s8996_s17   ;;  %s7001_s16 = sphi %s7113_s16, %s8995_s16   ;;  %s6997_s15 = sphi %s7111_s15, %s8994_s15   ;;  %s6993_s30 = sphi %s7109_s30, %s8993_s30   ;;  %s6989_s29 = sphi %s7107_s29, %s8992_s29  }
  0x10   : > { %8937 = sst [smem:[#allocation7_spill]] %s7005_s17  ;;  %p40_p0 = scmp.ge.s32.totalorder %s39_s23, 2 }
  0x11   : > { %8938 = sst [smem:[#allocation8_spill]] %s7009_s18  ;;  %s42_s24 = sadd.s32 1, %s7017_s20 }
  0x12   : > { %s5185_s25 = sadd.s32 4294967295, %s7025_s22   ;;  %p64_p1 = scmp.ne.s32.totalorder %s6997_s15, %s6993_s30 }
  0x13   : > { %s9002_s23 = smov (%p40_p0, %s39_s23), 0  ;;  %s9004_s24 = smov (!%p40_p0, %s42_s24), %s7017_s20 }
  0x14   : > { %8939 = sst [smem:[#allocation9_spill]] %s9002_s23  ;;  %s46_s26 = sadd.s32 1, %s7021_s21 }
  0x15   : > { %p65_p2 = scmp.eq.s32.totalorder %s7025_s22, 0  ;;  %p44_p3 = scmp.ge.s32.totalorder %s9004_s24, 2 }
  0x16   : > { %p371_p4 = scmp.eq.s32.totalorder %s5185_s25, 7  ;;  %s5186_s27 = sadd.s32 4294967294, %s7025_s22  }
  0x17   : > { %p7168_p5 = por %p65_p2, %p64_p1  ;;  %s9006_s24 = smov (%p44_p3, %s9004_s24), 0 }
  0x18   : > { %8941 = sst [smem:[#allocation10_spill]] %s9006_s24  ;;  %s9008_s26 = smov (!%p44_p3, %s46_s26), %s7021_s21 }
  0x19   : > { %p7175_p6 = por %p371_p4, %p64_p1  ;;  %p376_p7 = scmp.ne.s32.totalorder %s6993_s30, %s6989_s29 }
  0x1a   : > { %p48_p8 = scmp.ge.s32.totalorder %s9008_s26, 2  ;;  %p377_p9 = scmp.eq.s32.totalorder %s5186_s27, 7 }
  0x1b   : > { %s51_s18 = ssub.s32 %s7017_s20, %s9006_s24  ;;  %s53_s25 = ssub.s32 %s7013_s19, %s9002_s23 }
  0x1c   : > { %s9010_s26 = smov (%p48_p8, %s9008_s26), 0  ;;  %p7187_p10 = por %p377_p9, %p376_p7 }
  0x1d   : > { %8943 = sst [smem:[#allocation11_spill]] %s9010_s26  ;;  %s50_s17 = ssub.s32 %s7021_s21, %s9010_s26 }
  0x1e   : > { %s52_s13 = sor.u32 %s51_s18, %s50_s17  ;;  %s57_s12 = sadd.s32 1, %s6997_s15 }
  0x1f   : > { %s54_s11 = sor.u32 %s53_s25, %s52_s13  ;;  %p5188_p12 = scmp.ge.s32.totalorder %s7025_s22, 8 }
  0x20   : > { %p55_p11 = scmp.eq.s32.totalorder %s54_s11, 0 }
  0x21   : > { %432 = sbr.rel (%p5188_p12) target bundleno = 53 (0x35), region = 68 }
  0x22   : > { %s7195_s9 = scalar_select %p55_p11, %s6997_s15, %s57_s12  }
  0x26   : > { %435 = sbr.rel (!%p7168_p5) target bundleno = 53 (0x35), region = 72  ;;  %s437_s27 = sand.u32 (%p7168_p5), 1, %s6997_s15  }
  0x27   : > { %s5520_s24 = sshll.u32 (%p7168_p5), %s7017_s20, 4  ;;  %s5189_s23 = sshll.u32 (%p7168_p5), %s437_s27, 6 }
  0x28   : > { %s442_s26 = sadd.s32 (%p7168_p5), %s7013_s19, %s5520_s24  ;;  %s5192_s17 = sshll.u32 (%p7168_p5), %s7021_s21, 5 }
  0x29   : > { %s444_s13 = sadd.s32 (%p7168_p5), %s5192_s17, %s442_s26  ;;  %s8945_s0 = sld [smem:[#allocation28_spill]] (%p7168_p5) }
  0x2a   : > { %s5193_s18 = sshll.u32 (%p7168_p5), %s444_s13, 3  ;;  %s439_s28 = scalar_lea.vmem (%p7168_p5), [#allocation2], %s5189_s23 }
  0x2f   : > { %s446_s25 = scalar_lea.vmem %s8945_s0, %s5193_s18 }
  0x30   : > { %v489_v0 = vld [vmem:[%s446_s25] sm:$0xff]  ;;  %v491_v1 = vld [vmem:[%s446_s25 + $0x10] sm:$0xff] }
  0x31   : > { %v493_v2 = vld [vmem:[%s446_s25 + $0x20] sm:$0xff]  ;;  %490 = vst [vmem:[%s439_s28] sm:$0xff] %v489_v0  ;;  %492 = vst [vmem:[%s439_s28 + $0x8] sm:$0xff] %v491_v1  ;;  %v495_v3 = vld [vmem:[%s446_s25 + $0x30] sm:$0xff] }
  0x32   : > { %494 = vst [vmem:[%s439_s28 + $0x10] sm:$0xff] %v493_v2  ;;  %v497_v4 = vld [vmem:[%s446_s25 + $0x40] sm:$0xff]  ;;  %v499_v5 = vld [vmem:[%s446_s25 + $0x50] sm:$0xff]  ;;  %496 = vst [vmem:[%s439_s28 + $0x18] sm:$0xff] %v495_v3 }
  0x33   : > { %498 = vst [vmem:[%s439_s28 + $0x20] sm:$0xff] %v497_v4  ;;  %500 = vst [vmem:[%s439_s28 + $0x28] sm:$0xff] %v499_v5  ;;  %v501_v6 = vld [vmem:[%s446_s25 + $0x60] sm:$0xff]  ;;  %v503_v7 = vld [vmem:[%s446_s25 + $0x70] sm:$0xff] }
  0x34   : > { %502 = vst [vmem:[%s439_s28 + $0x30] sm:$0xff] %v501_v6  ;;  %504 = vst [vmem:[%s439_s28 + $0x38] sm:$0xff] %v503_v7 }
  0x35 PF: > { %p5194_p13 = scmp.ge.s32.totalorder %s7025_s22, 1  ;;  %p509_p0 = scmp.lt.s32.totalorder %s7025_s22, 9 }
  0x37   : > { %p510_p1 = pnand %p5194_p13, %p509_p0 }
  0x39   : > { %513 = sbr.rel (%p510_p1) target bundleno = 4957 (0x135d), region = 110 }
  0x3e   : > { %s8911_s23 = sand.u32 1, %s6993_s30   ;;  %vm573_vm0 = vcmask 523264   ;;  %v714_v0 = vld [vmem:[%s8894_s3 + $0x38] sm:$0xff]  ;;  %v713_v2 = vld [vmem:[%s8894_s3 + $0x30] sm:$0xff]  ;;  %v712_v4 = vld [vmem:[%s8894_s3 + $0x28] sm:$0xff]  ;;  %s8946_s1 = sld [smem:[#allocation29_spill]] }
  0x3f   : > { %s7212_s24 = sshll.u32 %s8911_s23, 6  ;;  %v859_v1 = vld [vmem:[%s8895_s4 + $0x38] sm:$0xff]  ;;  %5938 = vmatprep.subr.mxu0 %v714_v0  ;;  %v858_v3 = vld [vmem:[%s8895_s4 + $0x30] sm:$0xff]  ;;  %v857_v5 = vld [vmem:[%s8895_s4 + $0x28] sm:$0xff]  ;;  %s8947_s2 = sld [smem:[#allocation30_spill]]  ;;  %vm1078_vm1 = vcmask 130048  }
  0x40   : > { %s7215_s26 = scalar_lea.vmem [#allocation2], %s7212_s24  ;;  %5966 = vmatprep.subr.mxu1 %v859_v1  ;;  %5939 = vmatpush3.msra.mxu0 %v714_v0  ;;  %v711_v6 = vld [vmem:[%s8894_s3 + $0x20] sm:$0xff]  ;;  %s8956_s18 = sld [smem:[#allocation31_spill]] }
  0x41   : > { %v563_v8 = vld [vmem:[%s7215_s26] sm:$0xff]  ;;  %v565_v9 = vld [vmem:[%s7215_s26 + $0x10] sm:$0xff]  ;;  %v564_v10 = vld [vmem:[%s7215_s26 + $0x8] sm:$0xff]  ;;  %5967 = vmatpush3.msra.mxu1 %v859_v1  ;;  %5940 = vmatprep.subr.mxu0 %v713_v2  ;;  %s8957_s12 = sld [smem:[#allocation33_spill]]  ;;  %s8796_s0 = scalar_lea.vmem [#allocation3], %s7212_s24 }
  0x42   : > { %v574_v11 = vsel %vm573_vm0, %v563_v8, 0.0  ;;  %v580_v12 = vsel %vm573_vm0, %v565_v9, 0.0  ;;  %v566_v13 = vld [vmem:[%s7215_s26 + $0x18] sm:$0xff]  ;;  %v577_v14 = vsel %vm573_vm0, %v564_v10, 0.0  ;;  %v567_v16 = vld [vmem:[%s7215_s26 + $0x20] sm:$0xff]  ;;  %v568_v17 = vld [vmem:[%s7215_s26 + $0x28] sm:$0xff]  ;;  %5968 = vmatprep.subr.mxu1 %v858_v3  ;;  %5941 = vmatpush3.msra.mxu0 %v713_v2 }
  0x43   : > { %575 = vadd.xlane.f32.xlu0 %v574_v11  ;;  %581 = vadd.xlane.f32.xlu1 %v580_v12  ;;  %v583_v15 = vsel %vm573_vm0, %v566_v13, 0.0  ;;  %v586_v18 = vsel %vm573_vm0, %v567_v16, 0.0  ;;  %v589_v19 = vsel %vm573_vm0, %v568_v17, 0.0  ;;  %v569_v20 = vld [vmem:[%s7215_s26 + $0x30] sm:$0xff]  ;;  %v570_v21 = vld [vmem:[%s7215_s26 + $0x38] sm:$0xff]  ;;  %v856_v7 = vld [vmem:[%s8895_s4 + $0x20] sm:$0xff] }
  0x44   : > { %v592_v22 = vsel %vm573_vm0, %v569_v20, 0.0  ;;  %v595_v23 = vsel %vm573_vm0, %v570_v21, 0.0  ;;  %5969 = vmatpush3.msra.mxu1 %v858_v3  ;;  %5942 = vmatprep.subr.mxu0 %v712_v4  ;;  %v854_v11 = vld [vmem:[%s8895_s4 + $0x10] sm:$0xff]  ;;  %v708_v12 = vld [vmem:[%s8894_s3 + $0x8] sm:$0xff]  ;;  %s8958_s11 = sld [smem:[#allocation32_spill]]  ;;  %s5092_s23 = sshll.u32 %s8796_s0, 4  ;;  %s8820_s23 = int_to_ptr.vmem [resolvable:$true] %s5092_s23 }
  0x45   : > { %5970 = vmatprep.subr.mxu1 %v857_v5  ;;  %5943 = vmatpush3.msra.mxu0 %v712_v4  ;;  %s8975_s25 = sld [smem:[#allocation34_spill]] }
  0x46   : > { %5971 = vmatpush3.msra.mxu1 %v857_v5  ;;  %5944 = vmatprep.subr.mxu0 %v711_v6  ;;  %v970_v5 = vld [vmem:[%s8896_s5 + $0x28] sm:$0xff]  ;;  %s8979_s24 = sld [smem:[#allocation7_spill]] }
  0x47   : > { %578 = vadd.xlane.f32.xlu0 %v577_v14  ;;  %584 = vadd.xlane.f32.xlu1 %v583_v15  ;;  %v707_v14 = vld [vmem:[%s8894_s3] sm:$0xff]  ;;  %s8981_s28 = sld [smem:[#allocation6_spill]] }
  0x48   : > { %5972 = vmatprep.subr.mxu1 %v856_v7  ;;  %5945 = vmatpush3.msra.mxu0 %v711_v6  ;;  %v852_v15 = vld [vmem:[%s8895_s4] sm:$0xff]  ;;  %s8982_s27 = sld [smem:[#allocation8_spill]] }
  0x49   : > { %5973 = vmatpush3.msra.mxu1 %v856_v7 }
  0x4b   : > { %587 = vadd.xlane.f32.xlu0 %v586_v18  ;;  %590 = vadd.xlane.f32.xlu1 %v589_v19 }
  0x4c   : > { %s5521_s17 = sshll.u32 %s8979_s24, 4 }
  0x4d   : > { %s5087_s13 = sadd.s32 %s8981_s28, %s5521_s17  ;;  %s8987_s28 = sld [smem:[#allocation35_spill]] }
  0x4e   : > { %s8988_s17 = sand.u32 1, %s6993_s30  }
  0x4f   : > { %593 = vadd.xlane.f32.xlu0 %v592_v22  ;;  %596 = vadd.xlane.f32.xlu1 %v595_v23 }
  0xcc   : > { %v576_v24 = vpop.xlane.xlu0 %575  ;;  %v582_v25 = vpop.xlane.xlu1 %581 }
  0xcd   : > { %v599_v26 = vmul.f32 0.015625, %v576_v24  ;;  %v601_v27 = vmul.f32 0.015625, %v582_v25 }
  0xcf   : > { %v7233_v28 = vsub.f32 %v563_v8, %v599_v26  ;;  %v7235_v29 = vsub.f32 %v565_v9, %v601_v27  ;;  %v710_v8 = vld [vmem:[%s8894_s3 + $0x18] sm:$0xff] }
  0xd0   : > { %v579_v30 = vpop.xlane.xlu0 %578  ;;  %v585_v31 = vpop.xlane.xlu1 %584  ;;  %v855_v9 = vld [vmem:[%s8895_s4 + $0x18] sm:$0xff]  ;;  %5946 = vmatprep.subr.mxu0 %v710_v8 }
  0xd1   : > { %v600_v32 = vmul.f32 0.015625, %v579_v30  ;;  %v602_v33 = vmul.f32 0.015625, %v585_v31  ;;  %v615_v34 = vmul.f32 %v7233_v28, %v7233_v28  ;;  %v617_v35 = vmul.f32 %v7235_v29, %v7235_v29  ;;  %5974 = vmatprep.subr.mxu1 %v855_v9  ;;  %5947 = vmatpush3.msra.mxu0 %v710_v8 }
  0xd2   : > { %5975 = vmatpush3.msra.mxu1 %v855_v9 }
  0xd3   : > { %v7241_v36 = vsub.f32 %v564_v10, %v600_v32  ;;  %v7243_v37 = vsub.f32 %v566_v13, %v602_v33  ;;  %v623_v38 = vsel %vm573_vm0, %v615_v34, 0.0  ;;  %v629_v41 = vsel %vm573_vm0, %v617_v35, 0.0  ;;  %v709_v10 = vld [vmem:[%s8894_s3 + $0x10] sm:$0xff]  ;;  %5976 = vmatprep.subr.mxu1 %v854_v11  ;;  %v853_v13 = vld [vmem:[%s8895_s4 + $0x8] sm:$0xff] }
  0xd4   : > { %624 = vadd.xlane.f32.xlu0 %v623_v38  ;;  %v588_v39 = vpop.xlane.xlu0 %587  ;;  %v591_v40 = vpop.xlane.xlu1 %590  ;;  %5948 = vmatprep.subr.mxu0 %v709_v10 }
  0xd5   : > { %v603_v42 = vmul.f32 0.015625, %v588_v39  ;;  %v604_v43 = vmul.f32 0.015625, %v591_v40  ;;  %v616_v44 = vmul.f32 %v7241_v36, %v7241_v36  ;;  %v618_v45 = vmul.f32 %v7243_v37, %v7243_v37  ;;  %5949 = vmatpush3.msra.mxu0 %v709_v10  ;;  %5977 = vmatpush3.msra.mxu1 %v854_v11 }
  0xd6   : > { %5950 = vmatprep.subr.mxu0 %v708_v12  ;;  %5978 = vmatprep.subr.mxu1 %v853_v13 }
  0xd7   : > { %v7251_v46 = vsub.f32 %v567_v16, %v603_v42  ;;  %v7253_v47 = vsub.f32 %v568_v17, %v604_v43  ;;  %v626_v48 = vsel %vm573_vm0, %v616_v44, 0.0  ;;  %v632_v51 = vsel %vm573_vm0, %v618_v45, 0.0  ;;  %5951 = vmatpush3.msra.mxu0 %v708_v12  ;;  %5979 = vmatpush3.msra.mxu1 %v853_v13  ;;  %v7324_v16 = vld [vmem:[%s8896_s5 + $0x38] sm:$0xff]  ;;  %v5197_v45 = vld [vmem:[%s8946_s1] ss:$0 sm:$0xff] }
  0xd8   : > { %630 = vadd.xlane.f32.xlu0 %v629_v41  ;;  %627 = vadd.xlane.f32.xlu1 %v626_v48  ;;  %v594_v49 = vpop.xlane.xlu0 %593  ;;  %v597_v50 = vpop.xlane.xlu1 %596  ;;  %v968_v13 = vld [vmem:[%s8896_s5 + $0x18] sm:$0xff] }
  0xd9   : > { %v605_v52 = vmul.f32 0.015625, %v594_v49  ;;  %v606_v53 = vmul.f32 0.015625, %v597_v50  ;;  %v619_v54 = vmul.f32 %v7251_v46, %v7251_v46  ;;  %v620_v55 = vmul.f32 %v7253_v47, %v7253_v47  ;;  %5952 = vmatprep.subr.mxu0 %v707_v14  ;;  %5980 = vmatprep.subr.mxu1 %v852_v15  ;;  %v5198_v50 = vld [vmem:[%s8947_s2] ss:$0 sm:$0xff] }
  0xda   : > { %5953 = vmatpush3.msra.mxu0 %v707_v14  ;;  %5981 = vmatpush3.msra.mxu1 %v852_v15 }
  0xdb   : > { %v7261_v56 = vsub.f32 %v569_v20, %v605_v52  ;;  %v7263_v57 = vsub.f32 %v570_v21, %v606_v53  ;;  %v635_v58 = vsel %vm573_vm0, %v619_v54, 0.0  ;;  %v638_v59 = vsel %vm573_vm0, %v620_v55, 0.0  ;;  %5994 = vmatprep.subr.mxu0 %v7324_v16 }
  0xdc   : > { %633 = vadd.xlane.f32.xlu1 %v632_v51  ;;  %636 = vadd.xlane.f32.xlu0 %v635_v58 }
  0xdd   : > { %v621_v60 = vmul.f32 %v7261_v56, %v7261_v56  ;;  %v622_v61 = vmul.f32 %v7263_v57, %v7263_v57 }
  0xdf   : > { %v641_v62 = vsel %vm573_vm0, %v621_v60, 0.0  ;;  %v644_v63 = vsel %vm573_vm0, %v622_v61, 0.0 }
  0xe0   : > { %639 = vadd.xlane.f32.xlu1 %v638_v59  ;;  %642 = vadd.xlane.f32.xlu0 %v641_v62 }
  0xe4   : > { %645 = vadd.xlane.f32.xlu1 %v644_v63 }
 0x15d   : > { %v625_v17 = vpop.xlane.xlu0 %624 }
 0x15e   : > { %v647_v18 = vmul.f32 0.015625, %v625_v17  ;;  %v965_v17 = vld [vmem:[%s8896_s5] sm:$0xff] }
 0x160   : > { %v655_v19 = vadd.f32 1e-05, %v647_v18 }
 0x161   : > { %v628_v20 = vpop.xlane.xlu1 %627  ;;  %v631_v21 = vpop.xlane.xlu0 %630 }
 0x162   : > { %6685 = vrsqrt.f32 %v655_v19  ;;  %v648_v22 = vmul.f32 0.015625, %v628_v20  ;;  %v649_v23 = vmul.f32 0.015625, %v631_v21 }
 0x164   : > { %v656_v24 = vadd.f32 1e-05, %v648_v22  ;;  %v657_v25 = vadd.f32 1e-05, %v649_v23 }
 0x165   : > { %v634_v26 = vpop.xlane.xlu1 %633  ;;  %v637_v27 = vpop.xlane.xlu0 %636 }
 0x166   : > { %6687 = vrsqrt.f32 %v656_v24  ;;  %v650_v30 = vmul.f32 0.015625, %v634_v26  ;;  %v651_v31 = vmul.f32 0.015625, %v637_v27 }
 0x167   : > { %6689 = vrsqrt.f32 %v657_v25 }
 0x168   : > { %v658_v32 = vadd.f32 1e-05, %v650_v30  ;;  %v659_v33 = vadd.f32 1e-05, %v651_v31 }
 0x169   : > { %v640_v34 = vpop.xlane.xlu1 %639  ;;  %v643_v35 = vpop.xlane.xlu0 %642 }
 0x16a   : > { %6691 = vrsqrt.f32 %v658_v32  ;;  %v652_v38 = vmul.f32 0.015625, %v640_v34  ;;  %v653_v39 = vmul.f32 0.015625, %v643_v35 }
 0x16b   : > { %6693 = vrsqrt.f32 %v659_v33 }
 0x16c   : > { %v660_v40 = vadd.f32 1e-05, %v652_v38  ;;  %v661_v41 = vadd.f32 1e-05, %v653_v39 }
 0x16d   : > { %v646_v42 = vpop.xlane.xlu1 %645 }
 0x16e   : > { %6695 = vrsqrt.f32 %v660_v40  ;;  %v654_v43 = vmul.f32 0.015625, %v646_v42 }
 0x16f   : > { %v6686_v44 = vpop.eup %6685  ;;  %6697 = vrsqrt.f32 %v661_v41 }
 0x170   : > { %v671_v48 = vmul.f32 %v6686_v44, %v7233_v28  ;;  %v662_v49 = vadd.f32 1e-05, %v654_v43 }
 0x172   : > { %v685_v51 = vmul.f32 %v5197_v45, %v671_v48  ;;  %6699 = vrsqrt.f32 %v662_v49  ;;  %v5270_v49 = vld [vmem:[%s8895_s4 + $0x78] sm:$0xff] }
 0x173   : > { %v6688_v52 = vpop.eup %6687 }
 0x174   : > { %v6690_v53 = vpop.eup %6689  ;;  %v7334_v54 = vadd.f32 %v5198_v50, %v685_v51  ;;  %v672_v55 = vmul.f32 %v6688_v52, %v7241_v36  ;;  %v5269_v52 = vld [vmem:[%s8895_s4 + $0x70] sm:$0xff] }
 0x175   : > { %v673_v58 = vmul.f32 %v6690_v53, %v7235_v29  ;;  %v971_v29 = vld [vmem:[%s8896_s5 + $0x30] sm:$0xff]  ;;  %v5268_v53 = vld [vmem:[%s8895_s4 + $0x68] sm:$0xff] }
 0x176   : > { %v686_v59 = vmul.f32 %v5197_v45, %v672_v55  ;;  %5954 = vmatprep.mubr.msk.f32.mxu0 %vm573_vm0, %v7334_v54  ;;  %5982 = vmatprep.mubr.msk.f32.mxu1 %vm573_vm0, %v7334_v54 }
 0x177   : > { %v6692_v28 = vpop.eup %6691  ;;  %v687_v60 = vmul.f32 %v5197_v45, %v673_v58 }
 0x178   : > { %v6694_v61 = vpop.eup %6693  ;;  %v7342_v62 = vadd.f32 %v5198_v50, %v686_v59  ;;  %v674_v63 = vmul.f32 %v6692_v28, %v7243_v37  ;;  %v5267_v59 = vld [vmem:[%s8895_s4 + $0x60] sm:$0xff]  ;;  %v5266_v28 = vld [vmem:[%s8895_s4 + $0x58] sm:$0xff] }
 0x179   : > { %v7345_v0 = vadd.f32 %v5198_v50, %v687_v60  ;;  %v675_v36 = vmul.f32 %v6694_v61, %v7251_v46 }
 0x17a   : > { %v688_v1 = vmul.f32 %v5197_v45, %v674_v63  ;;  %5955 = vmatmul.mubr.msk.f32.vlgmr.msra.gmra.mxu0 %vm573_vm0, %v7342_v62  ;;  %5983 = vmatmul.mubr.msk.f32.vlgmr.msra.gmra.mxu1 %vm573_vm0, %v7342_v62  ;;  %v5265_v63 = vld [vmem:[%s8895_s4 + $0x50] sm:$0xff] }
 0x17b   : > { %v6696_v2 = vpop.eup %6695  ;;  %v689_v3 = vmul.f32 %v5197_v45, %v675_v36  ;;  %5957 = vmatprep.mubr.msk.f32.mxu0 %vm573_vm0, %v7345_v0  ;;  %5985 = vmatprep.mubr.msk.f32.mxu1 %vm573_vm0, %v7345_v0  ;;  %v5264_v36 = vld [vmem:[%s8895_s4 + $0x48] sm:$0xff] }
 0x17c   : > { %v6698_v37 = vpop.eup %6697  ;;  %v7359_v46 = vadd.f32 %v5198_v50, %v688_v1  ;;  %v676_v4 = vmul.f32 %v6696_v2, %v7253_v47  ;;  %5995 = vmatpush3.msra.mxu0 %v7324_v16  ;;  %v969_v47 = vld [vmem:[%s8896_s5 + $0x20] sm:$0xff]  ;;  %v966_v16 = vld [vmem:[%s8896_s5 + $0x8] sm:$0xff] }
 0x17d   : > { %v7366_v6 = vadd.f32 %v5198_v50, %v689_v3  ;;  %v677_v7 = vmul.f32 %v6698_v37, %v7261_v56  ;;  %5996 = vmatprep.subr.mxu0 %v971_v29 }
 0x17e   : > { %v690_v8 = vmul.f32 %v5197_v45, %v676_v4  ;;  %5997 = vmatpush3.msra.mxu0 %v971_v29  ;;  %5986 = vmatmul.mubr.msk.f32.gmra.mxu1 %vm573_vm0, %v7359_v46  ;;  %v5263_v29 = vld [vmem:[%s8895_s4 + $0x40] sm:$0xff] }
 0x17f   : > { %v6700_v9 = vpop.eup %6699  ;;  %v691_v10 = vmul.f32 %v5197_v45, %v677_v7  ;;  %5958 = vmatmul.mubr.msk.f32.gmra.mxu0 %vm573_vm0, %v7359_v46  ;;  %5998 = vmatprep.subr.mxu0 %v970_v5 }
 0x180   : > { %v7376_v11 = vadd.f32 %v5198_v50, %v690_v8  ;;  %v678_v56 = vmul.f32 %v6700_v9, %v7263_v57  ;;  %5960 = vmatprep.mubr.msk.f32.mxu0 %vm573_vm0, %v7366_v6  ;;  %5988 = vmatprep.mubr.msk.f32.mxu1 %vm573_vm0, %v7366_v6  ;;  %v967_v57 = vld [vmem:[%s8896_s5 + $0x10] sm:$0xff] }
 0x181   : > { %v7383_v12 = vadd.f32 %v5198_v50, %v691_v10  ;;  %5999 = vmatpush3.msra.mxu0 %v970_v5 }
 0x182   : > { %v692_v14 = vmul.f32 %v5197_v45, %v678_v56  ;;  %6000 = vmatprep.subr.mxu0 %v969_v47  ;;  %5989 = vmatmul.mubr.msk.f32.gmra.mxu1 %vm573_vm0, %v7376_v11 }
 0x183   : > { %6001 = vmatpush3.msra.mxu0 %v969_v47  ;;  %5991 = vmatprep.mubr.msk.f32.mxu1 %vm573_vm0, %v7383_v12 }
 0x184   : > { %v7395_v15 = vadd.f32 %v5198_v50, %v692_v14  ;;  %5961 = vmatmul.mubr.msk.f32.gmra.mxu0 %vm573_vm0, %v7376_v11  ;;  %6002 = vmatprep.subr.mxu0 %v968_v13 }
 0x185   : > { %5963 = vmatprep.mubr.msk.f32.mxu0 %vm573_vm0, %v7383_v12  ;;  %6003 = vmatpush3.msra.mxu0 %v968_v13 }
 0x186   : > { %6004 = vmatprep.subr.mxu0 %v967_v57  ;;  %5992 = vmatmul.mubr.msk.f32.gmra.mxu1 %vm573_vm0, %v7395_v15 }
 0x187   : > { %6005 = vmatpush3.msra.mxu0 %v967_v57 }
 0x188   : > { %5964 = vmatmul.mubr.msk.f32.gmra.mxu0 %vm573_vm0, %v7395_v15  ;;  %6006 = vmatprep.subr.mxu0 %v966_v16 }
 0x189   : > { %6007 = vmatpush3.msra.mxu0 %v966_v16  ;;  %6010 = vmatprep.mubr.msk.f32.mxu0 %vm573_vm0, %v7334_v54 }
 0x18a   : > { %6008 = vmatprep.subr.mxu0 %v965_v17 }
 0x18b   : > { %6009 = vmatpush3.msra.mxu0 %v965_v17 }
 0x18c   : > { %6011 = vmatmul.mubr.msk.f32.vlgmr.msra.gmra.mxu0 %vm573_vm0, %v7342_v62 }
 0x18d   : > { %6013 = vmatprep.mubr.msk.f32.mxu0 %vm573_vm0, %v7345_v0 }
 0x190   : > { %6014 = vmatmul.mubr.msk.f32.gmra.mxu0 %vm573_vm0, %v7359_v46 }
 0x191   : > { %6016 = vmatprep.mubr.msk.f32.mxu0 %vm573_vm0, %v7366_v6 }
 0x194   : > { %6017 = vmatmul.mubr.msk.f32.gmra.mxu0 %vm573_vm0, %v7376_v11 }
 0x195   : > { %6019 = vmatprep.mubr.msk.f32.mxu0 %vm573_vm0, %v7383_v12 }
 0x198   : > { %6020 = vmatmul.mubr.msk.f32.gmra.mxu0 %vm573_vm0, %v7395_v15 }
 0x23a   : > { %v5956_v18 = vpop.f32.mrf.mxu0  ;;  %v5984_v19 = vpop.f32.mrf.mxu1 }
 0x23b   : > { %v845_v50 = vmul.f32 0.25, %v5956_v18 }
 0x23c   : > { %v805_v20 = vpop.f32.mrf.mxu0  ;;  %v926_v21 = vpop.f32.mrf.mxu1 }
 0x23d   : > { %v844_v22 = vmul.f32 0.25, %v805_v20 }
 0x23e   : > { %v5987_v23 = vpop.f32.mrf.mxu1 }
 0x23f   : > { %v5959_v24 = vpop.f32.mrf.mxu0  ;;  %6038 = vmatprep.mubr.msk.f32.mxu1 %vm1078_vm1, %v844_v22 }
 0x240   : > { %v936_v25 = vpop.f32.mrf.mxu1  ;;  %v847_v55 = vmul.f32 0.25, %v5959_v24 }
 0x241   : > { %v815_v26 = vpop.f32.mrf.mxu0 }
 0x242   : > { %v5990_v27 = vpop.f32.mrf.mxu1  ;;  %v846_v51 = vmul.f32 0.25, %v815_v26 }
 0x244   : > { %v7428_v30 = vpop.f32.mrf.mxu0  ;;  %v946_v31 = vpop.f32.mrf.mxu1 }
 0x245   : > { %v849_v60 = vmul.f32 0.25, %v7428_v30 }
 0x246   : > { %v825_v32 = vpop.f32.mrf.mxu0  ;;  %v5993_v33 = vpop.f32.mrf.mxu1 }
 0x247   : > { %6022 = vmatprep.subr.msk.mxu1 %vm1078_vm1, %v5993_v33  ;;  %v848_v58 = vmul.f32 0.25, %v825_v32 }
 0x248   : > { %v7431_v34 = vpop.f32.mrf.mxu0  ;;  %v956_v35 = vpop.f32.mrf.mxu1  ;;  %6023 = vmatpush3.xpose.msk.msra.mxu1 %vm1078_vm1, %v5993_v33 }
 0x249   : > { %6024 = vmatprep.subr.msk.mxu1 %vm1078_vm1, %v956_v35  ;;  %v851_v1 = vmul.f32 0.25, %v7431_v34 }
 0x24a   : > { %v835_v38 = vpop.f32.mrf.mxu0 }
 0x24b   : > { %v850_v61 = vmul.f32 0.25, %v835_v38 }
 0x24c   : > { %v6012_v39 = vpop.f32.mrf.mxu0  ;;  %6025 = vmatpush3.xpose.msk.msra.mxu1 %vm1078_vm1, %v956_v35 }
 0x24d   : > { %6026 = vmatprep.subr.msk.mxu1 %vm1078_vm1, %v5990_v27 }
 0x24e   : > { %v1039_v40 = vpop.f32.mrf.mxu0 }
 0x250   : > { %v6015_v41 = vpop.f32.mrf.mxu0  ;;  %6027 = vmatpush3.xpose.msk.msra.mxu1 %vm1078_vm1, %v5990_v27 }
 0x251   : > { %6028 = vmatprep.subr.msk.mxu1 %vm1078_vm1, %v946_v31 }
 0x252   : > { %v1049_v42 = vpop.f32.mrf.mxu0 }
 0x254   : > { %v6018_v43 = vpop.f32.mrf.mxu0  ;;  %6029 = vmatpush3.xpose.msk.msra.mxu1 %vm1078_vm1, %v946_v31 }
 0x255   : > { %6030 = vmatprep.subr.msk.mxu1 %vm1078_vm1, %v5987_v23 }
 0x256   : > { %v1059_v44 = vpop.f32.mrf.mxu0 }
 0x258   : > { %v6021_v45 = vpop.f32.mrf.mxu0  ;;  %6031 = vmatpush3.xpose.msk.msra.mxu1 %vm1078_vm1, %v5987_v23 }
 0x259   : > { %6050 = vmatprep.subr.mxu0 %v6021_v45  ;;  %6032 = vmatprep.subr.msk.mxu1 %vm1078_vm1, %v936_v25 }
 0x25a   : > { %v1069_v48 = vpop.f32.mrf.mxu0  ;;  %6051 = vmatpush3.msra.mxu0 %v6021_v45 }
 0x25b   : > { %6052 = vmatprep.subr.mxu0 %v1069_v48 }
 0x25c   : > { %6053 = vmatpush3.msra.mxu0 %v1069_v48  ;;  %6033 = vmatpush3.xpose.msk.msra.mxu1 %vm1078_vm1, %v936_v25 }
 0x25d   : > { %6054 = vmatprep.subr.mxu0 %v6018_v43  ;;  %6034 = vmatprep.subr.msk.mxu1 %vm1078_vm1, %v5984_v19 }
 0x25e   : > { %6055 = vmatpush3.msra.mxu0 %v6018_v43 }
 0x25f   : > { %6056 = vmatprep.subr.mxu0 %v1059_v44 }
 0x260   : > { %6057 = vmatpush3.msra.mxu0 %v1059_v44  ;;  %6035 = vmatpush3.xpose.msk.msra.mxu1 %vm1078_vm1, %v5984_v19 }
 0x261   : > { %6058 = vmatprep.subr.mxu0 %v6015_v41  ;;  %6036 = vmatprep.subr.msk.mxu1 %vm1078_vm1, %v926_v21 }
 0x262   : > { %6059 = vmatpush3.msra.mxu0 %v6015_v41 }
 0x263   : > { %6060 = vmatprep.subr.mxu0 %v1049_v42 }
 0x264   : > { %6061 = vmatpush3.msra.mxu0 %v1049_v42  ;;  %6037 = vmatpush3.xpose.msk.msra.mxu1 %vm1078_vm1, %v926_v21 }
 0x265   : > { %6062 = vmatprep.subr.mxu0 %v6012_v39  ;;  %6106 = vmatprep.subr.mxu1 %v5270_v49 }
 0x266   : > { %6063 = vmatpush3.msra.mxu0 %v6012_v39 }
 0x267   : > { %6064 = vmatprep.subr.mxu0 %v1039_v40  ;;  %6039 = vmatmul.mubr.msk.f32.vlgmr.msra.gmra.mxu1 %vm1078_vm1, %v845_v50 }
 0x268   : > { %6065 = vmatpush3.msra.mxu0 %v1039_v40  ;;  %6041 = vmatprep.mubr.msk.f32.mxu1 %vm1078_vm1, %v846_v51 }
 0x269   : > { %6107 = vmatpush3.msra.mxu1 %v5270_v49 }
 0x26a   : > { %6108 = vmatprep.subr.mxu1 %v5269_v52 }
 0x26b   : > { %6109 = vmatpush3.msra.mxu1 %v5269_v52 }
 0x26c   : > { %6042 = vmatmul.mubr.msk.f32.gmra.mxu1 %vm1078_vm1, %v847_v55  ;;  %6110 = vmatprep.subr.mxu1 %v5268_v53 }
 0x26d   : > { %6044 = vmatprep.mubr.msk.f32.mxu1 %vm1078_vm1, %v848_v58  ;;  %6111 = vmatpush3.msra.mxu1 %v5268_v53 }
 0x26e   : > { %6112 = vmatprep.subr.mxu1 %v5267_v59 }
 0x26f   : > { %6113 = vmatpush3.msra.mxu1 %v5267_v59 }
 0x270   : > { %6045 = vmatmul.mubr.msk.f32.gmra.mxu1 %vm1078_vm1, %v849_v60  ;;  %6114 = vmatprep.subr.mxu1 %v5266_v28 }
 0x271   : > { %6047 = vmatprep.mubr.msk.f32.mxu1 %vm1078_vm1, %v850_v61  ;;  %6115 = vmatpush3.msra.mxu1 %v5266_v28 }
 0x272   : > { %6116 = vmatprep.subr.mxu1 %v5265_v63 }
 0x273   : > { %6117 = vmatpush3.msra.mxu1 %v5265_v63 }
 0x274   : > { %6048 = vmatmul.mubr.msk.f32.gmra.mxu1 %vm1078_vm1, %v851_v1  ;;  %6118 = vmatprep.subr.mxu1 %v5264_v36 }
 0x275   : > { %6119 = vmatpush3.msra.mxu1 %v5264_v36  ;;  %6122 = vmatprep.mubr.msk.f32.mxu1 %vm573_vm0, %v7334_v54 }
 0x276   : > { %6120 = vmatprep.subr.mxu1 %v5263_v29 }
 0x277   : > { %6121 = vmatpush3.msra.mxu1 %v5263_v29 }
 0x278   : > { %6123 = vmatmul.mubr.msk.f32.vlgmr.msra.gmra.mxu1 %vm573_vm0, %v7342_v62 }
 0x279   : > { %6125 = vmatprep.mubr.msk.f32.mxu1 %vm573_vm0, %v7345_v0 }
 0x27c   : > { %6126 = vmatmul.mubr.msk.f32.gmra.mxu1 %vm573_vm0, %v7359_v46 }
 0x27d   : > { %6128 = vmatprep.mubr.msk.f32.mxu1 %vm573_vm0, %v7366_v6 }
 0x280   : > { %6129 = vmatmul.mubr.msk.f32.gmra.mxu1 %vm573_vm0, %v7376_v11 }
 0x281   : > { %6131 = vmatprep.mubr.msk.f32.mxu1 %vm573_vm0, %v7383_v12 }
 0x284   : > { %6132 = vmatmul.mubr.msk.f32.gmra.mxu1 %vm573_vm0, %v7395_v15 }
 0x327   : > { %v6040_v2 = vpop.f32.mrf.mxu1 }
 0x328   : > { %v1235_v3 = vsel %vm573_vm0, %v6040_v2, -inf }
 0x329   : > { %1236 = vmax.xlane.f32.xlu1 %v1235_v3  ;;  %v1193_v37 = vpop.f32.mrf.mxu1 }
 0x32a   : > { %v1232_v4 = vsel %vm573_vm0, %v1193_v37, -inf }
 0x32b   : > { %1233 = vmax.xlane.f32.xlu0 %v1232_v4 }
 0x32c   : > { %v6043_v5 = vpop.f32.mrf.mxu1 }
 0x32d   : > { %v1241_v7 = vsel %vm573_vm0, %v6043_v5, -inf }
 0x32e   : > { %1242 = vmax.xlane.f32.xlu1 %v1241_v7  ;;  %v1203_v8 = vpop.f32.mrf.mxu1 }
 0x32f   : > { %v1238_v9 = vsel %vm573_vm0, %v1203_v8, -inf }
 0x330   : > { %1239 = vmax.xlane.f32.xlu0 %v1238_v9  ;;  %v6046_v10 = vpop.f32.mrf.mxu1 }
 0x331   : > { %v1247_v47 = vsel %vm573_vm0, %v6046_v10, -inf }
 0x332   : > { %1248 = vmax.xlane.f32.xlu1 %v1247_v47  ;;  %v1213_v56 = vpop.f32.mrf.mxu1 }
 0x333   : > { %v1244_v13 = vsel %vm573_vm0, %v1213_v56, -inf }
 0x334   : > { %1245 = vmax.xlane.f32.xlu0 %v1244_v13  ;;  %v6049_v14 = vpop.f32.mrf.mxu1 }
 0x335   : > { %v1253_v57 = vsel %vm573_vm0, %v6049_v14, -inf }
 0x336   : > { %1254 = vmax.xlane.f32.xlu1 %v1253_v57  ;;  %v1223_v16 = vpop.f32.mrf.mxu1 }
 0x337   : > { %v1250_v17 = vsel %vm573_vm0, %v1223_v16, -inf }
 0x338   : > { %v6124_v18 = vpop.f32.mrf.mxu1  ;;  %1251 = vmax.xlane.f32.xlu0 %v1250_v17 }
 0x33a   : > { %v1648_v19 = vpop.f32.mrf.mxu1 }
 0x33c   : > { %v6127_v20 = vpop.f32.mrf.mxu1 }
 0x33e   : > { %v1658_v21 = vpop.f32.mrf.mxu1 }
 0x340   : > { %v6130_v22 = vpop.f32.mrf.mxu1 }
 0x342   : > { %v1668_v23 = vpop.f32.mrf.mxu1 }
 0x344   : > { %v6133_v24 = vpop.f32.mrf.mxu1 }
 0x345   : > { %6162 = vmatprep.subr.msk.mxu1 %vm1078_vm1, %v6133_v24 }
 0x346   : > { %v1678_v25 = vpop.f32.mrf.mxu1  ;;  %6163 = vmatpush3.xpose.msk.msra.mxu1 %vm1078_vm1, %v6133_v24 }
 0x347   : > { %6164 = vmatprep.subr.msk.mxu1 %vm1078_vm1, %v1678_v25 }
 0x34a   : > { %6165 = vmatpush3.xpose.msk.msra.mxu1 %vm1078_vm1, %v1678_v25 }
 0x34b   : > { %6166 = vmatprep.subr.msk.mxu1 %vm1078_vm1, %v6130_v22 }
 0x34e   : > { %6167 = vmatpush3.xpose.msk.msra.mxu1 %vm1078_vm1, %v6130_v22 }
 0x34f   : > { %6168 = vmatprep.subr.msk.mxu1 %vm1078_vm1, %v1668_v23 }
 0x352   : > { %6169 = vmatpush3.xpose.msk.msra.mxu1 %vm1078_vm1, %v1668_v23  ;;  %v5253_v23 = vld [vmem:[%s8894_s3 + $0x70] sm:$0xff] }
 0x353   : > { %6170 = vmatprep.subr.msk.mxu1 %vm1078_vm1, %v6127_v20 }
 0x356   : > { %6171 = vmatpush3.xpose.msk.msra.mxu1 %vm1078_vm1, %v6127_v20 }
 0x357   : > { %6172 = vmatprep.subr.msk.mxu1 %vm1078_vm1, %v1658_v21 }
 0x35a   : > { %6173 = vmatpush3.xpose.msk.msra.mxu1 %vm1078_vm1, %v1658_v21 }
 0x35b   : > { %6174 = vmatprep.subr.msk.mxu1 %vm1078_vm1, %v6124_v18 }
 0x35e   : > { %6175 = vmatpush3.xpose.msk.msra.mxu1 %vm1078_vm1, %v6124_v18 }
 0x35f   : > { %6176 = vmatprep.subr.msk.mxu1 %vm1078_vm1, %v1648_v19 }
 0x362   : > { %6177 = vmatpush3.xpose.msk.msra.mxu1 %vm1078_vm1, %v1648_v19 }
 0x3b2   : > { %v1237_v26 = vpop.xlane.xlu1 %1236 }
 0x3b3   : > { %v1257_v27 = vsub.f32 %v6040_v2, %v1237_v26  ;;  %v5252_v26 = vld [vmem:[%s8894_s3 + $0x68] sm:$0xff] }
 0x3b4   : > { %v1234_v30 = vpop.xlane.xlu0 %1233 }
 0x3b5   : > { %v1266_v31 = vmul.f32 1.442695, %v1257_v27  ;;  %v1256_v32 = vsub.f32 %v1193_v37, %v1234_v30 }
 0x3b7   : > { %6701 = vpow2.f32 %v1266_v31  ;;  %v1264_v33 = vmul.f32 1.442695, %v1256_v32  ;;  %v1243_v34 = vpop.xlane.xlu1 %1242  ;;  %v5251_v32 = vld [vmem:[%s8894_s3 + $0x60] sm:$0xff] }
 0x3b8   : > { %v1259_v35 = vsub.f32 %v6043_v5, %v1243_v34 }
 0x3b9   : > { %6703 = vpow2.f32 %v1264_v33  ;;  %v1240_v38 = vpop.xlane.xlu0 %1239 }
 0x3ba   : > { %v1270_v39 = vmul.f32 1.442695, %v1259_v35  ;;  %v1258_v40 = vsub.f32 %v1203_v8, %v1240_v38  ;;  %v5250_v35 = vld [vmem:[%s8894_s3 + $0x58] sm:$0xff] }
 0x3bb   : > { %v1249_v41 = vpop.xlane.xlu1 %1248 }
 0x3bc   : > { %6705 = vpow2.f32 %v1270_v39  ;;  %v1268_v42 = vmul.f32 1.442695, %v1258_v40  ;;  %v1261_v43 = vsub.f32 %v6046_v10, %v1249_v41  ;;  %v5254_v10 = vld [vmem:[%s8894_s3 + $0x78] sm:$0xff]  ;;  %v5249_v40 = vld [vmem:[%s8894_s3 + $0x50] sm:$0xff] }
 0x3bd   : > { %v1246_v44 = vpop.xlane.xlu0 %1245  ;;  %6078 = vmatprep.subr.mxu0 %v5254_v10 }
 0x3be   : > { %6707 = vpow2.f32 %v1268_v42  ;;  %v1274_v45 = vmul.f32 1.442695, %v1261_v43  ;;  %v1260_v48 = vsub.f32 %v1213_v56, %v1246_v44  ;;  %v5248_v43 = vld [vmem:[%s8894_s3 + $0x48] sm:$0xff] }
 0x3bf   : > { %v1255_v49 = vpop.xlane.xlu1 %1254 }
 0x3c0   : > { %6709 = vpow2.f32 %v1274_v45  ;;  %v1272_v50 = vmul.f32 1.442695, %v1260_v48  ;;  %v1263_v51 = vsub.f32 %v6049_v14, %v1255_v49  ;;  %v5247_v45 = vld [vmem:[%s8894_s3 + $0x40] sm:$0xff]  ;;  %v5286_v48 = vld [vmem:[%s8896_s5 + $0x78] sm:$0xff]  ;;  %v5285_v49 = vld [vmem:[%s8896_s5 + $0x70] sm:$0xff] }
 0x3c1   : > { %v1252_v52 = vpop.xlane.xlu0 %1251 }
 0x3c2   : > { %6711 = vpow2.f32 %v1272_v50  ;;  %v1278_v53 = vmul.f32 1.442695, %v1263_v51  ;;  %v1262_v55 = vsub.f32 %v1223_v16, %v1252_v52  ;;  %v5284_v50 = vld [vmem:[%s8896_s5 + $0x68] sm:$0xff]  ;;  %v5283_v51 = vld [vmem:[%s8896_s5 + $0x60] sm:$0xff]  ;;  %v5282_v52 = vld [vmem:[%s8896_s5 + $0x58] sm:$0xff] }
 0x3c4   : > { %v6702_v58 = vpop.eup %6701  ;;  %6713 = vpow2.f32 %v1278_v53  ;;  %v1276_v59 = vmul.f32 1.442695, %v1262_v55  ;;  %v5281_v53 = vld [vmem:[%s8896_s5 + $0x50] sm:$0xff]  ;;  %v5280_v55 = vld [vmem:[%s8896_s5 + $0x48] sm:$0xff] }
 0x3c5   : > { %v1283_v28 = vsel %vm573_vm0, %v6702_v58, 0.0 }
 0x3c6   : > { %v6704_v60 = vpop.eup %6703  ;;  %6715 = vpow2.f32 %v1276_v59  ;;  %1284 = vadd.xlane.f32.xlu1 %v1283_v28  ;;  %v1450_v59 = vld [vmem:[%s8897_s6 + $0x8] sm:$0xff] }
 0x3c7   : > { %v1280_v61 = vsel %vm573_vm0, %v6704_v60, 0.0  ;;  %6234 = vmatprep.subr.mxu1 %v1450_v59 }
 0x3c8   : > { %1281 = vadd.xlane.f32.xlu0 %v1280_v61 }
 0x3c9   : > { %v6706_v63 = vpop.eup %6705 }
 0x3ca   : > { %v1289_v36 = vsel %vm573_vm0, %v6706_v63, 0.0 }
 0x3cb   : > { %v6708_v1 = vpop.eup %6707  ;;  %1290 = vadd.xlane.f32.xlu1 %v1289_v36 }
 0x3cc   : > { %v1286_v29 = vsel %vm573_vm0, %v6708_v1, 0.0 }
 0x3cd   : > { %v6710_v2 = vpop.eup %6709  ;;  %1287 = vadd.xlane.f32.xlu0 %v1286_v29 }
 0x3ce   : > { %v1295_v3 = vsel %vm573_vm0, %v6710_v2, 0.0 }
 0x3cf   : > { %v6712_v37 = vpop.eup %6711  ;;  %1296 = vadd.xlane.f32.xlu1 %v1295_v3 }
 0x3d0   : > { %v1292_v4 = vsel %vm573_vm0, %v6712_v37, 0.0 }
 0x3d1   : > { %v6714_v5 = vpop.eup %6713  ;;  %1293 = vadd.xlane.f32.xlu0 %v1292_v4 }
 0x3d2   : > { %v1301_v7 = vsel %vm573_vm0, %v6714_v5, 0.0 }
 0x3d3   : > { %v6716_v8 = vpop.eup %6715  ;;  %1302 = vadd.xlane.f32.xlu1 %v1301_v7 }
 0x3d4   : > { %v1298_v9 = vsel %vm573_vm0, %v6716_v8, 0.0 }
 0x3d5   : > { %1299 = vadd.xlane.f32.xlu0 %v1298_v9 }
 0x44f   : > { %v1285_v47 = vpop.xlane.xlu1 %1284 }
 0x450   : > { %6717 = vrcp.f32 %v1285_v47  ;;  %v5360_v47 = vld [vmem:[%s8895_s4 + $0xb8] sm:$0xff] }
 0x451   : > { %v1282_v56 = vpop.xlane.xlu0 %1281 }
 0x452   : > { %6719 = vrcp.f32 %v1282_v56 }
 0x454   : > { %v1291_v13 = vpop.xlane.xlu1 %1290 }
 0x455   : > { %6721 = vrcp.f32 %v1291_v13 }
 0x456   : > { %v1288_v14 = vpop.xlane.xlu0 %1287 }
 0x457   : > { %6723 = vrcp.f32 %v1288_v14 }
 0x458   : > { %v1297_v57 = vpop.xlane.xlu1 %1296 }
 0x459   : > { %6725 = vrcp.f32 %v1297_v57 }
 0x45a   : > { %v1294_v16 = vpop.xlane.xlu0 %1293 }
 0x45b   : > { %6727 = vrcp.f32 %v1294_v16 }
 0x45c   : > { %v1303_v17 = vpop.xlane.xlu1 %1302 }
 0x45d   : > { %v6718_v18 = vpop.eup %6717  ;;  %6729 = vrcp.f32 %v1303_v17 }
 0x45e   : > { %v1300_v19 = vpop.xlane.xlu0 %1299  ;;  %v1307_v22 = vmul.f32 %v6718_v18, %v6702_v58  ;;  %v5279_v58 = vld [vmem:[%s8896_s5 + $0x40] sm:$0xff] }
 0x45f   : > { %v6720_v20 = vpop.eup %6719  ;;  %6731 = vrcp.f32 %v1300_v19 }
 0x460   : > { %v1305_v21 = vmul.f32 %v6720_v20, %v6704_v60 }
 0x462   : > { %6066 = vmatprep.mubr.msk.f32.mxu0 %vm573_vm0, %v1305_v21  ;;  %v6722_v24 = vpop.eup %6721 }
 0x463   : > { %6067 = vmatmul.mubr.msk.f32.vlgmr.msra.gmra.mxu0 %vm573_vm0, %v1307_v22  ;;  %v1311_v30 = vmul.f32 %v6722_v24, %v6706_v63  ;;  %v5359_v24 = vld [vmem:[%s8895_s4 + $0xb0] sm:$0xff] }
 0x464   : > { %v6724_v25 = vpop.eup %6723  ;;  %6079 = vmatpush3.msra.mxu0 %v5254_v10 }
 0x465   : > { %6080 = vmatprep.subr.mxu0 %v5253_v23  ;;  %v1309_v27 = vmul.f32 %v6724_v25, %v6708_v1 }
 0x466   : > { %6081 = vmatpush3.msra.mxu0 %v5253_v23  ;;  %v6726_v31 = vpop.eup %6725 }
 0x467   : > { %6069 = vmatprep.mubr.msk.f32.mxu0 %vm573_vm0, %v1309_v27  ;;  %6082 = vmatprep.subr.mxu0 %v5252_v26  ;;  %v1315_v38 = vmul.f32 %v6726_v31, %v6710_v2 }
 0x468   : > { %v6728_v33 = vpop.eup %6727  ;;  %6070 = vmatmul.mubr.msk.f32.gmra.mxu0 %vm573_vm0, %v1311_v30  ;;  %v5357_v30 = vld [vmem:[%s8895_s4 + $0xa0] sm:$0xff] }
 0x469   : > { %6083 = vmatpush3.msra.mxu0 %v5252_v26  ;;  %v1313_v34 = vmul.f32 %v6728_v33, %v6712_v37  ;;  %v5358_v26 = vld [vmem:[%s8895_s4 + $0xa8] sm:$0xff]  ;;  %v5356_v33 = vld [vmem:[%s8895_s4 + $0x98] sm:$0xff] }
 0x46a   : > { %6084 = vmatprep.subr.mxu0 %v5251_v32  ;;  %v6730_v39 = vpop.eup %6729 }
 0x46b   : > { %6085 = vmatpush3.msra.mxu0 %v5251_v32  ;;  %6072 = vmatprep.mubr.msk.f32.mxu0 %vm573_vm0, %v1313_v34  ;;  %v1319_v44 = vmul.f32 %v6730_v39, %v6714_v5  ;;  %v5353_v39 = vld [vmem:[%s8895_s4 + $0x80] sm:$0xff] }
 0x46c   : > { %v6732_v41 = vpop.eup %6731  ;;  %6086 = vmatprep.subr.mxu0 %v5250_v35  ;;  %6073 = vmatmul.mubr.msk.f32.gmra.mxu0 %vm573_vm0, %v1315_v38  ;;  %v5354_v38 = vld [vmem:[%s8895_s4 + $0x88] sm:$0xff] }
 0x46d   : > { %6087 = vmatpush3.msra.mxu0 %v5250_v35  ;;  %v1317_v42 = vmul.f32 %v6732_v41, %v6716_v8  ;;  %v1449_v8 = vld [vmem:[%s8897_s6] sm:$0xff]  ;;  %v5355_v35 = vld [vmem:[%s8895_s4 + $0x90] sm:$0xff] }
 0x46e   : > { %6088 = vmatprep.subr.mxu0 %v5249_v40 }
 0x46f   : > { %6089 = vmatpush3.msra.mxu0 %v5249_v40  ;;  %6075 = vmatprep.mubr.msk.f32.mxu0 %vm573_vm0, %v1317_v42 }
 0x470   : > { %6090 = vmatprep.subr.mxu0 %v5248_v43  ;;  %6076 = vmatmul.mubr.msk.f32.gmra.mxu0 %vm573_vm0, %v1319_v44 }
 0x471   : > { %6091 = vmatpush3.msra.mxu0 %v5248_v43  ;;  %6094 = vmatprep.mubr.msk.f32.mxu0 %vm573_vm0, %v7334_v54 }
 0x472   : > { %6092 = vmatprep.subr.mxu0 %v5247_v45 }
 0x473   : > { %6093 = vmatpush3.msra.mxu0 %v5247_v45 }
 0x474   : > { %6095 = vmatmul.mubr.msk.f32.vlgmr.msra.gmra.mxu0 %vm573_vm0, %v7342_v62  ;;  %6134 = vmatprep.subr.mxu0 %v5286_v48 }
 0x475   : > { %6097 = vmatprep.mubr.msk.f32.mxu0 %vm573_vm0, %v7345_v0  ;;  %6135 = vmatpush3.msra.mxu0 %v5286_v48 }
 0x476   : > { %6136 = vmatprep.subr.mxu0 %v5285_v49 }
 0x477   : > { %6137 = vmatpush3.msra.mxu0 %v5285_v49 }
 0x478   : > { %6098 = vmatmul.mubr.msk.f32.gmra.mxu0 %vm573_vm0, %v7359_v46  ;;  %6138 = vmatprep.subr.mxu0 %v5284_v50 }
 0x479   : > { %6100 = vmatprep.mubr.msk.f32.mxu0 %vm573_vm0, %v7366_v6  ;;  %6139 = vmatpush3.msra.mxu0 %v5284_v50 }
 0x47a   : > { %6140 = vmatprep.subr.mxu0 %v5283_v51 }
 0x47b   : > { %6141 = vmatpush3.msra.mxu0 %v5283_v51 }
 0x47c   : > { %6101 = vmatmul.mubr.msk.f32.gmra.mxu0 %vm573_vm0, %v7376_v11  ;;  %6142 = vmatprep.subr.mxu0 %v5282_v52 }
 0x47d   : > { %6103 = vmatprep.mubr.msk.f32.mxu0 %vm573_vm0, %v7383_v12  ;;  %6143 = vmatpush3.msra.mxu0 %v5282_v52 }
 0x47e   : > { %6144 = vmatprep.subr.mxu0 %v5281_v53 }
 0x47f   : > { %6145 = vmatpush3.msra.mxu0 %v5281_v53 }
 0x480   : > { %6104 = vmatmul.mubr.msk.f32.gmra.mxu0 %vm573_vm0, %v7395_v15  ;;  %6146 = vmatprep.subr.mxu0 %v5280_v55 }
 0x481   : > { %6147 = vmatpush3.msra.mxu0 %v5280_v55  ;;  %6150 = vmatprep.mubr.msk.f32.mxu0 %vm573_vm0, %v7334_v54 }
 0x482   : > { %6148 = vmatprep.subr.mxu0 %v5279_v58 }
 0x483   : > { %6149 = vmatpush3.msra.mxu0 %v5279_v58 }
 0x484   : > { %6151 = vmatmul.mubr.msk.f32.vlgmr.msra.gmra.mxu0 %vm573_vm0, %v7342_v62 }
 0x485   : > { %6153 = vmatprep.mubr.msk.f32.mxu0 %vm573_vm0, %v7345_v0 }
 0x488   : > { %6154 = vmatmul.mubr.msk.f32.gmra.mxu0 %vm573_vm0, %v7359_v46 }
 0x489   : > { %6156 = vmatprep.mubr.msk.f32.mxu0 %vm573_vm0, %v7366_v6 }
 0x48c   : > { %6157 = vmatmul.mubr.msk.f32.gmra.mxu0 %vm573_vm0, %v7376_v11 }
 0x48d   : > { %6159 = vmatprep.mubr.msk.f32.mxu0 %vm573_vm0, %v7383_v12 }
 0x490   : > { %6160 = vmatmul.mubr.msk.f32.gmra.mxu0 %vm573_vm0, %v7395_v15 }
 0x523   : > { %v6068_v28 = vpop.f32.mrf.mxu0 }
 0x525   : > { %v1410_v60 = vpop.f32.mrf.mxu0 }
 0x528   : > { %v6071_v61 = vpop.f32.mrf.mxu0 }
 0x52a   : > { %v1420_v63 = vpop.f32.mrf.mxu0 }
 0x52c   : > { %v6074_v36 = vpop.f32.mrf.mxu0 }
 0x52e   : > { %v1430_v1 = vpop.f32.mrf.mxu0 }
 0x530   : > { %v7620_v29 = vpop.f32.mrf.mxu0 }
 0x532   : > { %v1440_v2 = vpop.f32.mrf.mxu0 }
 0x534   : > { %v6096_v3 = vpop.f32.mrf.mxu0 }
 0x535   : > { %v1566_v5 = vmul.f32 0.25, %v6096_v3 }
 0x536   : > { %v1526_v37 = vpop.f32.mrf.mxu0 }
 0x537   : > { %v1565_v4 = vmul.f32 0.25, %v1526_v37 }
 0x538   : > { %v6099_v7 = vpop.f32.mrf.mxu0 }
 0x539   : > { %6178 = vmatprep.mubr.msk.f32.mxu1 %vm1078_vm1, %v1565_v4  ;;  %v1568_v56 = vmul.f32 0.25, %v6099_v7 }
 0x53a   : > { %v1536_v9 = vpop.f32.mrf.mxu0  ;;  %6179 = vmatmul.mubr.msk.f32.vlgmr.msra.gmra.mxu1 %vm1078_vm1, %v1566_v5 }
 0x53b   : > { %v1567_v10 = vmul.f32 0.25, %v1536_v9  ;;  %6235 = vmatpush3.msra.mxu1 %v1450_v59 }
 0x53c   : > { %v6102_v13 = vpop.f32.mrf.mxu0  ;;  %6236 = vmatprep.subr.mxu1 %v1449_v8 }
 0x53d   : > { %6181 = vmatprep.mubr.msk.f32.mxu1 %vm1078_vm1, %v1567_v10  ;;  %6237 = vmatpush3.msra.mxu1 %v1449_v8  ;;  %v1570_v16 = vmul.f32 0.25, %v6102_v13 }
 0x53e   : > { %v1546_v14 = vpop.f32.mrf.mxu0  ;;  %6182 = vmatmul.mubr.msk.f32.gmra.mxu1 %vm1078_vm1, %v1568_v56  ;;  %6278 = vmatprep.subr.mxu1 %v5360_v47 }
 0x53f   : > { %v1569_v57 = vmul.f32 0.25, %v1546_v14 }
 0x540   : > { %v6105_v17 = vpop.f32.mrf.mxu0 }
 0x541   : > { %6184 = vmatprep.mubr.msk.f32.mxu1 %vm1078_vm1, %v1569_v57  ;;  %v1572_v20 = vmul.f32 0.25, %v6105_v17 }
 0x542   : > { %v1556_v18 = vpop.f32.mrf.mxu0  ;;  %6185 = vmatmul.mubr.msk.f32.gmra.mxu1 %vm1078_vm1, %v1570_v16 }
 0x543   : > { %v1571_v19 = vmul.f32 0.25, %v1556_v18 }
 0x544   : > { %v6152_v21 = vpop.f32.mrf.mxu0 }
 0x545   : > { %6187 = vmatprep.mubr.msk.f32.mxu1 %vm1078_vm1, %v1571_v19 }
 0x546   : > { %v1762_v22 = vpop.f32.mrf.mxu0  ;;  %6188 = vmatmul.mubr.msk.f32.gmra.mxu1 %vm1078_vm1, %v1572_v20 }
 0x547   : > { %6238 = vmatprep.mubr.msk.f32.mxu1 %vm1078_vm1, %v1410_v60 }
 0x548   : > { %v6155_v23 = vpop.f32.mrf.mxu0 }
 0x54a   : > { %v1772_v25 = vpop.f32.mrf.mxu0  ;;  %6239 = vmatmul.mubr.msk.f32.vlgmr.msra.gmra.mxu1 %vm1078_vm1, %v6068_v28 }
 0x54b   : > { %6241 = vmatprep.mubr.msk.f32.mxu1 %vm1078_vm1, %v1420_v63  ;;  %6279 = vmatpush3.msra.mxu1 %v5360_v47 }
 0x54c   : > { %v6158_v27 = vpop.f32.mrf.mxu0  ;;  %6280 = vmatprep.subr.mxu1 %v5359_v24 }
 0x54d   : > { %6281 = vmatpush3.msra.mxu1 %v5359_v24 }
 0x54e   : > { %v1782_v31 = vpop.f32.mrf.mxu0  ;;  %6242 = vmatmul.mubr.msk.f32.gmra.mxu1 %vm1078_vm1, %v6071_v61  ;;  %6282 = vmatprep.subr.mxu1 %v5358_v26 }
 0x54f   : > { %6244 = vmatprep.mubr.msk.f32.mxu1 %vm1078_vm1, %v1430_v1  ;;  %6283 = vmatpush3.msra.mxu1 %v5358_v26 }
 0x550   : > { %v6161_v32 = vpop.f32.mrf.mxu0  ;;  %6284 = vmatprep.subr.mxu1 %v5357_v30 }
 0x551   : > { %6190 = vmatprep.subr.mxu0 %v6161_v32  ;;  %6285 = vmatpush3.msra.mxu1 %v5357_v30 }
 0x552   : > { %v1792_v34 = vpop.f32.mrf.mxu0  ;;  %6191 = vmatpush3.msra.mxu0 %v6161_v32  ;;  %6245 = vmatmul.mubr.msk.f32.gmra.mxu1 %vm1078_vm1, %v6074_v36 }
 0x553   : > { %6286 = vmatprep.subr.mxu1 %v5356_v33  ;;  %6192 = vmatprep.subr.mxu0 %v1792_v34 }
 0x554   : > { %6247 = vmatprep.mubr.msk.f32.mxu1 %vm1078_vm1, %v1440_v2  ;;  %6287 = vmatpush3.msra.mxu1 %v5356_v33 }
 0x555   : > { %6193 = vmatpush3.msra.mxu0 %v1792_v34  ;;  %6288 = vmatprep.subr.mxu1 %v5355_v35 }
 0x556   : > { %6194 = vmatprep.subr.mxu0 %v6158_v27  ;;  %6289 = vmatpush3.msra.mxu1 %v5355_v35 }
 0x557   : > { %6195 = vmatpush3.msra.mxu0 %v6158_v27  ;;  %6248 = vmatmul.mubr.msk.f32.gmra.mxu1 %vm1078_vm1, %v7620_v29 }
 0x558   : > { %6290 = vmatprep.subr.mxu1 %v5354_v38  ;;  %6196 = vmatprep.subr.mxu0 %v1782_v31 }
 0x559   : > { %6291 = vmatpush3.msra.mxu1 %v5354_v38  ;;  %6294 = vmatprep.mubr.msk.f32.mxu1 %vm573_vm0, %v7334_v54 }
 0x55a   : > { %6197 = vmatpush3.msra.mxu0 %v1782_v31  ;;  %6292 = vmatprep.subr.mxu1 %v5353_v39 }
 0x55b   : > { %6198 = vmatprep.subr.mxu0 %v6155_v23  ;;  %6293 = vmatpush3.msra.mxu1 %v5353_v39 }
 0x55c   : > { %6199 = vmatpush3.msra.mxu0 %v6155_v23  ;;  %6295 = vmatmul.mubr.msk.f32.vlgmr.msra.gmra.mxu1 %vm573_vm0, %v7342_v62 }
 0x55d   : > { %6200 = vmatprep.subr.mxu0 %v1772_v25  ;;  %6297 = vmatprep.mubr.msk.f32.mxu1 %vm573_vm0, %v7345_v0 }
 0x55e   : > { %6201 = vmatpush3.msra.mxu0 %v1772_v25 }
 0x55f   : > { %6202 = vmatprep.subr.mxu0 %v6152_v21 }
 0x560   : > { %6203 = vmatpush3.msra.mxu0 %v6152_v21  ;;  %6298 = vmatmul.mubr.msk.f32.gmra.mxu1 %vm573_vm0, %v7359_v46 }
 0x561   : > { %6204 = vmatprep.subr.mxu0 %v1762_v22  ;;  %6300 = vmatprep.mubr.msk.f32.mxu1 %vm573_vm0, %v7366_v6 }
 0x562   : > { %6205 = vmatpush3.msra.mxu0 %v1762_v22 }
 0x564   : > { %6301 = vmatmul.mubr.msk.f32.gmra.mxu1 %vm573_vm0, %v7376_v11 }
 0x565   : > { %6303 = vmatprep.mubr.msk.f32.mxu1 %vm573_vm0, %v7383_v12 }
 0x568   : > { %6304 = vmatmul.mubr.msk.f32.gmra.mxu1 %vm573_vm0, %v7395_v15 }
 0x5fa   : > { %v6180_v40 = vpop.f32.mrf.mxu1 }
 0x5fb   : > { %v1957_v41 = vsel %vm573_vm0, %v6180_v40, -inf }
 0x5fc   : > { %1958 = vmax.xlane.f32.xlu1 %v1957_v41  ;;  %v1915_v42 = vpop.f32.mrf.mxu1 }
 0x5fd   : > { %v1954_v43 = vsel %vm573_vm0, %v1915_v42, -inf }
 0x5fe   : > { %1955 = vmax.xlane.f32.xlu0 %v1954_v43  ;;  %v6183_v44 = vpop.f32.mrf.mxu1 }
 0x5ff   : > { %v1963_v45 = vsel %vm573_vm0, %v6183_v44, -inf }
 0x600   : > { %1964 = vmax.xlane.f32.xlu1 %v1963_v45  ;;  %v1925_v48 = vpop.f32.mrf.mxu1 }
 0x601   : > { %v1960_v49 = vsel %vm573_vm0, %v1925_v48, -inf }
 0x602   : > { %1961 = vmax.xlane.f32.xlu0 %v1960_v49  ;;  %v7686_v50 = vpop.f32.mrf.mxu1 }
 0x603   : > { %v1969_v51 = vsel %vm573_vm0, %v7686_v50, -inf }
 0x604   : > { %1970 = vmax.xlane.f32.xlu1 %v1969_v51  ;;  %v7690_v52 = vpop.f32.mrf.mxu1 }
 0x605   : > { %v1966_v53 = vsel %vm573_vm0, %v7690_v52, -inf }
 0x606   : > { %1967 = vmax.xlane.f32.xlu0 %v1966_v53  ;;  %v7694_v55 = vpop.f32.mrf.mxu1 }
 0x607   : > { %v1975_v58 = vsel %vm573_vm0, %v7694_v55, -inf }
 0x608   : > { %1976 = vmax.xlane.f32.xlu1 %v1975_v58  ;;  %v7698_v59 = vpop.f32.mrf.mxu1 }
 0x609   : > { %v1972_v28 = vsel %vm573_vm0, %v7698_v59, -inf }
 0x60a   : > { %v7702_v60 = vpop.f32.mrf.mxu1  ;;  %1973 = vmax.xlane.f32.xlu0 %v1972_v28 }
 0x60c   : > { %v7704_v61 = vpop.f32.mrf.mxu1 }
 0x60e   : > { %v7706_v63 = vpop.f32.mrf.mxu1 }
 0x610   : > { %v7708_v36 = vpop.f32.mrf.mxu1 }
 0x612   : > { %v7710_v1 = vpop.f32.mrf.mxu1 }
 0x614   : > { %v7712_v29 = vpop.f32.mrf.mxu1 }
 0x617   : > { %v7714_v2 = vpop.f32.mrf.mxu1 }
 0x619   : > { %v7716_v3 = vpop.f32.mrf.mxu1 }
 0x61c   : > { %v6296_v37 = vpop.f32.mrf.mxu1 }
 0x61e   : > { %v2629_v4 = vpop.f32.mrf.mxu1 }
 0x620   : > { %v6299_v5 = vpop.f32.mrf.mxu1 }
 0x622   : > { %v2639_v7 = vpop.f32.mrf.mxu1 }
 0x624   : > { %v6302_v8 = vpop.f32.mrf.mxu1 }
 0x626   : > { %v2649_v9 = vpop.f32.mrf.mxu1 }
 0x628   : > { %v6305_v10 = vpop.f32.mrf.mxu1 }
 0x629   : > { %6334 = vmatprep.subr.msk.mxu1 %vm1078_vm1, %v6305_v10 }
 0x62a   : > { %v2659_v47 = vpop.f32.mrf.mxu1  ;;  %6335 = vmatpush3.xpose.msk.msra.mxu1 %vm1078_vm1, %v6305_v10 }
 0x62b   : > { %6336 = vmatprep.subr.msk.mxu1 %vm1078_vm1, %v2659_v47 }
 0x62e   : > { %6337 = vmatpush3.xpose.msk.msra.mxu1 %vm1078_vm1, %v2659_v47 }
 0x62f   : > { %6338 = vmatprep.subr.msk.mxu1 %vm1078_vm1, %v6302_v8 }
 0x632   : > { %6339 = vmatpush3.xpose.msk.msra.mxu1 %vm1078_vm1, %v6302_v8 }
 0x633   : > { %6340 = vmatprep.subr.msk.mxu1 %vm1078_vm1, %v2649_v9 }
 0x636   : > { %6341 = vmatpush3.xpose.msk.msra.mxu1 %vm1078_vm1, %v2649_v9 }
 0x637   : > { %6342 = vmatprep.subr.msk.mxu1 %vm1078_vm1, %v6299_v5 }
 0x63a   : > { %6343 = vmatpush3.xpose.msk.msra.mxu1 %vm1078_vm1, %v6299_v5 }
 0x63b   : > { %6344 = vmatprep.subr.msk.mxu1 %vm1078_vm1, %v2639_v7 }
 0x63e   : > { %6345 = vmatpush3.xpose.msk.msra.mxu1 %vm1078_vm1, %v2639_v7 }
 0x63f   : > { %6346 = vmatprep.subr.msk.mxu1 %vm1078_vm1, %v6296_v37 }
 0x642   : > { %6347 = vmatpush3.xpose.msk.msra.mxu1 %vm1078_vm1, %v6296_v37  ;;  %v5320_v37 = vld [vmem:[%s8897_s6 + $0x18] sm:$0xff] }
 0x643   : > { %6348 = vmatprep.subr.msk.mxu1 %vm1078_vm1, %v2629_v4  ;;  %6218 = vmatprep.subr.mxu0 %v5320_v37 }
 0x646   : > { %6349 = vmatpush3.xpose.msk.msra.mxu1 %vm1078_vm1, %v2629_v4 }
 0x685   : > { %v1959_v56 = vpop.xlane.xlu1 %1958 }
 0x686   : > { %v1979_v13 = vsub.f32 %v6180_v40, %v1959_v56 }
 0x687   : > { %v1956_v14 = vpop.xlane.xlu0 %1955 }
 0x688   : > { %v1988_v57 = vmul.f32 1.442695, %v1979_v13  ;;  %v1978_v16 = vsub.f32 %v1915_v42, %v1956_v14 }
 0x689   : > { %v1965_v17 = vpop.xlane.xlu1 %1964 }
 0x68a   : > { %6733 = vpow2.f32 %v1988_v57  ;;  %v1986_v18 = vmul.f32 1.442695, %v1978_v16  ;;  %v1981_v19 = vsub.f32 %v6183_v44, %v1965_v17 }
 0x68b   : > { %v1962_v20 = vpop.xlane.xlu0 %1961 }
 0x68c   : > { %6735 = vpow2.f32 %v1986_v18  ;;  %v1992_v21 = vmul.f32 1.442695, %v1981_v19  ;;  %v1980_v22 = vsub.f32 %v1925_v48, %v1962_v20  ;;  %v5319_v18 = vld [vmem:[%s8897_s6 + $0x10] sm:$0xff] }
 0x68d   : > { %v1971_v23 = vpop.xlane.xlu1 %1970 }
 0x68e   : > { %6737 = vpow2.f32 %v1992_v21  ;;  %v1990_v24 = vmul.f32 1.442695, %v1980_v22  ;;  %v1983_v25 = vsub.f32 %v7686_v50, %v1971_v23 }
 0x68f   : > { %v1968_v26 = vpop.xlane.xlu0 %1967 }
 0x690   : > { %6739 = vpow2.f32 %v1990_v24  ;;  %v1996_v27 = vmul.f32 1.442695, %v1983_v25  ;;  %v1982_v30 = vsub.f32 %v7690_v52, %v1968_v26 }
 0x691   : > { %v1977_v31 = vpop.xlane.xlu1 %1976 }
 0x692   : > { %6741 = vpow2.f32 %v1996_v27  ;;  %v1994_v32 = vmul.f32 1.442695, %v1982_v30  ;;  %v1985_v33 = vsub.f32 %v7694_v55, %v1977_v31 }
 0x693   : > { %v1974_v34 = vpop.xlane.xlu0 %1973 }
 0x694   : > { %6743 = vpow2.f32 %v1994_v32  ;;  %v2000_v35 = vmul.f32 1.442695, %v1985_v33  ;;  %v1984_v38 = vsub.f32 %v7698_v59, %v1974_v34  ;;  %v5344_v32 = vld [vmem:[%s8894_s3 + $0xb8] sm:$0xff] }
 0x696   : > { %6745 = vpow2.f32 %v2000_v35  ;;  %v1998_v39 = vmul.f32 1.442695, %v1984_v38  ;;  %v5343_v35 = vld [vmem:[%s8894_s3 + $0xb0] sm:$0xff] }
 0x697   : > { %v6734_v40 = vpop.eup %6733 }
 0x698   : > { %6747 = vpow2.f32 %v1998_v39  ;;  %v2005_v41 = vsel %vm573_vm0, %v6734_v40, 0.0  ;;  %v5342_v39 = vld [vmem:[%s8894_s3 + $0xa8] sm:$0xff] }
 0x699   : > { %v6736_v42 = vpop.eup %6735  ;;  %2006 = vadd.xlane.f32.xlu1 %v2005_v41  ;;  %v5341_v41 = vld [vmem:[%s8894_s3 + $0xa0] sm:$0xff] }
 0x69a   : > { %v2002_v43 = vsel %vm573_vm0, %v6736_v42, 0.0 }
 0x69b   : > { %v6738_v44 = vpop.eup %6737  ;;  %2003 = vadd.xlane.f32.xlu0 %v2002_v43  ;;  %v5340_v43 = vld [vmem:[%s8894_s3 + $0x98] sm:$0xff] }
 0x69c   : > { %v2011_v45 = vsel %vm573_vm0, %v6738_v44, 0.0 }
 0x69d   : > { %v6740_v48 = vpop.eup %6739  ;;  %2012 = vadd.xlane.f32.xlu1 %v2011_v45  ;;  %v5339_v45 = vld [vmem:[%s8894_s3 + $0x90] sm:$0xff] }
 0x69e   : > { %v2008_v49 = vsel %vm573_vm0, %v6740_v48, 0.0 }
 0x69f   : > { %v6742_v50 = vpop.eup %6741  ;;  %2009 = vadd.xlane.f32.xlu0 %v2008_v49  ;;  %v5338_v49 = vld [vmem:[%s8894_s3 + $0x88] sm:$0xff] }
 0x6a0   : > { %v2017_v51 = vsel %vm573_vm0, %v6742_v50, 0.0 }
 0x6a1   : > { %v6744_v52 = vpop.eup %6743  ;;  %2018 = vadd.xlane.f32.xlu1 %v2017_v51  ;;  %v5337_v51 = vld [vmem:[%s8894_s3 + $0x80] sm:$0xff] }
 0x6a2   : > { %v2014_v53 = vsel %vm573_vm0, %v6744_v52, 0.0 }
 0x6a3   : > { %v6746_v55 = vpop.eup %6745  ;;  %2015 = vadd.xlane.f32.xlu0 %v2014_v53  ;;  %v5375_v53 = vld [vmem:[%s8896_s5 + $0xb0] sm:$0xff] }
 0x6a4   : > { %v2023_v58 = vsel %vm573_vm0, %v6746_v55, 0.0 }
 0x6a5   : > { %v6748_v59 = vpop.eup %6747  ;;  %2024 = vadd.xlane.f32.xlu1 %v2023_v58  ;;  %v5373_v58 = vld [vmem:[%s8896_s5 + $0xa0] sm:$0xff] }
 0x6a6   : > { %v2020_v28 = vsel %vm573_vm0, %v6748_v59, 0.0 }
 0x6a7   : > { %2021 = vadd.xlane.f32.xlu0 %v2020_v28  ;;  %v5371_v28 = vld [vmem:[%s8896_s5 + $0x90] sm:$0xff] }
 0x722   : > { %v2007_v4 = vpop.xlane.xlu1 %2006 }
 0x723   : > { %6749 = vrcp.f32 %v2007_v4  ;;  %v5369_v4 = vld [vmem:[%s8896_s5 + $0x80] sm:$0xff] }
 0x724   : > { %v2004_v5 = vpop.xlane.xlu0 %2003 }
 0x725   : > { %6751 = vrcp.f32 %v2004_v5  ;;  %v5426_v5 = vld [vmem:[%s8894_s3 + $0xf8] sm:$0xff] }
 0x726   : > { %v2013_v7 = vpop.xlane.xlu1 %2012  ;;  %6406 = vmatprep.subr.mxu1 %v5426_v5 }
 0x727   : > { %6753 = vrcp.f32 %v2013_v7 }
 0x728   : > { %v2010_v8 = vpop.xlane.xlu0 %2009 }
 0x729   : > { %6755 = vrcp.f32 %v2010_v8 }
 0x72a   : > { %v2019_v9 = vpop.xlane.xlu1 %2018 }
 0x72b   : > { %6757 = vrcp.f32 %v2019_v9 }
 0x72c   : > { %v2016_v10 = vpop.xlane.xlu0 %2015 }
 0x72d   : > { %6759 = vrcp.f32 %v2016_v10 }
 0x72e   : > { %v2025_v47 = vpop.xlane.xlu1 %2024 }
 0x72f   : > { %6761 = vrcp.f32 %v2025_v47 }
 0x730   : > { %v2022_v56 = vpop.xlane.xlu0 %2021  ;;  %v6750_v13 = vpop.eup %6749 }
 0x731   : > { %6763 = vrcp.f32 %v2022_v56  ;;  %v2029_v16 = vmul.f32 %v6750_v13, %v6734_v40 }
 0x732   : > { %v6752_v14 = vpop.eup %6751 }
 0x733   : > { %v2027_v57 = vmul.f32 %v6752_v14, %v6736_v42 }
 0x734   : > { %v6754_v17 = vpop.eup %6753 }
 0x735   : > { %6206 = vmatprep.mubr.msk.f32.mxu0 %vm573_vm0, %v2027_v57  ;;  %v2033_v21 = vmul.f32 %v6754_v17, %v6738_v44 }
 0x736   : > { %v6756_v19 = vpop.eup %6755  ;;  %6207 = vmatmul.mubr.msk.f32.vlgmr.msra.gmra.mxu0 %vm573_vm0, %v2029_v16 }
 0x737   : > { %v2031_v20 = vmul.f32 %v6756_v19, %v6740_v48  ;;  %6219 = vmatpush3.msra.mxu0 %v5320_v37  ;;  %v5370_v37 = vld [vmem:[%s8896_s5 + $0x88] sm:$0xff] }
 0x738   : > { %6220 = vmatprep.subr.mxu0 %v5319_v18  ;;  %v6758_v22 = vpop.eup %6757 }
 0x739   : > { %6209 = vmatprep.mubr.msk.f32.mxu0 %vm573_vm0, %v2031_v20  ;;  %6221 = vmatpush3.msra.mxu0 %v5319_v18  ;;  %v2037_v25 = vmul.f32 %v6758_v22, %v6742_v50  ;;  %v5425_v20 = vld [vmem:[%s8894_s3 + $0xf0] sm:$0xff] }
 0x73a   : > { %v6760_v23 = vpop.eup %6759  ;;  %6210 = vmatmul.mubr.msk.f32.gmra.mxu0 %vm573_vm0, %v2033_v21  ;;  %6250 = vmatprep.subr.mxu0 %v5344_v32 }
 0x73b   : > { %v2035_v24 = vmul.f32 %v6760_v23, %v6744_v52  ;;  %v5376_v52 = vld [vmem:[%s8896_s5 + $0xb8] sm:$0xff]  ;;  %v5424_v23 = vld [vmem:[%s8894_s3 + $0xe8] sm:$0xff] }
 0x73c   : > { %v6762_v26 = vpop.eup %6761 }
 0x73d   : > { %6212 = vmatprep.mubr.msk.f32.mxu0 %vm573_vm0, %v2035_v24  ;;  %v2041_v31 = vmul.f32 %v6762_v26, %v6746_v55  ;;  %v5374_v55 = vld [vmem:[%s8896_s5 + $0xa8] sm:$0xff]  ;;  %v5423_v26 = vld [vmem:[%s8894_s3 + $0xe0] sm:$0xff] }
 0x73e   : > { %v6764_v27 = vpop.eup %6763  ;;  %6213 = vmatmul.mubr.msk.f32.gmra.mxu0 %vm573_vm0, %v2037_v25 }
 0x73f   : > { %v2039_v30 = vmul.f32 %v6764_v27, %v6748_v59  ;;  %v5372_v59 = vld [vmem:[%s8896_s5 + $0x98] sm:$0xff] }
 0x741   : > { %6215 = vmatprep.mubr.msk.f32.mxu0 %vm573_vm0, %v2039_v30 }
 0x742   : > { %6216 = vmatmul.mubr.msk.f32.gmra.mxu0 %vm573_vm0, %v2041_v31  ;;  %v5422_v31 = vld [vmem:[%s8894_s3 + $0xd8] sm:$0xff] }
 0x7f6   : > { %v6208_v33 = vpop.f32.mrf.mxu0 }
 0x7f8   : > { %v2132_v34 = vpop.f32.mrf.mxu0 }
 0x7f9   : > { %6222 = vmatprep.mubr.msk.f32.mxu0 %vm1078_vm1, %v2132_v34  ;;  %v5421_v34 = vld [vmem:[%s8894_s3 + $0xd0] sm:$0xff] }
 0x7fa   : > { %v6211_v38 = vpop.f32.mrf.mxu0  ;;  %6223 = vmatmul.mubr.msk.f32.vlgmr.msra.gmra.mxu0 %vm1078_vm1, %v6208_v33 }
 0x7fb   : > { %6251 = vmatpush3.msra.mxu0 %v5344_v32 }
 0x7fc   : > { %6252 = vmatprep.subr.mxu0 %v5343_v35  ;;  %v2142_v40 = vpop.f32.mrf.mxu0 }
 0x7fd   : > { %6253 = vmatpush3.msra.mxu0 %v5343_v35  ;;  %6225 = vmatprep.mubr.msk.f32.mxu0 %vm1078_vm1, %v2142_v40 }
 0x7fe   : > { %6254 = vmatprep.subr.mxu0 %v5342_v39  ;;  %v6214_v42 = vpop.f32.mrf.mxu0  ;;  %6226 = vmatmul.mubr.msk.f32.gmra.mxu0 %vm1078_vm1, %v6211_v38 }
 0x7ff   : > { %6255 = vmatpush3.msra.mxu0 %v5342_v39  ;;  %v5420_v39 = vld [vmem:[%s8894_s3 + $0xc8] sm:$0xff] }
 0x800   : > { %6256 = vmatprep.subr.mxu0 %v5341_v41  ;;  %v2152_v44 = vpop.f32.mrf.mxu0 }
 0x801   : > { %6257 = vmatpush3.msra.mxu0 %v5341_v41  ;;  %6228 = vmatprep.mubr.msk.f32.mxu0 %vm1078_vm1, %v2152_v44  ;;  %v5458_v44 = vld [vmem:[%s8896_s5 + $0xf8] sm:$0xff] }
 0x802   : > { %6258 = vmatprep.subr.mxu0 %v5340_v43  ;;  %v6217_v48 = vpop.f32.mrf.mxu0  ;;  %6229 = vmatmul.mubr.msk.f32.gmra.mxu0 %vm1078_vm1, %v6214_v42  ;;  %v5419_v42 = vld [vmem:[%s8894_s3 + $0xc0] sm:$0xff] }
 0x803   : > { %6259 = vmatpush3.msra.mxu0 %v5340_v43 }
 0x804   : > { %6260 = vmatprep.subr.mxu0 %v5339_v45  ;;  %v2162_v50 = vpop.f32.mrf.mxu0 }
 0x805   : > { %6261 = vmatpush3.msra.mxu0 %v5339_v45  ;;  %6231 = vmatprep.mubr.msk.f32.mxu0 %vm1078_vm1, %v2162_v50  ;;  %v5456_v50 = vld [vmem:[%s8896_s5 + $0xe8] sm:$0xff] }
 0x806   : > { %6262 = vmatprep.subr.mxu0 %v5338_v49  ;;  %6232 = vmatmul.mubr.msk.f32.gmra.mxu0 %vm1078_vm1, %v6217_v48  ;;  %v5457_v48 = vld [vmem:[%s8896_s5 + $0xf0] sm:$0xff] }
 0x807   : > { %6263 = vmatpush3.msra.mxu0 %v5338_v49  ;;  %6266 = vmatprep.mubr.msk.f32.mxu0 %vm573_vm0, %v7334_v54 }
 0x808   : > { %6264 = vmatprep.subr.mxu0 %v5337_v51 }
 0x809   : > { %6265 = vmatpush3.msra.mxu0 %v5337_v51 }
 0x80a   : > { %6267 = vmatmul.mubr.msk.f32.vlgmr.msra.gmra.mxu0 %vm573_vm0, %v7342_v62  ;;  %6306 = vmatprep.subr.mxu0 %v5376_v52 }
 0x80b   : > { %6269 = vmatprep.mubr.msk.f32.mxu0 %vm573_vm0, %v7345_v0  ;;  %6307 = vmatpush3.msra.mxu0 %v5376_v52  ;;  %v5455_v52 = vld [vmem:[%s8896_s5 + $0xe0] sm:$0xff] }
 0x80c   : > { %6308 = vmatprep.subr.mxu0 %v5375_v53 }
 0x80d   : > { %6309 = vmatpush3.msra.mxu0 %v5375_v53 }
 0x80e   : > { %6270 = vmatmul.mubr.msk.f32.gmra.mxu0 %vm573_vm0, %v7359_v46  ;;  %6310 = vmatprep.subr.mxu0 %v5374_v55 }
 0x80f   : > { %6272 = vmatprep.mubr.msk.f32.mxu0 %vm573_vm0, %v7366_v6  ;;  %6311 = vmatpush3.msra.mxu0 %v5374_v55 }
 0x810   : > { %6312 = vmatprep.subr.mxu0 %v5373_v58 }
 0x811   : > { %6313 = vmatpush3.msra.mxu0 %v5373_v58  ;;  %v5454_v58 = vld [vmem:[%s8896_s5 + $0xd8] sm:$0xff] }
 0x812   : > { %6273 = vmatmul.mubr.msk.f32.gmra.mxu0 %vm573_vm0, %v7376_v11  ;;  %6314 = vmatprep.subr.mxu0 %v5372_v59 }
 0x813   : > { %6275 = vmatprep.mubr.msk.f32.mxu0 %vm573_vm0, %v7383_v12  ;;  %6315 = vmatpush3.msra.mxu0 %v5372_v59 }
 0x814   : > { %6316 = vmatprep.subr.mxu0 %v5371_v28 }
 0x815   : > { %6317 = vmatpush3.msra.mxu0 %v5371_v28  ;;  %v5453_v28 = vld [vmem:[%s8896_s5 + $0xd0] sm:$0xff] }
 0x816   : > { %6276 = vmatmul.mubr.msk.f32.gmra.mxu0 %vm573_vm0, %v7395_v15  ;;  %6318 = vmatprep.subr.mxu0 %v5370_v37 }
 0x817   : > { %6319 = vmatpush3.msra.mxu0 %v5370_v37  ;;  %6322 = vmatprep.mubr.msk.f32.mxu0 %vm573_vm0, %v7334_v54  ;;  %v5452_v37 = vld [vmem:[%s8896_s5 + $0xc8] sm:$0xff] }
 0x818   : > { %6320 = vmatprep.subr.mxu0 %v5369_v4 }
 0x819   : > { %6321 = vmatpush3.msra.mxu0 %v5369_v4  ;;  %v5451_v4 = vld [vmem:[%s8896_s5 + $0xc0] sm:$0xff] }
 0x81a   : > { %6323 = vmatmul.mubr.msk.f32.vlgmr.msra.gmra.mxu0 %vm573_vm0, %v7342_v62 }
 0x81b   : > { %6325 = vmatprep.mubr.msk.f32.mxu0 %vm573_vm0, %v7345_v0 }
 0x81e   : > { %6326 = vmatmul.mubr.msk.f32.gmra.mxu0 %vm573_vm0, %v7359_v46 }
 0x81f   : > { %6328 = vmatprep.mubr.msk.f32.mxu0 %vm573_vm0, %v7366_v6 }
 0x822   : > { %6329 = vmatmul.mubr.msk.f32.gmra.mxu0 %vm573_vm0, %v7376_v11 }
 0x823   : > { %6331 = vmatprep.mubr.msk.f32.mxu0 %vm573_vm0, %v7383_v12 }
 0x826   : > { %6332 = vmatmul.mubr.msk.f32.gmra.mxu0 %vm573_vm0, %v7395_v15 }
 0x8ba   : > { %v7851_v7 = vpop.f32.mrf.mxu0 }
 0x8bc   : > { %v7853_v8 = vpop.f32.mrf.mxu0 }
 0x8be   : > { %v7855_v9 = vpop.f32.mrf.mxu0 }
 0x8c0   : > { %v7857_v10 = vpop.f32.mrf.mxu0 }
 0x8c2   : > { %v7859_v47 = vpop.f32.mrf.mxu0 }
 0x8c4   : > { %v7861_v56 = vpop.f32.mrf.mxu0 }
 0x8c6   : > { %v7863_v13 = vpop.f32.mrf.mxu0 }
 0x8c8   : > { %v7865_v14 = vpop.f32.mrf.mxu0 }
 0x8ca   : > { %v6268_v57 = vpop.f32.mrf.mxu0 }
 0x8cb   : > { %v2547_v18 = vmul.f32 0.25, %v6268_v57 }
 0x8cc   : > { %v2507_v16 = vpop.f32.mrf.mxu0 }
 0x8cd   : > { %v2546_v17 = vmul.f32 0.25, %v2507_v16 }
 0x8ce   : > { %v6271_v19 = vpop.f32.mrf.mxu0 }
 0x8cf   : > { %6350 = vmatprep.mubr.msk.f32.mxu1 %vm1078_vm1, %v2546_v17  ;;  %v2549_v24 = vmul.f32 0.25, %v6271_v19 }
 0x8d0   : > { %v2517_v21 = vpop.f32.mrf.mxu0  ;;  %6351 = vmatmul.mubr.msk.f32.vlgmr.msra.gmra.mxu1 %vm1078_vm1, %v2547_v18 }
 0x8d1   : > { %v2548_v22 = vmul.f32 0.25, %v2517_v21  ;;  %6407 = vmatpush3.msra.mxu1 %v5426_v5 }
 0x8d2   : > { %v6274_v25 = vpop.f32.mrf.mxu0  ;;  %6408 = vmatprep.subr.mxu1 %v5425_v20 }
 0x8d3   : > { %6353 = vmatprep.mubr.msk.f32.mxu1 %vm1078_vm1, %v2548_v22  ;;  %6409 = vmatpush3.msra.mxu1 %v5425_v20  ;;  %v2551_v32 = vmul.f32 0.25, %v6274_v25 }
 0x8d4   : > { %v2527_v27 = vpop.f32.mrf.mxu0  ;;  %6354 = vmatmul.mubr.msk.f32.gmra.mxu1 %vm1078_vm1, %v2549_v24  ;;  %6410 = vmatprep.subr.mxu1 %v5424_v23 }
 0x8d5   : > { %v2550_v30 = vmul.f32 0.25, %v2527_v27  ;;  %6411 = vmatpush3.msra.mxu1 %v5424_v23 }
 0x8d6   : > { %v6277_v33 = vpop.f32.mrf.mxu0  ;;  %6412 = vmatprep.subr.mxu1 %v5423_v26 }
 0x8d7   : > { %6356 = vmatprep.mubr.msk.f32.mxu1 %vm1078_vm1, %v2550_v30  ;;  %6413 = vmatpush3.msra.mxu1 %v5423_v26  ;;  %v2553_v40 = vmul.f32 0.25, %v6277_v33 }
 0x8d8   : > { %v2537_v35 = vpop.f32.mrf.mxu0  ;;  %6357 = vmatmul.mubr.msk.f32.gmra.mxu1 %vm1078_vm1, %v2551_v32  ;;  %6414 = vmatprep.subr.mxu1 %v5422_v31 }
 0x8d9   : > { %v2552_v38 = vmul.f32 0.25, %v2537_v35  ;;  %6415 = vmatpush3.msra.mxu1 %v5422_v31 }
 0x8da   : > { %v7891_v41 = vpop.f32.mrf.mxu0  ;;  %6416 = vmatprep.subr.mxu1 %v5421_v34 }
 0x8db   : > { %6359 = vmatprep.mubr.msk.f32.mxu1 %vm1078_vm1, %v2552_v38  ;;  %6417 = vmatpush3.msra.mxu1 %v5421_v34 }
 0x8dc   : > { %v7897_v43 = vpop.f32.mrf.mxu0  ;;  %6360 = vmatmul.mubr.msk.f32.gmra.mxu1 %vm1078_vm1, %v2553_v40  ;;  %6418 = vmatprep.subr.mxu1 %v5420_v39 }
 0x8dd   : > { %6419 = vmatpush3.msra.mxu1 %v5420_v39  ;;  %6422 = vmatprep.mubr.msk.f32.mxu1 %vm573_vm0, %v7334_v54 }
 0x8de   : > { %v6327_v45 = vpop.f32.mrf.mxu0  ;;  %6420 = vmatprep.subr.mxu1 %v5419_v42 }
 0x8df   : > { %6421 = vmatpush3.msra.mxu1 %v5419_v42 }
 0x8e0   : > { %v2753_v49 = vpop.f32.mrf.mxu0  ;;  %6423 = vmatmul.mubr.msk.f32.vlgmr.msra.gmra.mxu1 %vm573_vm0, %v7342_v62  ;;  %6462 = vmatprep.subr.mxu1 %v5458_v44 }
 0x8e1   : > { %6425 = vmatprep.mubr.msk.f32.mxu1 %vm573_vm0, %v7345_v0  ;;  %6463 = vmatpush3.msra.mxu1 %v5458_v44 }
 0x8e2   : > { %v6330_v51 = vpop.f32.mrf.mxu0  ;;  %6464 = vmatprep.subr.mxu1 %v5457_v48 }
 0x8e3   : > { %6465 = vmatpush3.msra.mxu1 %v5457_v48 }
 0x8e4   : > { %v2763_v53 = vpop.f32.mrf.mxu0  ;;  %6426 = vmatmul.mubr.msk.f32.gmra.mxu1 %vm573_vm0, %v7359_v46  ;;  %6466 = vmatprep.subr.mxu1 %v5456_v50 }
 0x8e5   : > { %6428 = vmatprep.mubr.msk.f32.mxu1 %vm573_vm0, %v7366_v6  ;;  %6467 = vmatpush3.msra.mxu1 %v5456_v50 }
 0x8e6   : > { %v6333_v55 = vpop.f32.mrf.mxu0  ;;  %6468 = vmatprep.subr.mxu1 %v5455_v52 }
 0x8e7   : > { %6362 = vmatprep.subr.mxu0 %v6333_v55  ;;  %6469 = vmatpush3.msra.mxu1 %v5455_v52 }
 0x8e8   : > { %v2773_v59 = vpop.f32.mrf.mxu0  ;;  %6363 = vmatpush3.msra.mxu0 %v6333_v55  ;;  %6429 = vmatmul.mubr.msk.f32.gmra.mxu1 %vm573_vm0, %v7376_v11 }
 0x8e9   : > { %6470 = vmatprep.subr.mxu1 %v5454_v58  ;;  %6364 = vmatprep.subr.mxu0 %v2773_v59 }
 0x8ea   : > { %6431 = vmatprep.mubr.msk.f32.mxu1 %vm573_vm0, %v7383_v12  ;;  %6471 = vmatpush3.msra.mxu1 %v5454_v58 }
 0x8eb   : > { %6365 = vmatpush3.msra.mxu0 %v2773_v59  ;;  %6472 = vmatprep.subr.mxu1 %v5453_v28 }
 0x8ec   : > { %6366 = vmatprep.subr.mxu0 %v6330_v51  ;;  %6473 = vmatpush3.msra.mxu1 %v5453_v28 }
 0x8ed   : > { %6367 = vmatpush3.msra.mxu0 %v6330_v51  ;;  %6432 = vmatmul.mubr.msk.f32.gmra.mxu1 %vm573_vm0, %v7395_v15 }
 0x8ee   : > { %6474 = vmatprep.subr.mxu1 %v5452_v37  ;;  %6368 = vmatprep.subr.mxu0 %v2763_v53 }
 0x8ef   : > { %6475 = vmatpush3.msra.mxu1 %v5452_v37  ;;  %6478 = vmatprep.mubr.msk.f32.mxu1 %vm573_vm0, %v7334_v54 }
 0x8f0   : > { %6369 = vmatpush3.msra.mxu0 %v2763_v53  ;;  %6476 = vmatprep.subr.mxu1 %v5451_v4 }
 0x8f1   : > { %6370 = vmatprep.subr.mxu0 %v6327_v45  ;;  %6477 = vmatpush3.msra.mxu1 %v5451_v4 }
 0x8f2   : > { %6371 = vmatpush3.msra.mxu0 %v6327_v45  ;;  %6479 = vmatmul.mubr.msk.f32.vlgmr.msra.gmra.mxu1 %vm573_vm0, %v7342_v62 }
 0x8f3   : > { %6372 = vmatprep.subr.mxu0 %v2753_v49  ;;  %6481 = vmatprep.mubr.msk.f32.mxu1 %vm573_vm0, %v7345_v0 }
 0x8f4   : > { %6373 = vmatpush3.msra.mxu0 %v2753_v49 }
 0x8f5   : > { %6374 = vmatprep.subr.mxu0 %v7891_v41 }
 0x8f6   : > { %6375 = vmatpush3.msra.mxu0 %v7891_v41  ;;  %6482 = vmatmul.mubr.msk.f32.gmra.mxu1 %vm573_vm0, %v7359_v46 }
 0x8f7   : > { %6376 = vmatprep.subr.mxu0 %v7897_v43  ;;  %6484 = vmatprep.mubr.msk.f32.mxu1 %vm573_vm0, %v7366_v6 }
 0x8f8   : > { %6377 = vmatpush3.msra.mxu0 %v7897_v43 }
 0x8fa   : > { %6485 = vmatmul.mubr.msk.f32.gmra.mxu1 %vm573_vm0, %v7376_v11 }
 0x8fb   : > { %6487 = vmatprep.mubr.msk.f32.mxu1 %vm573_vm0, %v7383_v12 }
 0x8fe   : > { %6488 = vmatmul.mubr.msk.f32.gmra.mxu1 %vm573_vm0, %v7395_v15 }
 0x990   : > { %v6352_v5 = vpop.f32.mrf.mxu1 }
 0x991   : > { %v2938_v57 = vsel %vm573_vm0, %v6352_v5, -inf }
 0x992   : > { %2939 = vmax.xlane.f32.xlu1 %v2938_v57  ;;  %v2896_v16 = vpop.f32.mrf.mxu1 }
 0x993   : > { %v2935_v17 = vsel %vm573_vm0, %v2896_v16, -inf }
 0x994   : > { %2936 = vmax.xlane.f32.xlu0 %v2935_v17  ;;  %v6355_v18 = vpop.f32.mrf.mxu1 }
 0x995   : > { %v2944_v19 = vsel %vm573_vm0, %v6355_v18, -inf }
 0x996   : > { %2945 = vmax.xlane.f32.xlu1 %v2944_v19  ;;  %v2906_v20 = vpop.f32.mrf.mxu1 }
 0x997   : > { %v2941_v21 = vsel %vm573_vm0, %v2906_v20, -inf }
 0x998   : > { %2942 = vmax.xlane.f32.xlu0 %v2941_v21  ;;  %v7964_v22 = vpop.f32.mrf.mxu1 }
 0x999   : > { %v2950_v23 = vsel %vm573_vm0, %v7964_v22, -inf }
 0x99a   : > { %2951 = vmax.xlane.f32.xlu1 %v2950_v23  ;;  %v7968_v24 = vpop.f32.mrf.mxu1 }
 0x99b   : > { %v2947_v25 = vsel %vm573_vm0, %v7968_v24, -inf }
 0x99c   : > { %2948 = vmax.xlane.f32.xlu0 %v2947_v25  ;;  %v7972_v26 = vpop.f32.mrf.mxu1 }
 0x99d   : > { %v2956_v27 = vsel %vm573_vm0, %v7972_v26, -inf }
 0x99e   : > { %2957 = vmax.xlane.f32.xlu1 %v2956_v27  ;;  %v7976_v30 = vpop.f32.mrf.mxu1 }
 0x99f   : > { %v2953_v31 = vsel %vm573_vm0, %v7976_v30, -inf }
 0x9a0   : > { %v7980_v32 = vpop.f32.mrf.mxu1  ;;  %2954 = vmax.xlane.f32.xlu0 %v2953_v31 }
 0x9a2   : > { %v7982_v33 = vpop.f32.mrf.mxu1 }
 0x9a4   : > { %v7984_v34 = vpop.f32.mrf.mxu1 }
 0x9a6   : > { %v7986_v35 = vpop.f32.mrf.mxu1 }
 0x9a8   : > { %v7988_v38 = vpop.f32.mrf.mxu1 }
 0x9aa   : > { %v7990_v39 = vpop.f32.mrf.mxu1 }
 0x9ad   : > { %v7992_v40 = vpop.f32.mrf.mxu1 }
 0x9af   : > { %v7994_v41 = vpop.f32.mrf.mxu1 }
 0x9b2   : > { %v6480_v42 = vpop.f32.mrf.mxu1 }
 0x9b4   : > { %v3603_v43 = vpop.f32.mrf.mxu1 }
 0x9b6   : > { %v6483_v44 = vpop.f32.mrf.mxu1 }
 0x9b8   : > { %v3613_v45 = vpop.f32.mrf.mxu1 }
 0x9ba   : > { %v6486_v48 = vpop.f32.mrf.mxu1 }
 0x9bc   : > { %v3623_v49 = vpop.f32.mrf.mxu1 }
 0x9be   : > { %v6489_v50 = vpop.f32.mrf.mxu1 }
 0x9bf   : > { %6518 = vmatprep.subr.mxu1 %v6489_v50 }
 0x9c0   : > { %v3633_v51 = vpop.f32.mrf.mxu1  ;;  %6519 = vmatpush3.msra.mxu1 %v6489_v50 }
 0x9c1   : > { %6520 = vmatprep.subr.mxu1 %v3633_v51 }
 0x9c2   : > { %6521 = vmatpush3.msra.mxu1 %v3633_v51 }
 0x9c3   : > { %6522 = vmatprep.subr.mxu1 %v6486_v48 }
 0x9c4   : > { %6523 = vmatpush3.msra.mxu1 %v6486_v48 }
 0x9c5   : > { %6524 = vmatprep.subr.mxu1 %v3623_v49 }
 0x9c6   : > { %6525 = vmatpush3.msra.mxu1 %v3623_v49 }
 0x9c7   : > { %6526 = vmatprep.subr.mxu1 %v6483_v44 }
 0x9c8   : > { %6527 = vmatpush3.msra.mxu1 %v6483_v44 }
 0x9c9   : > { %6528 = vmatprep.subr.mxu1 %v3613_v45 }
 0x9ca   : > { %6529 = vmatpush3.msra.mxu1 %v3613_v45 }
 0x9cb   : > { %6530 = vmatprep.subr.mxu1 %v6480_v42 }
 0x9cc   : > { %6531 = vmatpush3.msra.mxu1 %v6480_v42 }
 0x9cd   : > { %6532 = vmatprep.subr.mxu1 %v3603_v43 }
 0x9ce   : > { %6533 = vmatpush3.msra.mxu1 %v3603_v43 }
 0xa1b   : > { %v2940_v52 = vpop.xlane.xlu1 %2939 }
 0xa1c   : > { %v2960_v53 = vsub.f32 %v6352_v5, %v2940_v52 }
 0xa1d   : > { %v2937_v55 = vpop.xlane.xlu0 %2936 }
 0xa1e   : > { %v2969_v58 = vmul.f32 1.442695, %v2960_v53  ;;  %v2959_v59 = vsub.f32 %v2896_v16, %v2937_v55 }
 0xa1f   : > { %v2946_v28 = vpop.xlane.xlu1 %2945 }
 0xa20   : > { %6765 = vpow2.f32 %v2969_v58  ;;  %v2967_v37 = vmul.f32 1.442695, %v2959_v59  ;;  %v2962_v4 = vsub.f32 %v6355_v18, %v2946_v28 }
 0xa21   : > { %v2943_v57 = vpop.xlane.xlu0 %2942 }
 0xa22   : > { %6767 = vpow2.f32 %v2967_v37  ;;  %v2973_v17 = vmul.f32 1.442695, %v2962_v4  ;;  %v2961_v19 = vsub.f32 %v2906_v20, %v2943_v57  ;;  %v5410_v57 = vld [vmem:[%s8897_s6 + $0x28] sm:$0xff] }
 0xa23   : > { %v2952_v21 = vpop.xlane.xlu1 %2951  ;;  %6390 = vmatprep.subr.mxu0 %v5410_v57 }
 0xa24   : > { %6769 = vpow2.f32 %v2973_v17  ;;  %v2971_v23 = vmul.f32 1.442695, %v2961_v19  ;;  %v2964_v25 = vsub.f32 %v7964_v22, %v2952_v21 }
 0xa25   : > { %v2949_v27 = vpop.xlane.xlu0 %2948 }
 0xa26   : > { %6771 = vpow2.f32 %v2971_v23  ;;  %v2977_v31 = vmul.f32 1.442695, %v2964_v25  ;;  %v2963_v5 = vsub.f32 %v7968_v24, %v2949_v27 }
 0xa27   : > { %v2958_v42 = vpop.xlane.xlu1 %2957 }
 0xa28   : > { %6773 = vpow2.f32 %v2977_v31  ;;  %v2975_v16 = vmul.f32 1.442695, %v2963_v5  ;;  %v2966_v43 = vsub.f32 %v7972_v26, %v2958_v42 }
 0xa29   : > { %v2955_v18 = vpop.xlane.xlu0 %2954 }
 0xa2a   : > { %6775 = vpow2.f32 %v2975_v16  ;;  %v2981_v44 = vmul.f32 1.442695, %v2966_v43  ;;  %v2965_v20 = vsub.f32 %v7976_v30, %v2955_v18 }
 0xa2c   : > { %6777 = vpow2.f32 %v2981_v44  ;;  %v2979_v45 = vmul.f32 1.442695, %v2965_v20  ;;  %v5409_v20 = vld [vmem:[%s8897_s6 + $0x20] sm:$0xff] }
 0xa2d   : > { %v6766_v48 = vpop.eup %6765 }
 0xa2e   : > { %6779 = vpow2.f32 %v2979_v45  ;;  %v2986_v22 = vsel %vm573_vm0, %v6766_v48, 0.0 }
 0xa2f   : > { %v6768_v49 = vpop.eup %6767  ;;  %2987 = vadd.xlane.f32.xlu1 %v2986_v22 }
 0xa30   : > { %v2983_v24 = vsel %vm573_vm0, %v6768_v49, 0.0 }
 0xa31   : > { %v6770_v50 = vpop.eup %6769  ;;  %2984 = vadd.xlane.f32.xlu0 %v2983_v24 }
 0xa32   : > { %v2992_v51 = vsel %vm573_vm0, %v6770_v50, 0.0 }
 0xa33   : > { %v6772_v26 = vpop.eup %6771  ;;  %2993 = vadd.xlane.f32.xlu1 %v2992_v51 }
 0xa34   : > { %v2989_v52 = vsel %vm573_vm0, %v6772_v26, 0.0 }
 0xa35   : > { %v6774_v53 = vpop.eup %6773  ;;  %2990 = vadd.xlane.f32.xlu0 %v2989_v52 }
 0xa36   : > { %v2998_v30 = vsel %vm573_vm0, %v6774_v53, 0.0 }
 0xa37   : > { %v6776_v55 = vpop.eup %6775  ;;  %2999 = vadd.xlane.f32.xlu1 %v2998_v30 }
 0xa38   : > { %v2995_v58 = vsel %vm573_vm0, %v6776_v55, 0.0 }
 0xa39   : > { %v6778_v59 = vpop.eup %6777  ;;  %2996 = vadd.xlane.f32.xlu0 %v2995_v58 }
 0xa3a   : > { %v3004_v28 = vsel %vm573_vm0, %v6778_v59, 0.0 }
 0xa3b   : > { %v6780_v37 = vpop.eup %6779  ;;  %3005 = vadd.xlane.f32.xlu1 %v3004_v28 }
 0xa3c   : > { %v3001_v4 = vsel %vm573_vm0, %v6780_v37, 0.0 }
 0xa3d   : > { %3002 = vadd.xlane.f32.xlu0 %v3001_v4 }
 0xab8   : > { %v2988_v17 = vpop.xlane.xlu1 %2987 }
 0xab9   : > { %6781 = vrcp.f32 %v2988_v17  ;;  %v5439_v17 = vld [vmem:[%s8895_s4 + $0xe0] sm:$0xff] }
 0xaba   : > { %v2985_v19 = vpop.xlane.xlu0 %2984 }
 0xabb   : > { %6783 = vrcp.f32 %v2985_v19 }
 0xabc   : > { %v2994_v21 = vpop.xlane.xlu1 %2993 }
 0xabd   : > { %6785 = vrcp.f32 %v2994_v21  ;;  %v5438_v21 = vld [vmem:[%s8895_s4 + $0xd8] sm:$0xff] }
 0xabe   : > { %v2991_v23 = vpop.xlane.xlu0 %2990 }
 0xabf   : > { %6787 = vrcp.f32 %v2991_v23 }
 0xac0   : > { %v3000_v25 = vpop.xlane.xlu1 %2999 }
 0xac1   : > { %6789 = vrcp.f32 %v3000_v25  ;;  %v5437_v25 = vld [vmem:[%s8895_s4 + $0xd0] sm:$0xff] }
 0xac2   : > { %v2997_v27 = vpop.xlane.xlu0 %2996 }
 0xac3   : > { %6791 = vrcp.f32 %v2997_v27 }
 0xac4   : > { %v3006_v31 = vpop.xlane.xlu1 %3005 }
 0xac5   : > { %6793 = vrcp.f32 %v3006_v31  ;;  %v5436_v31 = vld [vmem:[%s8895_s4 + $0xc8] sm:$0xff] }
 0xac6   : > { %v3003_v5 = vpop.xlane.xlu0 %3002  ;;  %v6782_v42 = vpop.eup %6781 }
 0xac7   : > { %6795 = vrcp.f32 %v3003_v5  ;;  %v3010_v18 = vmul.f32 %v6782_v42, %v6766_v48  ;;  %v5435_v42 = vld [vmem:[%s8895_s4 + $0xc0] sm:$0xff] }
 0xac8   : > { %v6784_v16 = vpop.eup %6783 }
 0xac9   : > { %v3008_v43 = vmul.f32 %v6784_v16, %v6768_v49 }
 0xaca   : > { %v6786_v44 = vpop.eup %6785 }
 0xacb   : > { %6378 = vmatprep.mubr.msk.f32.mxu0 %vm573_vm0, %v3008_v43  ;;  %v3014_v24 = vmul.f32 %v6786_v44, %v6770_v50  ;;  %v5442_v50 = vld [vmem:[%s8895_s4 + $0xf8] sm:$0xff] }
 0xacc   : > { %v6788_v45 = vpop.eup %6787  ;;  %6379 = vmatmul.mubr.msk.f32.vlgmr.msra.gmra.mxu0 %vm573_vm0, %v3010_v18 }
 0xacd   : > { %v3012_v22 = vmul.f32 %v6788_v45, %v6772_v26  ;;  %6391 = vmatpush3.msra.mxu0 %v5410_v57 }
 0xace   : > { %6392 = vmatprep.subr.mxu0 %v5409_v20  ;;  %v6790_v51 = vpop.eup %6789 }
 0xacf   : > { %6381 = vmatprep.mubr.msk.f32.mxu0 %vm573_vm0, %v3012_v22  ;;  %6393 = vmatpush3.msra.mxu0 %v5409_v20  ;;  %v3018_v52 = vmul.f32 %v6790_v51, %v6774_v53  ;;  %v5441_v53 = vld [vmem:[%s8895_s4 + $0xf0] sm:$0xff] }
 0xad0   : > { %v6792_v49 = vpop.eup %6791  ;;  %6382 = vmatmul.mubr.msk.f32.gmra.mxu0 %vm573_vm0, %v3014_v24  ;;  %6434 = vmatprep.subr.mxu0 %v5442_v50 }
 0xad1   : > { %v3016_v48 = vmul.f32 %v6792_v49, %v6776_v55 }
 0xad2   : > { %v6794_v30 = vpop.eup %6793 }
 0xad3   : > { %6384 = vmatprep.mubr.msk.f32.mxu0 %vm573_vm0, %v3016_v48  ;;  %v3022_v26 = vmul.f32 %v6794_v30, %v6778_v59  ;;  %v5440_v59 = vld [vmem:[%s8895_s4 + $0xe8] sm:$0xff]  ;;  %v3411_v30 = vmul.f32 0.25, %v7988_v38 }
 0xad4   : > { %v6796_v58 = vpop.eup %6795  ;;  %6385 = vmatmul.mubr.msk.f32.gmra.mxu0 %vm573_vm0, %v3018_v52  ;;  %v3410_v52 = vmul.f32 0.25, %v7990_v39 }
 0xad5   : > { %v3020_v28 = vmul.f32 %v6796_v58, %v6780_v37  ;;  %v3412_v58 = vmul.f32 0.25, %v7994_v41 }
 0xad7   : > { %6387 = vmatprep.mubr.msk.f32.mxu0 %vm573_vm0, %v3020_v28 }
 0xad8   : > { %6388 = vmatmul.mubr.msk.f32.gmra.mxu0 %vm573_vm0, %v3022_v26 }
 0xb8c   : > { %v6380_v4 = vpop.f32.mrf.mxu0 }
 0xb8e   : > { %v3113_v55 = vpop.f32.mrf.mxu0 }
 0xb8f   : > { %6394 = vmatprep.mubr.msk.f32.mxu0 %vm1078_vm1, %v3113_v55 }
 0xb90   : > { %v6383_v57 = vpop.f32.mrf.mxu0  ;;  %6395 = vmatmul.mubr.msk.f32.vlgmr.msra.gmra.mxu0 %vm1078_vm1, %v6380_v4 }
 0xb91   : > { %6435 = vmatpush3.msra.mxu0 %v5442_v50 }
 0xb92   : > { %6436 = vmatprep.subr.mxu0 %v5441_v53  ;;  %v3123_v37 = vpop.f32.mrf.mxu0 }
 0xb93   : > { %6437 = vmatpush3.msra.mxu0 %v5441_v53  ;;  %6397 = vmatprep.mubr.msk.f32.mxu0 %vm1078_vm1, %v3123_v37 }
 0xb94   : > { %6438 = vmatprep.subr.mxu0 %v5440_v59  ;;  %v6386_v19 = vpop.f32.mrf.mxu0  ;;  %6398 = vmatmul.mubr.msk.f32.gmra.mxu0 %vm1078_vm1, %v6383_v57 }
 0xb95   : > { %6439 = vmatpush3.msra.mxu0 %v5440_v59 }
 0xb96   : > { %6440 = vmatprep.subr.mxu0 %v5439_v17  ;;  %v3133_v23 = vpop.f32.mrf.mxu0 }
 0xb97   : > { %6441 = vmatpush3.msra.mxu0 %v5439_v17  ;;  %6400 = vmatprep.mubr.msk.f32.mxu0 %vm1078_vm1, %v3133_v23 }
 0xb98   : > { %6442 = vmatprep.subr.mxu0 %v5438_v21  ;;  %v6389_v27 = vpop.f32.mrf.mxu0  ;;  %6401 = vmatmul.mubr.msk.f32.gmra.mxu0 %vm1078_vm1, %v6386_v19 }
 0xb99   : > { %6443 = vmatpush3.msra.mxu0 %v5438_v21 }
 0xb9a   : > { %6444 = vmatprep.subr.mxu0 %v5437_v25  ;;  %v3143_v5 = vpop.f32.mrf.mxu0 }
 0xb9b   : > { %6445 = vmatpush3.msra.mxu0 %v5437_v25  ;;  %6403 = vmatprep.mubr.msk.f32.mxu0 %vm1078_vm1, %v3143_v5 }
 0xb9c   : > { %6446 = vmatprep.subr.mxu0 %v5436_v31  ;;  %6404 = vmatmul.mubr.msk.f32.gmra.mxu0 %vm1078_vm1, %v6389_v27 }
 0xb9d   : > { %6447 = vmatpush3.msra.mxu0 %v5436_v31  ;;  %6450 = vmatprep.mubr.msk.f32.mxu0 %vm573_vm0, %v7334_v54  ;;  %v3406_v54 = vmul.f32 0.25, %v7982_v33 }
 0xb9e   : > { %6448 = vmatprep.subr.mxu0 %v5435_v42 }
 0xb9f   : > { %6449 = vmatpush3.msra.mxu0 %v5435_v42 }
 0xba0   : > { %6451 = vmatmul.mubr.msk.f32.vlgmr.msra.gmra.mxu0 %vm573_vm0, %v7342_v62  ;;  %v2399_v62 = vadd.f32 %v7702_v60, %v7851_v7  ;;  %v2419_v60 = vadd.f32 %v7710_v1, %v7859_v47 }
 0xba1   : > { %6453 = vmatprep.mubr.msk.f32.mxu0 %vm573_vm0, %v7345_v0 }
 0xba4   : > { %6454 = vmatmul.mubr.msk.f32.gmra.mxu0 %vm573_vm0, %v7359_v46  ;;  %v2394_v46 = vadd.f32 %v7704_v61, %v7853_v8  ;;  %v2414_v8 = vadd.f32 %v7712_v29, %v7861_v56 }
 0xba5   : > { %6456 = vmatprep.mubr.msk.f32.mxu0 %vm573_vm0, %v7366_v6 }
 0xba8   : > { %6457 = vmatmul.mubr.msk.f32.gmra.mxu0 %vm573_vm0, %v7376_v11 }
 0xba9   : > { %6459 = vmatprep.mubr.msk.f32.mxu0 %vm573_vm0, %v7383_v12  ;;  %v2409_v12 = vadd.f32 %v7706_v63, %v7855_v9  ;;  %v2429_v9 = vadd.f32 %v7714_v2, %v7863_v13  ;;  %v3408_v13 = vmul.f32 0.25, %v7986_v35 }
 0xbac   : > { %6460 = vmatmul.mubr.msk.f32.gmra.mxu0 %vm573_vm0, %v7395_v15  ;;  %v2404_v15 = vadd.f32 %v7708_v36, %v7857_v10  ;;  %v2424_v10 = vadd.f32 %v7716_v3, %v7865_v14  ;;  %v3407_v3 = vmul.f32 0.25, %v7980_v32  ;;  %v3409_v14 = vmul.f32 0.25, %v7984_v34 }
 0xbad   : > { %6506 = vmatprep.mubr.msk.f32.mxu0 %vm1078_vm1, %v3406_v54  ;;  %v3413_v32 = vmul.f32 0.25, %v7992_v40 }
 0xc50   : > { %v6396_v0 = vpop.f32.mrf.mxu0 }
 0xc51   : > { %v8076_v6 = vadd.f32 %v6396_v0, %v2399_v62 }
 0xc52   : > { %v3245_v11 = vpop.f32.mrf.mxu0 }
 0xc53   : > { %v8080_v16 = vadd.f32 %v3245_v11, %v2394_v46 }
 0xc54   : > { %v6399_v33 = vpop.f32.mrf.mxu0 }
 0xc55   : > { %v8084_v43 = vadd.f32 %v6399_v33, %v2409_v12 }
 0xc56   : > { %v3255_v18 = vpop.f32.mrf.mxu0 }
 0xc57   : > { %v8088_v7 = vadd.f32 %v3255_v18, %v2404_v15 }
 0xc58   : > { %v6402_v61 = vpop.f32.mrf.mxu0 }
 0xc59   : > { %v8092_v44 = vadd.f32 %v6402_v61, %v2419_v60 }
 0xc5a   : > { %v3265_v63 = vpop.f32.mrf.mxu0 }
 0xc5b   : > { %v8096_v20 = vadd.f32 %v3265_v63, %v2414_v8 }
 0xc5c   : > { %v6405_v36 = vpop.f32.mrf.mxu0 }
 0xc5d   : > { %v8100_v45 = vadd.f32 %v6405_v36, %v2429_v9 }
 0xc5e   : > { %v3275_v1 = vpop.f32.mrf.mxu0 }
 0xc5f   : > { %v8102_v47 = vadd.f32 %v3275_v1, %v2424_v10 }
 0xc60   : > { %v6452_v22 = vpop.f32.mrf.mxu0 }
 0xc62   : > { %v3489_v24 = vpop.f32.mrf.mxu0 }
 0xc64   : > { %v6455_v29 = vpop.f32.mrf.mxu0 }
 0xc66   : > { %v3499_v56 = vpop.f32.mrf.mxu0 }
 0xc68   : > { %v6458_v51 = vpop.f32.mrf.mxu0 }
 0xc6a   : > { %v3509_v49 = vpop.f32.mrf.mxu0 }
 0xc6c   : > { %v6461_v48 = vpop.f32.mrf.mxu0 }
 0xc6d   : > { %6490 = vmatprep.subr.msk.mxu0 %vm1078_vm1, %v6461_v48 }
 0xc6e   : > { %v3519_v2 = vpop.f32.mrf.mxu0  ;;  %6491 = vmatpush3.xpose.msk.msra.mxu0 %vm1078_vm1, %v6461_v48 }
 0xc6f   : > { %6492 = vmatprep.subr.msk.mxu0 %vm1078_vm1, %v3519_v2 }
 0xc72   : > { %6493 = vmatpush3.xpose.msk.msra.mxu0 %vm1078_vm1, %v3519_v2 }
 0xc73   : > { %6494 = vmatprep.subr.msk.mxu0 %vm1078_vm1, %v6458_v51 }
 0xc76   : > { %6495 = vmatpush3.xpose.msk.msra.mxu0 %vm1078_vm1, %v6458_v51 }
 0xc77   : > { %6496 = vmatprep.subr.msk.mxu0 %vm1078_vm1, %v3509_v49 }
 0xc7a   : > { %6497 = vmatpush3.xpose.msk.msra.mxu0 %vm1078_vm1, %v3509_v49 }
 0xc7b   : > { %6498 = vmatprep.subr.msk.mxu0 %vm1078_vm1, %v6455_v29 }
 0xc7e   : > { %6499 = vmatpush3.xpose.msk.msra.mxu0 %vm1078_vm1, %v6455_v29 }
 0xc7f   : > { %6500 = vmatprep.subr.msk.mxu0 %vm1078_vm1, %v3499_v56 }
 0xc82   : > { %6501 = vmatpush3.xpose.msk.msra.mxu0 %vm1078_vm1, %v3499_v56 }
 0xc83   : > { %6502 = vmatprep.subr.msk.mxu0 %vm1078_vm1, %v6452_v22 }
 0xc86   : > { %6503 = vmatpush3.xpose.msk.msra.mxu0 %vm1078_vm1, %v6452_v22 }
 0xc87   : > { %6504 = vmatprep.subr.msk.mxu0 %vm1078_vm1, %v3489_v24 }
 0xc8a   : > { %6505 = vmatpush3.xpose.msk.msra.mxu0 %vm1078_vm1, %v3489_v24 }
 0xc8d   : > { %6507 = vmatmul.mubr.msk.f32.vlgmr.msra.gmra.mxu0 %vm1078_vm1, %v3407_v3 }
 0xc8e   : > { %6509 = vmatprep.mubr.msk.f32.mxu0 %vm1078_vm1, %v3408_v13 }
 0xc91   : > { %6510 = vmatmul.mubr.msk.f32.gmra.mxu0 %vm1078_vm1, %v3409_v14 }
 0xc92   : > { %6512 = vmatprep.mubr.msk.f32.mxu0 %vm1078_vm1, %v3410_v52 }
 0xc95   : > { %6513 = vmatmul.mubr.msk.f32.gmra.mxu0 %vm1078_vm1, %v3411_v30 }
 0xc96   : > { %6515 = vmatprep.mubr.msk.f32.mxu0 %vm1078_vm1, %v3412_v58 }
 0xc99   : > { %6516 = vmatmul.mubr.msk.f32.gmra.mxu0 %vm1078_vm1, %v3413_v32 }
 0xd4d   : > { %v6508_v35 = vpop.f32.mrf.mxu0 }
 0xd4e   : > { %v3798_v34 = vsel %vm573_vm0, %v6508_v35, -inf }
 0xd4f   : > { %3799 = vmax.xlane.f32.xlu1 %v3798_v34  ;;  %v3756_v39 = vpop.f32.mrf.mxu0 }
 0xd50   : > { %v3795_v28 = vsel %vm573_vm0, %v3756_v39, -inf }
 0xd51   : > { %3796 = vmax.xlane.f32.xlu0 %v3795_v28  ;;  %v6511_v26 = vpop.f32.mrf.mxu0 }
 0xd52   : > { %v3804_v38 = vsel %vm573_vm0, %v6511_v26, -inf }
 0xd53   : > { %3805 = vmax.xlane.f32.xlu1 %v3804_v38  ;;  %v3766_v41 = vpop.f32.mrf.mxu0 }
 0xd54   : > { %v3801_v50 = vsel %vm573_vm0, %v3766_v41, -inf }
 0xd55   : > { %3802 = vmax.xlane.f32.xlu0 %v3801_v50  ;;  %v6514_v4 = vpop.f32.mrf.mxu0 }
 0xd56   : > { %v3810_v40 = vsel %vm573_vm0, %v6514_v4, -inf }
 0xd57   : > { %3811 = vmax.xlane.f32.xlu1 %v3810_v40  ;;  %v3776_v55 = vpop.f32.mrf.mxu0 }
 0xd58   : > { %v3807_v53 = vsel %vm573_vm0, %v3776_v55, -inf }
 0xd59   : > { %3808 = vmax.xlane.f32.xlu0 %v3807_v53  ;;  %v6517_v57 = vpop.f32.mrf.mxu0 }
 0xd5a   : > { %v3816_v59 = vsel %vm573_vm0, %v6517_v57, -inf }
 0xd5b   : > { %3817 = vmax.xlane.f32.xlu1 %v3816_v59  ;;  %v3786_v37 = vpop.f32.mrf.mxu0 }
 0xd5c   : > { %v3813_v17 = vsel %vm573_vm0, %v3786_v37, -inf }
 0xd5d   : > { %3814 = vmax.xlane.f32.xlu0 %v3813_v17 }
 0xdd8   : > { %v3800_v19 = vpop.xlane.xlu1 %3799 }
 0xdd9   : > { %v3820_v21 = vsub.f32 %v6508_v35, %v3800_v19  ;;  %v5492_v35 = vld [vmem:[%s8897_s6 + $0x38] sm:$0xff] }
 0xdda   : > { %v3797_v23 = vpop.xlane.xlu0 %3796  ;;  %6546 = vmatprep.subr.mxu1 %v5492_v35 }
 0xddb   : > { %v3829_v25 = vmul.f32 1.442695, %v3820_v21  ;;  %v3819_v27 = vsub.f32 %v3756_v39, %v3797_v23 }
 0xddc   : > { %v3806_v31 = vpop.xlane.xlu1 %3805 }
 0xddd   : > { %6797 = vpow2.f32 %v3829_v25  ;;  %v3827_v5 = vmul.f32 1.442695, %v3819_v27  ;;  %v3822_v42 = vsub.f32 %v6511_v26, %v3806_v31 }
 0xdde   : > { %v3803_v54 = vpop.xlane.xlu0 %3802 }
 0xddf   : > { %6799 = vpow2.f32 %v3827_v5  ;;  %v3833_v62 = vmul.f32 1.442695, %v3822_v42  ;;  %v3821_v0 = vsub.f32 %v3766_v41, %v3803_v54 }
 0xde0   : > { %v3812_v46 = vpop.xlane.xlu1 %3811 }
 0xde1   : > { %6801 = vpow2.f32 %v3833_v62  ;;  %v3831_v11 = vmul.f32 1.442695, %v3821_v0  ;;  %v3824_v12 = vsub.f32 %v6514_v4, %v3812_v46 }
 0xde2   : > { %v3809_v33 = vpop.xlane.xlu0 %3808 }
 0xde3   : > { %6803 = vpow2.f32 %v3831_v11  ;;  %v3837_v15 = vmul.f32 1.442695, %v3824_v12  ;;  %v3823_v18 = vsub.f32 %v3776_v55, %v3809_v33 }
 0xde4   : > { %v3818_v60 = vpop.xlane.xlu1 %3817 }
 0xde5   : > { %6805 = vpow2.f32 %v3837_v15  ;;  %v3835_v61 = vmul.f32 1.442695, %v3823_v18  ;;  %v3826_v8 = vsub.f32 %v6517_v57, %v3818_v60 }
 0xde6   : > { %v3815_v63 = vpop.xlane.xlu0 %3814 }
 0xde7   : > { %6807 = vpow2.f32 %v3835_v61  ;;  %v3841_v9 = vmul.f32 1.442695, %v3826_v8  ;;  %v3825_v36 = vsub.f32 %v3786_v37, %v3815_v63  ;;  %v5491_v37 = vld [vmem:[%s8897_s6 + $0x30] sm:$0xff]  ;;  %v5501_v8 = vld [vmem:[%s8898_s7] ss:$0 sm:$0xff] }
 0xde9   : > { %6809 = vpow2.f32 %v3841_v9  ;;  %v3839_v10 = vmul.f32 1.442695, %v3825_v36 }
 0xdea   : > { %v6798_v1 = vpop.eup %6797 }
 0xdeb   : > { %6811 = vpow2.f32 %v3839_v10  ;;  %v3846_v22 = vsel %vm573_vm0, %v6798_v1, 0.0 }
 0xdec   : > { %v6800_v24 = vpop.eup %6799  ;;  %3847 = vadd.xlane.f32.xlu1 %v3846_v22  ;;  %v6909_v22 = vld [vmem:[%s7215_s26 + $0x8] sm:$0xff] }
 0xded   : > { %v3843_v29 = vsel %vm573_vm0, %v6800_v24, 0.0 }
 0xdee   : > { %v6802_v56 = vpop.eup %6801  ;;  %3844 = vadd.xlane.f32.xlu0 %v3843_v29 }
 0xdef   : > { %v3852_v51 = vsel %vm573_vm0, %v6802_v56, 0.0 }
 0xdf0   : > { %v6804_v49 = vpop.eup %6803  ;;  %3853 = vadd.xlane.f32.xlu1 %v3852_v51 }
 0xdf1   : > { %v3849_v48 = vsel %vm573_vm0, %v6804_v49, 0.0 }
 0xdf2   : > { %v6806_v2 = vpop.eup %6805  ;;  %3850 = vadd.xlane.f32.xlu0 %v3849_v48 }
 0xdf3   : > { %v3858_v3 = vsel %vm573_vm0, %v6806_v2, 0.0 }
 0xdf4   : > { %v6808_v13 = vpop.eup %6807  ;;  %3859 = vadd.xlane.f32.xlu1 %v3858_v3 }
 0xdf5   : > { %v3855_v14 = vsel %vm573_vm0, %v6808_v13, 0.0 }
 0xdf6   : > { %v6810_v52 = vpop.eup %6809  ;;  %3856 = vadd.xlane.f32.xlu0 %v3855_v14 }
 0xdf7   : > { %v3864_v30 = vsel %vm573_vm0, %v6810_v52, 0.0 }
 0xdf8   : > { %v6812_v58 = vpop.eup %6811  ;;  %3865 = vadd.xlane.f32.xlu1 %v3864_v30 }
 0xdf9   : > { %v3861_v32 = vsel %vm573_vm0, %v6812_v58, 0.0 }
 0xdfa   : > { %3862 = vadd.xlane.f32.xlu0 %v3861_v32  ;;  %v6912_v32 = vld [vmem:[%s7215_s26 + $0x10] sm:$0xff] }
 0xe75   : > { %v3848_v34 = vpop.xlane.xlu1 %3847 }
 0xe76   : > { %6813 = vrcp.f32 %v3848_v34 }
 0xe77   : > { %v3845_v39 = vpop.xlane.xlu0 %3844 }
 0xe78   : > { %6815 = vrcp.f32 %v3845_v39 }
 0xe79   : > { %v3854_v28 = vpop.xlane.xlu1 %3853 }
 0xe7a   : > { %6817 = vrcp.f32 %v3854_v28 }
 0xe7b   : > { %v3851_v26 = vpop.xlane.xlu0 %3850 }
 0xe7c   : > { %6819 = vrcp.f32 %v3851_v26  ;;  %v6913_v26 = vld [vmem:[%s7215_s26 + $0x28] sm:$0xff] }
 0xe7d   : > { %v3860_v38 = vpop.xlane.xlu1 %3859 }
 0xe7e   : > { %6821 = vrcp.f32 %v3860_v38 }
 0xe7f   : > { %v3857_v41 = vpop.xlane.xlu0 %3856 }
 0xe80   : > { %6823 = vrcp.f32 %v3857_v41 }
 0xe81   : > { %v3866_v50 = vpop.xlane.xlu1 %3865 }
 0xe82   : > { %6825 = vrcp.f32 %v3866_v50 }
 0xe83   : > { %v3863_v4 = vpop.xlane.xlu0 %3862  ;;  %v6814_v40 = vpop.eup %6813 }
 0xe84   : > { %6827 = vrcp.f32 %v3863_v4  ;;  %v3870_v57 = vmul.f32 %v6814_v40, %v6798_v1  ;;  %v6914_v40 = vld [vmem:[%s7215_s26 + $0x20] sm:$0xff] }
 0xe85   : > { %v6816_v55 = vpop.eup %6815 }
 0xe86   : > { %v3868_v53 = vmul.f32 %v6816_v55, %v6800_v24 }
 0xe87   : > { %v6818_v59 = vpop.eup %6817 }
 0xe88   : > { %6534 = vmatprep.mubr.msk.f32.mxu1 %vm573_vm0, %v3868_v53  ;;  %v3874_v21 = vmul.f32 %v6818_v59, %v6802_v56  ;;  %v6915_v59 = vld [vmem:[%s7215_s26 + $0x38] sm:$0xff] }
 0xe89   : > { %v6820_v17 = vpop.eup %6819  ;;  %6535 = vmatmul.mubr.msk.f32.vlgmr.msra.gmra.mxu1 %vm573_vm0, %v3870_v57 }
 0xe8a   : > { %v3872_v19 = vmul.f32 %v6820_v17, %v6804_v49  ;;  %6547 = vmatpush3.msra.mxu1 %v5492_v35  ;;  %v6910_v49 = vld [vmem:[%s7215_s26] sm:$0xff] }
 0xe8b   : > { %6548 = vmatprep.subr.mxu1 %v5491_v37  ;;  %v6822_v23 = vpop.eup %6821 }
 0xe8c   : > { %6537 = vmatprep.mubr.msk.f32.mxu1 %vm573_vm0, %v3872_v19  ;;  %6549 = vmatpush3.msra.mxu1 %v5491_v37  ;;  %v3878_v31 = vmul.f32 %v6822_v23, %v6806_v2  ;;  %v6916_v19 = vld [vmem:[%s7215_s26 + $0x30] sm:$0xff] }
 0xe8d   : > { %v6824_v25 = vpop.eup %6823  ;;  %6538 = vmatmul.mubr.msk.f32.gmra.mxu1 %vm573_vm0, %v3874_v21 }
 0xe8e   : > { %v3876_v27 = vmul.f32 %v6824_v25, %v6808_v13  ;;  %v6911_v13 = vld [vmem:[%s7215_s26 + $0x18] sm:$0xff] }
 0xe8f   : > { %v6826_v5 = vpop.eup %6825 }
 0xe90   : > { %6540 = vmatprep.mubr.msk.f32.mxu1 %vm573_vm0, %v3876_v27  ;;  %v3882_v62 = vmul.f32 %v6826_v5, %v6810_v52 }
 0xe91   : > { %v6828_v42 = vpop.eup %6827  ;;  %6541 = vmatmul.mubr.msk.f32.gmra.mxu1 %vm573_vm0, %v3878_v31 }
 0xe92   : > { %v3880_v54 = vmul.f32 %v6828_v42, %v6812_v58 }
 0xe94   : > { %6543 = vmatprep.mubr.msk.f32.mxu1 %vm573_vm0, %v3880_v54 }
 0xe95   : > { %6544 = vmatmul.mubr.msk.f32.gmra.mxu1 %vm573_vm0, %v3882_v62 }
 0xf49   : > { %v6536_v0 = vpop.f32.mrf.mxu1 }
 0xf4b   : > { %v3973_v46 = vpop.f32.mrf.mxu1 }
 0xf4c   : > { %6550 = vmatprep.mubr.msk.f32.mxu1 %vm1078_vm1, %v3973_v46 }
 0xf4d   : > { %v6539_v11 = vpop.f32.mrf.mxu1  ;;  %6551 = vmatmul.mubr.msk.f32.vlgmr.msra.gmra.mxu1 %vm1078_vm1, %v6536_v0 }
 0xf4f   : > { %v3983_v12 = vpop.f32.mrf.mxu1 }
 0xf50   : > { %6553 = vmatprep.mubr.msk.f32.mxu1 %vm1078_vm1, %v3983_v12 }
 0xf51   : > { %v6542_v33 = vpop.f32.mrf.mxu1  ;;  %6554 = vmatmul.mubr.msk.f32.gmra.mxu1 %vm1078_vm1, %v6539_v11 }
 0xf53   : > { %v3993_v15 = vpop.f32.mrf.mxu1 }
 0xf54   : > { %6556 = vmatprep.mubr.msk.f32.mxu1 %vm1078_vm1, %v3993_v15 }
 0xf55   : > { %v6545_v18 = vpop.f32.mrf.mxu1  ;;  %6557 = vmatmul.mubr.msk.f32.gmra.mxu1 %vm1078_vm1, %v6542_v33 }
 0xf57   : > { %v4003_v60 = vpop.f32.mrf.mxu1 }
 0xf58   : > { %6559 = vmatprep.mubr.msk.f32.mxu1 %vm1078_vm1, %v4003_v60 }
 0xf59   : > { %6560 = vmatmul.mubr.msk.f32.gmra.mxu1 %vm1078_vm1, %v6545_v18 }
0x100d   : > { %v6552_v61 = vpop.f32.mrf.mxu1 }
0x100e   : > { %v4145_v63 = vadd.f32 %v6552_v61, %v8076_v6 }
0x100f   : > { %v4105_v9 = vpop.f32.mrf.mxu1 }
0x1010   : > { %v4160_v36 = vadd.f32 %v5501_v8, %v4145_v63  ;;  %v4144_v10 = vadd.f32 %v4105_v9, %v8080_v16 }
0x1011   : > { %v6555_v1 = vpop.f32.mrf.mxu1 }
0x1012   : > { %v8178_v24 = vadd.f32 %v6909_v22, %v4160_v36  ;;  %v4159_v29 = vadd.f32 %v5501_v8, %v4144_v10  ;;  %v4147_v56 = vadd.f32 %v6555_v1, %v8084_v43 }
0x1013   : > { %v4115_v51 = vpop.f32.mrf.mxu1 }
0x1014   : > { %8948 = vst [vmem:[#allocation12_spill] sm:$0xff] %v8178_v24  ;;  %v8182_v48 = vadd.f32 %v6910_v49, %v4159_v29  ;;  %v4162_v2 = vadd.f32 %v5501_v8, %v4147_v56  ;;  %v4146_v6 = vadd.f32 %v4115_v51, %v8088_v7  ;;  %v4180_v3 = vsel %vm573_vm0, %v8178_v24, 0.0 }
0x1015   : > { %4181 = vadd.xlane.f32.xlu1 %v4180_v3  ;;  %v6558_v16 = vpop.f32.mrf.mxu1 }
0x1016   : > { %8949 = vst [vmem:[#allocation13_spill] sm:$0xff] %v8182_v48  ;;  %v8188_v14 = vadd.f32 %v6911_v13, %v4162_v2  ;;  %v4161_v52 = vadd.f32 %v5501_v8, %v4146_v6  ;;  %v4149_v43 = vadd.f32 %v6558_v16, %v8092_v44  ;;  %v4177_v30 = vsel %vm573_vm0, %v8182_v48, 0.0 }
0x1017   : > { %4178 = vadd.xlane.f32.xlu0 %v4177_v30  ;;  %v4125_v58 = vpop.f32.mrf.mxu1 }
0x1018   : > { %8950 = vst [vmem:[#allocation14_spill] sm:$0xff] %v8188_v14  ;;  %v8194_v7 = vadd.f32 %v6912_v32, %v4161_v52  ;;  %v4164_v35 = vadd.f32 %v5501_v8, %v4149_v43  ;;  %v4148_v34 = vadd.f32 %v4125_v58, %v8096_v20  ;;  %v4186_v39 = vsel %vm573_vm0, %v8188_v14, 0.0 }
0x1019   : > { %4187 = vadd.xlane.f32.xlu1 %v4186_v39  ;;  %v6561_v28 = vpop.f32.mrf.mxu1 }
0x101a   : > { %8951 = vst [vmem:[#allocation15_spill] sm:$0xff] %v8194_v7  ;;  %v8200_v44 = vadd.f32 %v6913_v26, %v4164_v35  ;;  %v4163_v38 = vadd.f32 %v5501_v8, %v4148_v34  ;;  %v4151_v41 = vadd.f32 %v6561_v28, %v8100_v45  ;;  %v4183_v50 = vsel %vm573_vm0, %v8194_v7, 0.0  ;;  %v4324_v28 = vld [vmem:[%s8901_s10 + $0x78] sm:$0xff]  ;;  %v4323_v26 = vld [vmem:[%s8901_s10 + $0x70] sm:$0xff] }
0x101b   : > { %4184 = vadd.xlane.f32.xlu0 %v4183_v50  ;;  %v4135_v4 = vpop.f32.mrf.mxu1  ;;  %4377 = vmatprep.subr.mxu0 %v4324_v28  ;;  %v4320_v50 = vld [vmem:[%s8901_s10 + $0x58] sm:$0xff]  ;;  %v5503_v28 = vld [vmem:[%s8956_s18] ss:$0 sm:$0xff]  ;;  %s5516_s18 = sshll.u32 %s8982_s27, 5 }
0x101c   : > { %8952 = vst [vmem:[#allocation16_spill] sm:$0xff] %v8200_v44  ;;  %v8206_v20 = vadd.f32 %v6914_v40, %v4163_v38  ;;  %v4166_v55 = vadd.f32 %v5501_v8, %v4151_v41  ;;  %v4150_v53 = vadd.f32 %v4135_v4, %v8102_v47  ;;  %v4192_v57 = vsel %vm573_vm0, %v8200_v44, 0.0  ;;  %4378 = vmatpush1.msra.mxu0 %v4323_v26  ;;  %v4322_v38 = vld [vmem:[%s8901_s10 + $0x68] sm:$0xff]  ;;  %v4321_v41 = vld [vmem:[%s8901_s10 + $0x60] sm:$0xff]  ;;  %v4319_v4 = vld [vmem:[%s8901_s10 + $0x50] sm:$0xff] }
0x101d   : > { %4193 = vadd.xlane.f32.xlu1 %v4192_v57  ;;  %4379 = vmatprep.subr.mxu0 %v4322_v38  ;;  %v4318_v40 = vld [vmem:[%s8901_s10 + $0x48] sm:$0xff]  ;;  %v4315_v57 = vld [vmem:[%s8901_s10 + $0x30] sm:$0xff] }
0x101e   : > { %8953 = vst [vmem:[#allocation17_spill] sm:$0xff] %v8206_v20  ;;  %v8212_v37 = vadd.f32 %v6915_v59, %v4166_v55  ;;  %v4165_v17 = vadd.f32 %v5501_v8, %v4150_v53  ;;  %v4189_v45 = vsel %vm573_vm0, %v8206_v20, 0.0  ;;  %4380 = vmatpush1.msra.mxu0 %v4321_v41  ;;  %v4317_v55 = vld [vmem:[%s8901_s10 + $0x40] sm:$0xff]  ;;  %v4316_v53 = vld [vmem:[%s8901_s10 + $0x38] sm:$0xff]  ;;  %v4314_v59 = vld [vmem:[%s8901_s10 + $0x28] sm:$0xff] }
0x101f   : > { %4190 = vadd.xlane.f32.xlu0 %v4189_v45  ;;  %4381 = vmatprep.subr.mxu0 %v4320_v50  ;;  %v4312_v45 = vld [vmem:[%s8901_s10 + $0x18] sm:$0xff] }
0x1020   : > { %8954 = vst [vmem:[#allocation18_spill] sm:$0xff] %v8212_v37  ;;  %v8217_v21 = vadd.f32 %v6916_v19, %v4165_v17  ;;  %v4198_v23 = vsel %vm573_vm0, %v8212_v37, 0.0  ;;  %4382 = vmatpush1.msra.mxu0 %v4319_v4  ;;  %v4313_v17 = vld [vmem:[%s8901_s10 + $0x20] sm:$0xff]  ;;  %v4311_v19 = vld [vmem:[%s8901_s10 + $0x10] sm:$0xff] }
0x1021   : > { %4199 = vadd.xlane.f32.xlu1 %v4198_v23  ;;  %4383 = vmatprep.subr.mxu0 %v4318_v40  ;;  %v4310_v23 = vld [vmem:[%s8901_s10 + $0x8] sm:$0xff] }
0x1022   : > { %8955 = vst [vmem:[#allocation19_spill] sm:$0xff] %v8217_v21  ;;  %v4195_v47 = vsel %vm573_vm0, %v8217_v21, 0.0  ;;  %4384 = vmatpush1.msra.mxu0 %v4317_v55 }
0x1023   : > { %4196 = vadd.xlane.f32.xlu0 %v4195_v47  ;;  %4385 = vmatprep.subr.mxu0 %v4316_v53  ;;  %v4309_v47 = vld [vmem:[%s8901_s10] sm:$0xff] }
0x1024   : > { %4386 = vmatpush1.msra.mxu0 %v4315_v57 }
0x1025   : > { %4387 = vmatprep.subr.mxu0 %v4314_v59 }
0x1026   : > { %4388 = vmatpush1.msra.mxu0 %v4313_v17 }
0x1027   : > { %4389 = vmatprep.subr.mxu0 %v4312_v45 }
0x1028   : > { %4390 = vmatpush1.msra.mxu0 %v4311_v19 }
0x1029   : > { %4391 = vmatprep.subr.mxu0 %v4310_v23 }
0x102a   : > { %4392 = vmatpush1.msra.mxu0 %v4309_v47 }
0x109e   : > { %v4182_v25 = vpop.xlane.xlu1 %4181 }
0x109f   : > { %v4202_v27 = vmul.f32 0.015625, %v4182_v25  ;;  %v7027_v25 = vmov 0.0  }
0x10a0   : > { %v4179_v31 = vpop.xlane.xlu0 %4178  ;;  %4425 = vmatprep.mubr.f32.mxu0 %v7027_v25 }
0x10a1   : > { %v8224_v5 = vsub.f32 %v8178_v24, %v4202_v27  ;;  %v4201_v42 = vmul.f32 0.015625, %v4179_v31 }
0x10a2   : > { %v4188_v54 = vpop.xlane.xlu1 %4187 }
0x10a3   : > { %v8227_v62 = vsub.f32 %v8182_v48, %v4201_v42  ;;  %v4204_v0 = vmul.f32 0.015625, %v4188_v54  ;;  %v4218_v46 = vmul.f32 %v8224_v5, %v8224_v5 }
0x10a4   : > { %v4185_v11 = vpop.xlane.xlu0 %4184 }
0x10a5   : > { %v8232_v12 = vsub.f32 %v8188_v14, %v4204_v0  ;;  %v4203_v33 = vmul.f32 0.015625, %v4185_v11  ;;  %v4228_v15 = vsel %vm573_vm0, %v4218_v46, 0.0  ;;  %v4217_v18 = vmul.f32 %v8227_v62, %v8227_v62 }
0x10a6   : > { %v4194_v60 = vpop.xlane.xlu1 %4193  ;;  %4229 = vadd.xlane.f32.xlu1 %v4228_v15 }
0x10a7   : > { %v8238_v61 = vsub.f32 %v8194_v7, %v4203_v33  ;;  %v4206_v8 = vmul.f32 0.015625, %v4194_v60  ;;  %v4225_v63 = vsel %vm573_vm0, %v4217_v18, 0.0  ;;  %v4220_v9 = vmul.f32 %v8232_v12, %v8232_v12 }
0x10a8   : > { %v4191_v36 = vpop.xlane.xlu0 %4190  ;;  %4226 = vadd.xlane.f32.xlu0 %v4225_v63 }
0x10a9   : > { %v8244_v10 = vsub.f32 %v8200_v44, %v4206_v8  ;;  %v4205_v1 = vmul.f32 0.015625, %v4191_v36  ;;  %v4234_v22 = vsel %vm573_vm0, %v4220_v9, 0.0  ;;  %v4219_v29 = vmul.f32 %v8238_v61, %v8238_v61 }
0x10aa   : > { %4235 = vadd.xlane.f32.xlu1 %v4234_v22  ;;  %v4200_v56 = vpop.xlane.xlu1 %4199 }
0x10ab   : > { %v8250_v51 = vsub.f32 %v8206_v20, %v4205_v1  ;;  %v4208_v49 = vmul.f32 0.015625, %v4200_v56  ;;  %v4231_v2 = vsel %vm573_vm0, %v4219_v29, 0.0  ;;  %v4222_v6 = vmul.f32 %v8244_v10, %v8244_v10 }
0x10ac   : > { %4232 = vadd.xlane.f32.xlu0 %v4231_v2  ;;  %v4197_v3 = vpop.xlane.xlu0 %4196 }
0x10ad   : > { %v8256_v16 = vsub.f32 %v8212_v37, %v4208_v49  ;;  %v4207_v13 = vmul.f32 0.015625, %v4197_v3  ;;  %v4240_v52 = vsel %vm573_vm0, %v4222_v6, 0.0  ;;  %v4221_v43 = vmul.f32 %v8250_v51, %v8250_v51 }
0x10ae   : > { %4241 = vadd.xlane.f32.xlu1 %v4240_v52 }
0x10af   : > { %v8262_v30 = vsub.f32 %v8217_v21, %v4207_v13  ;;  %v4237_v58 = vsel %vm573_vm0, %v4221_v43, 0.0  ;;  %v4224_v32 = vmul.f32 %v8256_v16, %v8256_v16 }
0x10b0   : > { %4238 = vadd.xlane.f32.xlu0 %v4237_v58 }
0x10b1   : > { %v4246_v35 = vsel %vm573_vm0, %v4224_v32, 0.0  ;;  %v4223_v34 = vmul.f32 %v8262_v30, %v8262_v30  ;;  %v5502_v32 = vld [vmem:[%s8899_s8] ss:$0 sm:$0xff] }
0x10b2   : > { %4247 = vadd.xlane.f32.xlu1 %v4246_v35 }
0x10b3   : > { %v4243_v39 = vsel %vm573_vm0, %v4223_v34, 0.0 }
0x10b4   : > { %4244 = vadd.xlane.f32.xlu0 %v4243_v39 }
0x112f   : > { %v4230_v27 = vpop.xlane.xlu1 %4229 }
0x1130   : > { %v4250_v31 = vmul.f32 0.015625, %v4230_v27 }
0x1131   : > { %v4227_v42 = vpop.xlane.xlu0 %4226 }
0x1132   : > { %v4258_v54 = vadd.f32 1e-05, %v4250_v31  ;;  %v4249_v0 = vmul.f32 0.015625, %v4227_v42 }
0x1133   : > { %v4236_v46 = vpop.xlane.xlu1 %4235 }
0x1134   : > { %6829 = vrsqrt.f32 %v4258_v54  ;;  %v4257_v11 = vadd.f32 1e-05, %v4249_v0  ;;  %v4252_v33 = vmul.f32 0.015625, %v4236_v46  ;;  %v4937_v0 = vld [vmem:[%s8957_s12 + $0xf8] sm:$0xff]  ;;  %v4936_v46 = vld [vmem:[%s8957_s12 + $0xf0] sm:$0xff] }
0x1135   : > { %v4233_v15 = vpop.xlane.xlu0 %4232  ;;  %5882 = vmatprep.subr.mxu0 %v4937_v0  ;;  %6562 = vmatprep.subr.mxu1 %v4937_v0 }
0x1136   : > { %6831 = vrsqrt.f32 %v4257_v11  ;;  %v4251_v18 = vmul.f32 0.015625, %v4233_v15  ;;  %v4260_v60 = vadd.f32 1e-05, %v4252_v33  ;;  %v4935_v11 = vld [vmem:[%s8957_s12 + $0xe8] sm:$0xff]  ;;  %v4934_v15 = vld [vmem:[%s8957_s12 + $0xe0] sm:$0xff] }
0x1137   : > { %v4242_v63 = vpop.xlane.xlu1 %4241  ;;  %v4919_v33 = vld [vmem:[%s8957_s12 + $0x68] sm:$0xff] }
0x1138   : > { %v4259_v8 = vadd.f32 1e-05, %v4251_v18  ;;  %v4254_v1 = vmul.f32 0.015625, %v4242_v63  ;;  %v4918_v18 = vld [vmem:[%s8957_s12 + $0x60] sm:$0xff]  ;;  %v4932_v63 = vld [vmem:[%s8957_s12 + $0xd0] sm:$0xff] }
0x1139   : > { %v4239_v9 = vpop.xlane.xlu0 %4238 }
0x113a   : > { %6833 = vrsqrt.f32 %v4259_v8  ;;  %v4253_v36 = vmul.f32 0.015625, %v4239_v9  ;;  %v4262_v56 = vadd.f32 1e-05, %v4254_v1  ;;  %v4917_v8 = vld [vmem:[%s8957_s12 + $0x58] sm:$0xff]  ;;  %v4916_v9 = vld [vmem:[%s8957_s12 + $0x50] sm:$0xff]  ;;  %v4915_v1 = vld [vmem:[%s8957_s12 + $0x48] sm:$0xff] }
0x113b   : > { %6835 = vrsqrt.f32 %v4260_v60  ;;  %v4248_v49 = vpop.xlane.xlu1 %4247  ;;  %v4933_v60 = vld [vmem:[%s8957_s12 + $0xd8] sm:$0xff] }
0x113c   : > { %v4261_v22 = vadd.f32 1e-05, %v4253_v36  ;;  %v4256_v13 = vmul.f32 0.015625, %v4248_v49  ;;  %v4931_v36 = vld [vmem:[%s8957_s12 + $0xc8] sm:$0xff]  ;;  %v4913_v49 = vld [vmem:[%s8957_s12 + $0x38] sm:$0xff] }
0x113d   : > { %v4245_v29 = vpop.xlane.xlu0 %4244 }
0x113e   : > { %6837 = vrsqrt.f32 %v4261_v22  ;;  %v4255_v2 = vmul.f32 0.015625, %v4245_v29  ;;  %v4264_v39 = vadd.f32 1e-05, %v4256_v13  ;;  %v4930_v22 = vld [vmem:[%s8957_s12 + $0xc0] sm:$0xff]  ;;  %v4911_v13 = vld [vmem:[%s8957_s12 + $0x28] sm:$0xff] }
0x113f   : > { %6839 = vrsqrt.f32 %v4262_v56  ;;  %v4914_v29 = vld [vmem:[%s8957_s12 + $0x40] sm:$0xff]  ;;  %v4929_v56 = vld [vmem:[%s8957_s12 + $0xb8] sm:$0xff] }
0x1140   : > { %v4263_v43 = vadd.f32 1e-05, %v4255_v2  ;;  %v4928_v2 = vld [vmem:[%s8957_s12 + $0xb0] sm:$0xff] }
0x1141   : > { %v6830_v6 = vpop.eup %6829 }
0x1142   : > { %v4274_v58 = vmul.f32 %v6830_v6, %v8224_v5  ;;  %6841 = vrsqrt.f32 %v4263_v43  ;;  %v4912_v6 = vld [vmem:[%s8957_s12 + $0x30] sm:$0xff]  ;;  %v4910_v43 = vld [vmem:[%s8957_s12 + $0x20] sm:$0xff] }
0x1143   : > { %v6832_v3 = vpop.eup %6831  ;;  %6843 = vrsqrt.f32 %v4264_v39  ;;  %v4923_v39 = vld [vmem:[%s8957_s12 + $0x88] sm:$0xff] }
0x1144   : > { %v4273_v52 = vmul.f32 %v6832_v3, %v8227_v62  ;;  %v4288_v38 = vmul.f32 %v5502_v32, %v4274_v58  ;;  %v4927_v3 = vld [vmem:[%s8957_s12 + $0xa8] sm:$0xff]  ;;  %v4925_v58 = vld [vmem:[%s8957_s12 + $0x98] sm:$0xff] }
0x1146   : > { %v4287_v35 = vmul.f32 %v5502_v32, %v4273_v52  ;;  %v4302_v5 = vadd.f32 %v5503_v28, %v4288_v38  ;;  %v4926_v52 = vld [vmem:[%s8957_s12 + $0xa0] sm:$0xff] }
0x1147   : > { %v6834_v34 = vpop.eup %6833  ;;  %v4906_v38 = vld [vmem:[%s8957_s12] sm:$0xff] }
0x1148   : > { %v4301_v26 = vadd.f32 %v5503_v28, %v4287_v35  ;;  %v4275_v62 = vmul.f32 %v6834_v34, %v8238_v61  ;;  %v6836_v41 = vpop.eup %6835  ;;  %v4924_v35 = vld [vmem:[%s8957_s12 + $0x90] sm:$0xff] }
0x1149   : > { %v4276_v4 = vmul.f32 %v6836_v41, %v8232_v12  ;;  %v4908_v34 = vld [vmem:[%s8957_s12 + $0x10] sm:$0xff] }
0x114a   : > { %5504 = vmatmul.mubr.msk.f32.vlgmr.msra.gmra.mxu0 %vm573_vm0, %v4301_v26  ;;  %v4289_v50 = vmul.f32 %v5502_v32, %v4275_v62  ;;  %v4922_v26 = vld [vmem:[%s8957_s12 + $0x80] sm:$0xff]  ;;  %v4327_v62 = vlaneseq }
0x114b   : > { %4431 = vmatprep.mubr.f32.mxu0 %v7027_v25  ;;  %v6838_v40 = vpop.eup %6837  ;;  %v4290_v57 = vmul.f32 %v5502_v32, %v4276_v4 }
0x114c   : > { %v4277_v55 = vmul.f32 %v6838_v40, %v8250_v51  ;;  %v4303_v53 = vadd.f32 %v5503_v28, %v4289_v50  ;;  %v6840_v61 = vpop.eup %6839  ;;  %v4328_v41 = vshrl.u32 %v4327_v62, 7  ;;  %v4325_v50 = vld [vmem:[%s8958_s11] sm:$0x3]  ;;  %s5089_s11 = sadd.s32 %s5516_s18, %s5087_s13  ;;  %s8834_s13 = scalar_lea.sflag [#allocation4], %s8988_s17 }
0x114d   : > { %v4278_v59 = vmul.f32 %v6840_v61, %v8244_v10  ;;  %v4304_v17 = vadd.f32 %v5503_v28, %v4290_v57  ;;  %s5517_s26 = sshll.u32 %s5089_s11, 7  ;;  %s6917_s18 = scalar_lea.vmem %s8820_s23, 1024 }
0x114e   : > { %5505 = vmatmul.mubr.msk.f32.gmra.mxu0 %vm573_vm0, %v4302_v5  ;;  %v4291_v45 = vmul.f32 %v5502_v32, %v4277_v55  ;;  %v4329_v5 = vsub.s32 0, %v4328_v41  ;;  %v4333_v4 = vsub.s32 1, %v4328_v41  ;;  %s8828_s27 = scalar_lea.hbm %s8987_s28, %s5517_s26  ;;  %p6918_p2 = scmp.ne.s32.totalorder %s8820_s23, %s6917_s18 }
0x114f   : > { %4437 = vmatprep.mubr.f32.mxu0 %v7027_v25  ;;  %v6842_v19 = vpop.eup %6841  ;;  %v4292_v51 = vmul.f32 %v5502_v32, %v4278_v59  ;;  %s7028_s11 = smov [#allocation3]  }
0x1150   : > { %v4279_v12 = vmul.f32 %v6842_v19, %v8262_v30  ;;  %v4305_v23 = vadd.f32 %v5503_v28, %v4291_v45  ;;  %v6844_v47 = vpop.eup %6843  ;;  %v8448_v40 = vrot.slane %v4325_v50, %v4329_v5  ;;  %v8450_v55 = vrot.slane %v4325_v50, %v4333_v4  ;;  %p6919_p3 = pnand %p6918_p2, %p7175_p6  ;;  %s6921_s1 = sshll.u32 %s7028_s11, 4  ;;  %s6922_s1 = int_to_ptr.vmem [resolvable:$false] %s6921_s1 }
0x1151   : > { %v4280_v27 = vmul.f32 %v6844_v47, %v8256_v16  ;;  %v4306_v31 = vadd.f32 %v5503_v28, %v4292_v51  ;;  %v4921_v16 = vld [vmem:[%s8957_s12 + $0x78] sm:$0xff]  ;;  %s6923_s2 = scalar_lea.vmem %s6922_s1, 2048  ;;  %p6924_p5 = scmp.lt.s32.totalorder %s8820_s23, %s6922_s1 }
0x1152   : > { %5506 = vmatmul.mubr.msk.f32.gmra.mxu0 %vm573_vm0, %v4303_v53  ;;  %v4293_v10 = vmul.f32 %v5502_v32, %v4279_v12  ;;  %6578 = vmatpush3.msra.mxu1 %v4921_v16  ;;  %p6920_p4 = pneg %p6919_p3  ;;  %p6925_p7 = scmp.lt.s32.totalorder %s6923_s2, %s6917_s18 }
0x1153   : > { %4443 = vmatprep.mubr.f32.mxu0 %v7027_v25  ;;  %v4294_v54 = vmul.f32 %v5502_v32, %v4280_v27  ;;  %5883 = vmatpush3.msra.mxu0 %v4921_v16  ;;  %v4909_v32 = vld [vmem:[%s8957_s12 + $0x18] sm:$0xff] }
0x1154   : > { %v4307_v42 = vadd.f32 %v5503_v28, %v4293_v10  ;;  %5884 = vmatprep.subr.mxu0 %v4936_v46  ;;  %6563 = vmatprep.subr.mxu1 %v4936_v46  ;;  %p6926_p8 = por %p6925_p7, %p6924_p5 }
0x1155   : > { %v4308_v30 = vadd.f32 %v5503_v28, %v4294_v54  ;;  %v4907_v28 = vld [vmem:[%s8957_s12 + $0x8] sm:$0xff] }
0x1156   : > { %5507 = vmatmul.mubr.msk.f32.gmra.mxu0 %vm573_vm0, %v4304_v17  ;;  %p6927_p9 = pnand %p6926_p8, %p6920_p4 }
0x1157   : > { %4449 = vmatprep.mubr.f32.mxu0 %v7027_v25 }
0x115a   : > { %5508 = vmatmul.mubr.msk.f32.gmra.mxu0 %vm573_vm0, %v4305_v23 }
0x115b   : > { %4455 = vmatprep.mubr.f32.mxu0 %v7027_v25 }
0x115e   : > { %5509 = vmatmul.mubr.msk.f32.gmra.mxu0 %vm573_vm0, %v4306_v31 }
0x115f   : > { %4461 = vmatprep.mubr.f32.mxu0 %v7027_v25 }
0x1162   : > { %5510 = vmatmul.mubr.msk.f32.gmra.mxu0 %vm573_vm0, %v4307_v42 }
0x1163   : > { %4467 = vmatprep.mubr.f32.mxu0 %v7027_v25  ;;  %v4920_v25 = vld [vmem:[%s8957_s12 + $0x70] sm:$0xff] }
0x1164   : > { %5885 = vmatpush3.msra.mxu0 %v4920_v25  ;;  %6579 = vmatpush3.msra.mxu1 %v4920_v25 }
0x1165   : > { %5886 = vmatprep.subr.mxu0 %v4935_v11  ;;  %6564 = vmatprep.subr.mxu1 %v4935_v11 }
0x1166   : > { %5511 = vmatmul.mubr.msk.f32.gmra.mxu0 %vm573_vm0, %v4308_v30  ;;  %6580 = vmatpush3.msra.mxu1 %v4919_v33 }
0x1167   : > { %5887 = vmatpush3.msra.mxu0 %v4919_v33  ;;  %6565 = vmatprep.subr.mxu1 %v4934_v15 }
0x1168   : > { %5888 = vmatprep.subr.mxu0 %v4934_v15  ;;  %6581 = vmatpush3.msra.mxu1 %v4918_v18 }
0x1169   : > { %5889 = vmatpush3.msra.mxu0 %v4918_v18  ;;  %6566 = vmatprep.subr.mxu1 %v4933_v60 }
0x116a   : > { %5890 = vmatprep.subr.mxu0 %v4933_v60  ;;  %6582 = vmatpush3.msra.mxu1 %v4917_v8 }
0x116b   : > { %5891 = vmatpush3.msra.mxu0 %v4917_v8  ;;  %6567 = vmatprep.subr.mxu1 %v4932_v63 }
0x116c   : > { %5892 = vmatprep.subr.mxu0 %v4932_v63  ;;  %6583 = vmatpush3.msra.mxu1 %v4916_v9 }
0x116d   : > { %5893 = vmatpush3.msra.mxu0 %v4916_v9  ;;  %6568 = vmatprep.subr.mxu1 %v4931_v36 }
0x116e   : > { %5894 = vmatprep.subr.mxu0 %v4931_v36  ;;  %6584 = vmatpush3.msra.mxu1 %v4915_v1 }
0x116f   : > { %5895 = vmatpush3.msra.mxu0 %v4915_v1  ;;  %6569 = vmatprep.subr.mxu1 %v4930_v22 }
0x1170   : > { %5896 = vmatprep.subr.mxu0 %v4930_v22  ;;  %6585 = vmatpush3.msra.mxu1 %v4914_v29 }
0x1171   : > { %5897 = vmatpush3.msra.mxu0 %v4914_v29  ;;  %6570 = vmatprep.subr.mxu1 %v4929_v56 }
0x1172   : > { %5898 = vmatprep.subr.mxu0 %v4929_v56  ;;  %6586 = vmatpush3.msra.mxu1 %v4913_v49 }
0x1173   : > { %5899 = vmatpush3.msra.mxu0 %v4913_v49  ;;  %6571 = vmatprep.subr.mxu1 %v4928_v2 }
0x1174   : > { %5900 = vmatprep.subr.mxu0 %v4928_v2  ;;  %6587 = vmatpush3.msra.mxu1 %v4912_v6 }
0x1175   : > { %5901 = vmatpush3.msra.mxu0 %v4912_v6  ;;  %6572 = vmatprep.subr.mxu1 %v4927_v3 }
0x1176   : > { %5902 = vmatprep.subr.mxu0 %v4927_v3  ;;  %6588 = vmatpush3.msra.mxu1 %v4911_v13 }
0x1177   : > { %5903 = vmatpush3.msra.mxu0 %v4911_v13  ;;  %6573 = vmatprep.subr.mxu1 %v4926_v52 }
0x1178   : > { %5904 = vmatprep.subr.mxu0 %v4926_v52  ;;  %6589 = vmatpush3.msra.mxu1 %v4910_v43 }
0x1179   : > { %5905 = vmatpush3.msra.mxu0 %v4910_v43  ;;  %6574 = vmatprep.subr.mxu1 %v4925_v58 }
0x117a   : > { %5906 = vmatprep.subr.mxu0 %v4925_v58  ;;  %6590 = vmatpush3.msra.mxu1 %v4909_v32 }
0x117b   : > { %5907 = vmatpush3.msra.mxu0 %v4909_v32  ;;  %6575 = vmatprep.subr.mxu1 %v4924_v35 }
0x117c   : > { %5908 = vmatprep.subr.mxu0 %v4924_v35  ;;  %6591 = vmatpush3.msra.mxu1 %v4908_v34 }
0x117d   : > { %5909 = vmatpush3.msra.mxu0 %v4908_v34  ;;  %6576 = vmatprep.subr.mxu1 %v4923_v39 }
0x117e   : > { %5910 = vmatprep.subr.mxu0 %v4923_v39  ;;  %6592 = vmatpush3.msra.mxu1 %v4907_v28 }
0x117f   : > { %5911 = vmatpush3.msra.mxu0 %v4907_v28  ;;  %6577 = vmatprep.subr.mxu1 %v4922_v26 }
0x1180   : > { %5912 = vmatprep.subr.mxu0 %v4922_v26  ;;  %6593 = vmatpush3.msra.mxu1 %v4906_v38 }
0x1181   : > { %5913 = vmatpush3.msra.mxu0 %v4906_v38 }
0x120a   : > { %v4427_v53 = vpop.f32.mrf.mxu0 }
0x120b   : > { %v4428_v57 = vadd.f32 %v4427_v53, %v8448_v40 }
0x120c   : > { %v4429_v61 = vpop.f32.mrf.mxu0 }
0x120d   : > { %v8453_v59 = vmul.f32 0.70710677, %v4428_v57  ;;  %v4430_v17 = vadd.f32 %v4429_v61, %v8450_v55  ;;  %v8488_v28 = vmul.f32 0.5, %v4428_v57 }
0x120e   : > { %v4433_v45 = vpop.f32.mrf.mxu0 }
0x120f   : > { %v4506_v19 = vand.u32 2147483647, %v8453_v59  ;;  %v8457_v12 = vmul.f32 0.70710677, %v4430_v17  ;;  %v4434_v23 = vadd.f32 %v4433_v45, %v8448_v40  ;;  %v8490_v62 = vmul.f32 0.5, %v4430_v17 }
0x1210   : > { %v4435_v51 = vpop.f32.mrf.mxu0  ;;  %vm4826_vm2 = vcmp.ge.f32.partialorder %v8453_v59, 0.0 }
0x1211   : > { %v4522_v47 = vmul.f32 0.3275911, %v4506_v19  ;;  %v8460_v27 = vmul.f32 0.70710677, %v4434_v23  ;;  %v4436_v42 = vadd.f32 %v4435_v51, %v8450_v55  ;;  %v4507_v54 = vand.u32 2147483647, %v8457_v12 }
0x1212   : > { %v4439_v31 = vpop.f32.mrf.mxu0  ;;  %v4730_v16 = vsub.f32 0.0, %v4506_v19  ;;  %v8502_v51 = vmul.f32 0.5, %v4434_v23  ;;  %vm4827_vm5 = vcmp.ge.f32.partialorder %v8457_v12, 0.0 }
0x1213   : > { %v4538_v10 = vadd.f32 1.0, %v4522_v47  ;;  %v4508_v30 = vand.u32 2147483647, %v8460_v27  ;;  %v8465_v11 = vmul.f32 0.70710677, %v4436_v42  ;;  %v4440_v33 = vadd.f32 %v4439_v31, %v8448_v40 }
0x1214   : > { %v4441_v0 = vpop.f32.mrf.mxu0  ;;  %v4731_v18 = vsub.f32 0.0, %v4507_v54  ;;  %v4746_v8 = vmul.f32 %v4730_v16, %v4506_v19  ;;  %v4523_v36 = vmul.f32 0.3275911, %v4507_v54  ;;  %v8504_v47 = vmul.f32 0.5, %v4436_v42 }
0x1215   : > { %6845 = vrcp.f32 %v4538_v10  ;;  %v4524_v46 = vmul.f32 0.3275911, %v4508_v30  ;;  %v8469_v15 = vadd.f32 %v4441_v0, %v8450_v55  ;;  %v8471_v63 = vmul.f32 0.70710677, %v4440_v33 }
0x1216   : > { %v4445_v25 = vpop.f32.mrf.mxu0  ;;  %v4732_v1 = vsub.f32 0.0, %v4508_v30  ;;  %v4509_v22 = vand.u32 2147483647, %v8465_v11  ;;  %v4747_v49 = vmul.f32 %v4731_v18, %v4507_v54  ;;  %v4762_v6 = vmul.f32 1.442695, %v4746_v8 }
0x1217   : > { %v4540_v60 = vadd.f32 1.0, %v4524_v46  ;;  %v4510_v29 = vand.u32 2147483647, %v8471_v63  ;;  %v8476_v56 = vmul.f32 0.70710677, %v8469_v15  ;;  %v8479_v2 = vadd.f32 %v4445_v25, %v8448_v40 }
0x1218   : > { %v4447_v9 = vpop.f32.mrf.mxu0  ;;  %v4748_v52 = vmul.f32 %v4732_v1, %v4508_v30  ;;  %v4539_v35 = vadd.f32 1.0, %v4523_v36  ;;  %v4733_v34 = vsub.f32 0.0, %v4509_v22  ;;  %v4764_v26 = vmul.f32 1.442695, %v4747_v49 }
0x1219   : > { %6847 = vrcp.f32 %v4540_v60  ;;  %v4526_v3 = vmul.f32 0.3275911, %v4510_v29  ;;  %v4511_v43 = vand.u32 2147483647, %v8476_v56  ;;  %v8483_v58 = vmul.f32 0.70710677, %v8479_v2 }
0x121a   : > { %v4451_v13 = vpop.f32.mrf.mxu0  ;;  %v8486_v32 = vadd.f32 %v4447_v9, %v8450_v55  ;;  %v4734_v38 = vsub.f32 0.0, %v4510_v29  ;;  %v4766_v53 = vmul.f32 1.442695, %v4748_v52  ;;  %v4525_v61 = vmul.f32 0.3275911, %v4509_v22 }
0x121b   : > { %v4542_v39 = vadd.f32 1.0, %v4526_v3  ;;  %v4735_v41 = vsub.f32 0.0, %v4511_v43  ;;  %v4512_v5 = vand.u32 2147483647, %v8483_v58  ;;  %v4749_v19 = vmul.f32 %v4733_v34, %v4509_v22 }
0x121c   : > { %v4453_v50 = vpop.f32.mrf.mxu0  ;;  %v8496_v45 = vmul.f32 0.70710677, %v8486_v32  ;;  %v8500_v17 = vadd.f32 %v4451_v13, %v8448_v40  ;;  %v4750_v31 = vmul.f32 %v4734_v38, %v4510_v29  ;;  %v4527_v54 = vmul.f32 0.3275911, %v4511_v43 }
0x121d   : > { %6849 = vrcp.f32 %v4542_v39  ;;  %v4751_v30 = vmul.f32 %v4735_v41, %v4511_v43  ;;  %v4736_v0 = vsub.f32 0.0, %v4512_v5  ;;  %v4541_v46 = vadd.f32 1.0, %v4525_v61 }
0x121e   : > { %6851 = vpow2.f32 %v4762_v6  ;;  %v4457_v16 = vpop.f32.mrf.mxu0  ;;  %v8506_v25 = vmul.f32 0.5, %v4440_v33  ;;  %v4513_v18 = vand.u32 2147483647, %v8496_v45  ;;  %v4768_v23 = vmul.f32 1.442695, %v4749_v19 }
0x121f   : > { %6853 = vrcp.f32 %v4539_v35  ;;  %v8513_v42 = vmul.f32 0.70710677, %v8500_v17  ;;  %v8516_v9 = vadd.f32 %v4453_v50, %v8450_v55  ;;  %v4770_v1 = vmul.f32 1.442695, %v4750_v31 }
0x1220   : > { %6855 = vpow2.f32 %v4764_v26  ;;  %v4528_v22 = vmul.f32 0.3275911, %v4512_v5  ;;  %v8520_v33 = vadd.f32 %v4457_v16, %v8448_v40  ;;  %v4543_v49 = vadd.f32 1.0, %v4527_v54  ;;  %v4459_v61 = vpop.f32.mrf.mxu0 }
0x1221   : > { %6857 = vpow2.f32 %v4766_v53  ;;  %v4772_v6 = vmul.f32 1.442695, %v4751_v30  ;;  %v4752_v3 = vmul.f32 %v4736_v0, %v4512_v5  ;;  %v4529_v52 = vmul.f32 0.3275911, %v4513_v18 }
0x1222   : > { %v8493_v4 = vpop.eup %6845  ;;  %6859 = vrcp.f32 %v4541_v46  ;;  %v4737_v43 = vsub.f32 0.0, %v4513_v18  ;;  %v4514_v34 = vand.u32 2147483647, %v8513_v42  ;;  %v8525_v39 = vmul.f32 0.70710677, %v8516_v9 }
0x1223   : > { %v4586_v57 = vmul.f32 1.0614054, %v8493_v4  ;;  %6861 = vpow2.f32 %v4768_v23  ;;  %v4544_v38 = vadd.f32 1.0, %v4528_v22  ;;  %v8529_v41 = vmul.f32 0.70710677, %v8520_v33 }
0x1224   : > { %6863 = vpow2.f32 %v4770_v1  ;;  %v8532_v50 = vmul.f32 0.5, %v8469_v15  ;;  %v4774_v53 = vmul.f32 1.442695, %v4752_v3  ;;  %v4545_v31 = vadd.f32 1.0, %v4529_v52 }
0x1225   : > { %v4602_v10 = vadd.f32 -1.4531521, %v4586_v57  ;;  %6865 = vrcp.f32 %v4543_v49  ;;  %v4738_v16 = vsub.f32 0.0, %v4514_v34  ;;  %v4515_v46 = vand.u32 2147483647, %v8525_v39 }
0x1226   : > { %v8509_v60 = vpop.eup %6847  ;;  %6867 = vpow2.f32 %v4772_v6  ;;  %v4516_v23 = vand.u32 2147483647, %v8529_v41  ;;  %v8549_v6 = vmul.f32 0.5, %v8479_v2  ;;  %vm4828_vm3 = vcmp.ge.f32.partialorder %v8460_v27, 0.0 }
0x1227   : > { %v4618_v8 = vmul.f32 %v8493_v4, %v4602_v10  ;;  %v4588_v36 = vmul.f32 1.0614054, %v8509_v60  ;;  %v4753_v10 = vmul.f32 %v4737_v43, %v4513_v18  ;;  %6869 = vrcp.f32 %v4544_v38 }
0x1228   : > { %6871 = vpow2.f32 %v4774_v53  ;;  %v4739_v38 = vsub.f32 0.0, %v4515_v46  ;;  %vm4830_vm4 = vcmp.ge.f32.partialorder %v8471_v63, 0.0  ;;  %vm4829_vm6 = vcmp.ge.f32.partialorder %v8465_v11, 0.0 }
0x1229   : > { %v4634_v29 = vadd.f32 1.4214138, %v4618_v8  ;;  %v4604_v13 = vadd.f32 -1.4531521, %v4588_v36  ;;  %v8544_v36 = vadd.f32 %v4459_v61, %v8450_v55  ;;  %6873 = vrcp.f32 %v4545_v31 }
0x122a   : > { %v8534_v57 = vpop.eup %6849  ;;  %v4776_v3 = vmul.f32 1.442695, %v4753_v10  ;;  %v4531_v61 = vmul.f32 0.3275911, %v4515_v46  ;;  %vm4831_vm7 = vcmp.ge.f32.partialorder %v8476_v56, 0.0  ;;  %vm4833_vm8 = vcmp.ge.f32.partialorder %v8496_v45, 0.0 }
0x122b   : > { %v4650_v35 = vmul.f32 %v8493_v4, %v4634_v29  ;;  %v4620_v26 = vmul.f32 %v8509_v60, %v4604_v13  ;;  %v6852_v54 = vpop.eup %6851  ;;  %v4590_v0 = vmul.f32 1.0614054, %v8534_v57  ;;  %v4530_v29 = vmul.f32 0.3275911, %v4514_v34  ;;  %v4463_v13 = vpop.f32.mrf.mxu0 }
0x122c   : > { %v8539_v8 = vpop.eup %6853  ;;  %v8555_v53 = vmul.f32 0.70710677, %v8544_v36  ;;  %v8560_v10 = vadd.f32 %v4463_v13, %v8448_v40  ;;  %6875 = vpow2.f32 %v4776_v3  ;;  %v4547_v13 = vadd.f32 1.0, %v4531_v61 }
0x122d   : > { %v4666_v5 = vadd.f32 -0.28449672, %v4650_v35  ;;  %v4636_v19 = vadd.f32 1.4214138, %v4620_v26  ;;  %v8546_v1 = vpop.eup %6855  ;;  %v4606_v22 = vadd.f32 -1.4531521, %v4590_v0  ;;  %v4754_v26 = vmul.f32 %v4738_v16, %v4514_v34  ;;  %v4465_v16 = vpop.f32.mrf.mxu0 }
0x122e   : > { %v6858_v52 = vpop.eup %6857  ;;  %v4546_v31 = vadd.f32 1.0, %v4530_v29  ;;  %8959 = vst [vmem:[#allocation20_spill] sm:$0xff] %v8560_v10  ;;  %v4517_v34 = vand.u32 2147483647, %v8555_v53  ;;  %v4587_v59 = vmul.f32 1.0614054, %v8539_v8 }
0x122f   : > { %v4682_v30 = vmul.f32 %v8493_v4, %v4666_v5  ;;  %v4652_v15 = vmul.f32 %v8509_v60, %v4636_v19  ;;  %v4622_v35 = vmul.f32 %v8534_v57, %v4606_v22  ;;  %v4740_v19 = vsub.f32 0.0, %v4516_v23 }
0x1230   : > { %v4778_v22 = vmul.f32 1.442695, %v4754_v26  ;;  %v8577_v26 = vadd.f32 %v4465_v16, %v8450_v55  ;;  %6877 = vrcp.f32 %v4546_v31  ;;  %vm4832_vm9 = vcmp.ge.f32.partialorder %v8483_v58, 0.0 }
0x1231   : > { %v4698_v18 = vadd.f32 0.2548296, %v4682_v30  ;;  %v4668_v49 = vadd.f32 -0.28449672, %v4652_v15  ;;  %v4638_v2 = vadd.f32 1.4214138, %v4622_v35  ;;  %v8563_v15 = vpop.eup %6859  ;;  %v4756_v35 = vmul.f32 %v4740_v19, %v4516_v23 }
0x1232   : > { %8961 = vst [vmem:[#allocation22_spill] sm:$0xff] %v8577_v26  ;;  %6879 = vpow2.f32 %v4778_v22  ;;  %v4533_v19 = vmul.f32 0.3275911, %v4517_v34  ;;  %v8590_v31 = vmul.f32 0.70710677, %v8577_v26  ;;  %vm4834_vm10 = vcmp.ge.f32.partialorder %v8513_v42, 0.0 }
0x1233   : > { %v4714_v43 = vmul.f32 %v8493_v4, %v4698_v18  ;;  %v4684_v5 = vmul.f32 %v8509_v60, %v4668_v49  ;;  %v4532_v4 = vmul.f32 0.3275911, %v4516_v23  ;;  %v4654_v18 = vmul.f32 %v8534_v57, %v4638_v2 }
0x1234   : > { %v4755_v49 = vmul.f32 %v4739_v38, %v4515_v46  ;;  %v4741_v2 = vsub.f32 0.0, %v4517_v34  ;;  %6881 = vrcp.f32 %v4547_v13  ;;  %v4782_v16 = vmul.f32 1.442695, %v4756_v35  ;;  %8962 = vst [vmem:[#allocation23_spill] sm:$0xff] %v8590_v31 }
0x1235   : > { %v8557_v30 = vmul.f32 %v6852_v54, %v4714_v43  ;;  %v4700_v0 = vadd.f32 0.2548296, %v4684_v5  ;;  %v8567_v54 = vmul.f32 0.70710677, %v8560_v10  ;;  %v8569_v43 = vpop.eup %6861  ;;  %v4670_v37 = vadd.f32 -0.28449672, %v4654_v18  ;;  %v4469_v18 = vpop.f32.mrf.mxu0 }
0x1236   : > { %v6864_v5 = vpop.eup %6863  ;;  %v4780_v61 = vmul.f32 1.442695, %v4755_v49  ;;  %v4519_v13 = vand.u32 2147483647, %v8590_v31  ;;  %vm4835_vm11 = vcmp.ge.f32.partialorder %v8525_v39, 0.0  ;;  %vm4837_vm12 = vcmp.ge.f32.partialorder %v8555_v53, 0.0 }
0x1237   : > { %8960 = vst [vmem:[#allocation21_spill] sm:$0xff] %v8567_v54  ;;  %v4810_v29 = vsub.f32 1.0, %v8557_v30  ;;  %v4716_v3 = vmul.f32 %v8509_v60, %v4700_v0  ;;  %v4518_v46 = vand.u32 2147483647, %v8567_v54  ;;  %v8579_v38 = vpop.eup %6865  ;;  %v8582_v30 = vmul.f32 0.5, %v8486_v32  ;;  %v4471_v35 = vpop.f32.mrf.mxu0 }
0x1238   : > { %v4548_v60 = vadd.f32 1.0, %v4532_v4  ;;  %v8584_v0 = vpop.eup %6867  ;;  %v4686_v23 = vmul.f32 %v8534_v57, %v4670_v37  ;;  %v4757_v32 = vmul.f32 %v4741_v2, %v4517_v34  ;;  %v8596_v37 = vmul.f32 0.5, %v8500_v17 }
0x1239   : > { %v4796_v21 = vmul.f32 %v6858_v52, %v4716_v3  ;;  %v4742_v20 = vsub.f32 0.0, %v4518_v46  ;;  %v8587_v14 = vpop.eup %6869  ;;  %v4842_v52 = vsub.f32 0.0, %v4810_v29  ;;  %v4549_v34 = vadd.f32 1.0, %v4533_v19 }
0x123a   : > { %v4702_v3 = vadd.f32 0.2548296, %v4686_v23  ;;  %v8592_v4 = vpop.eup %6871  ;;  %6883 = vrcp.f32 %v4548_v60  ;;  %v4534_v2 = vmul.f32 0.3275911, %v4518_v46  ;;  %vm4836_vm13 = vcmp.ge.f32.partialorder %v8529_v41, 0.0 }
0x123b   : > { %v4812_v44 = vsub.f32 1.0, %v4796_v21  ;;  %v8599_v21 = vadd.f32 %v4469_v18, %v8448_v40  ;;  %v8601_v22 = vpop.eup %6873  ;;  %6885 = vpow2.f32 %v4780_v61  ;;  %v4758_v23 = vmul.f32 %v4742_v20, %v4518_v46 }
0x123c   : > { %v4718_v49 = vmul.f32 %v8534_v57, %v4702_v3  ;;  %6887 = vpow2.f32 %v4782_v16  ;;  %v4858_v17 = vsel %vm4826_vm2, %v4810_v29, %v4842_v52  ;;  %v4784_v18 = vmul.f32 1.442695, %v4757_v32  ;;  %v8616_v16 = vpop.eup %6875 }
0x123d   : > { %v4844_v7 = vsub.f32 0.0, %v4812_v44  ;;  %8963 = vst [vmem:[#allocation24_spill] sm:$0xff] %v8599_v21  ;;  %v8606_v24 = vmul.f32 0.70710677, %v8599_v21  ;;  %v4535_v57 = vmul.f32 0.3275911, %v4519_v13  ;;  %v8614_v3 = vadd.f32 %v4471_v35, %v8450_v55 }
0x123e   : > { %v4798_v60 = vmul.f32 %v6864_v5, %v4718_v49  ;;  %v4743_v61 = vsub.f32 0.0, %v4519_v13  ;;  %v8619_v46 = vmul.f32 0.5, %v8516_v9  ;;  %6889 = vrcp.f32 %v4549_v34  ;;  %v8626_v9 = vpop.eup %6877 }
0x123f   : > { %8964 = vst [vmem:[#allocation25_spill] sm:$0xff] %v8606_v24  ;;  %v4860_v40 = vsel %vm4828_vm3, %v4812_v44, %v4844_v7  ;;  %v4520_v19 = vand.u32 2147483647, %v8606_v24  ;;  %8965 = vst [vmem:[#allocation26_spill] sm:$0xff] %v8614_v3  ;;  %v4874_v27 = vadd.f32 1.0, %v4858_v17  ;;  %v4550_v7 = vadd.f32 1.0, %v4534_v2 }
0x1240   : > { %v4814_v20 = vsub.f32 1.0, %v4798_v60  ;;  %v4786_v44 = vmul.f32 1.442695, %v4758_v23  ;;  %v4876_v5 = vadd.f32 1.0, %v4860_v40  ;;  %v8623_v32 = vmul.f32 0.70710677, %v8614_v3  ;;  %v8632_v40 = vpop.eup %6879 }
0x1241   : > { %v4536_v29 = vmul.f32 0.3275911, %v4520_v19  ;;  %v4603_v55 = vadd.f32 -1.4531521, %v4587_v59  ;;  %6891 = vpow2.f32 %v4784_v18  ;;  %v4551_v49 = vadd.f32 1.0, %v4535_v57  ;;  %v8637_v57 = vpop.eup %6881 }
0x1242   : > { %v4846_v52 = vsub.f32 0.0, %v4814_v20  ;;  %8966 = vst [vmem:[#allocation27_spill] sm:$0xff] %v8623_v32  ;;  %v4759_v35 = vmul.f32 %v4743_v61, %v4519_v13  ;;  %v4589_v60 = vmul.f32 1.0614054, %v8563_v15  ;;  %v4744_v17 = vsub.f32 0.0, %v4520_v19 }
0x1243   : > { %v4521_v2 = vand.u32 2147483647, %v8623_v32  ;;  %v4619_v23 = vmul.f32 %v8539_v8, %v4603_v55  ;;  %v8635_v48 = vmul.f32 %v4874_v27, %v8488_v28  ;;  %6893 = vrcp.f32 %v4550_v7 }
0x1244   : > { %v4862_v34 = vsel %vm4830_vm4, %v4814_v20, %v4846_v52  ;;  %v4552_v18 = vadd.f32 1.0, %v4536_v29  ;;  %v4605_v13 = vadd.f32 -1.4531521, %v4589_v60  ;;  %v8640_v61 = vmul.f32 %v4876_v5, %v8502_v51 }
0x1245   : > { %v4878_v63 = vadd.f32 1.0, %v4862_v34  ;;  %6895 = vpow2.f32 %v4786_v44  ;;  %v4635_v20 = vadd.f32 1.4214138, %v4619_v23  ;;  %v8642_v59 = vmul.f32 1.442695, %v4759_v35 }
0x1246   : > { %6897 = vrcp.f32 %v4551_v49  ;;  %v4621_v52 = vmul.f32 %v8563_v15, %v4605_v13  ;;  %v4591_v55 = vmul.f32 1.0614054, %v8579_v38  ;;  %v8648_v27 = vmul.f32 %v4744_v17, %v4520_v19 }
0x1247   : > { %v8646_v28 = vpop.eup %6883  ;;  %v4537_v7 = vmul.f32 0.3275911, %v4521_v2  ;;  %v4651_v29 = vmul.f32 %v8539_v8, %v4635_v20  ;;  %v4593_v51 = vmul.f32 1.0614054, %v8601_v22  ;;  %6899 = vrcp.f32 %v4552_v18 }
0x1248   : > { %v8652_v5 = vpop.eup %6885  ;;  %v4637_v44 = vadd.f32 1.4214138, %v4621_v52  ;;  %v4607_v49 = vadd.f32 -1.4531521, %v4591_v55  ;;  %v4592_v35 = vmul.f32 1.0614054, %v8587_v14  ;;  %v8658_v34 = vmul.f32 %v4878_v63, %v8506_v25 }
0x1249   : > { %v8655_v60 = vpop.eup %6887  ;;  %v4745_v23 = vsub.f32 0.0, %v4521_v2  ;;  %v4667_v19 = vadd.f32 -0.28449672, %v4651_v29  ;;  %v4609_v17 = vadd.f32 -1.4531521, %v4593_v51  ;;  %v4553_v18 = vadd.f32 1.0, %v4537_v7 }
0x124a   : > { %v4653_v13 = vmul.f32 %v8563_v15, %v4637_v44  ;;  %v4623_v20 = vmul.f32 %v8579_v38, %v4607_v49  ;;  %v4608_v21 = vadd.f32 -1.4531521, %v4592_v35  ;;  %v4595_v24 = vmul.f32 1.0614054, %v8637_v57 }
0x124b   : > { %v4683_v52 = vmul.f32 %v8539_v8, %v4667_v19  ;;  %v4625_v55 = vmul.f32 %v8601_v22, %v4609_v17  ;;  %v4594_v3 = vmul.f32 1.0614054, %v8626_v9  ;;  %v8666_v10 = vpop.eup %6889  ;;  %v8669_v44 = vmul.f32 %v4745_v23, %v4521_v2 }
0x124c   : > { %v4669_v25 = vadd.f32 -0.28449672, %v4653_v13  ;;  %v4639_v63 = vadd.f32 1.4214138, %v4623_v20  ;;  %v4624_v29 = vmul.f32 %v8587_v14, %v4608_v21  ;;  %v4611_v51 = vadd.f32 -1.4531521, %v4595_v24 }
0x124d   : > { %v4699_v49 = vadd.f32 0.2548296, %v4683_v52  ;;  %v4641_v35 = vadd.f32 1.4214138, %v4625_v55  ;;  %v4610_v32 = vadd.f32 -1.4531521, %v4594_v3  ;;  %6901 = vrcp.f32 %v4553_v18 }
0x124e   : > { %v4685_v7 = vmul.f32 %v8563_v15, %v4669_v25  ;;  %v4655_v19 = vmul.f32 %v8579_v38, %v4639_v63  ;;  %v4640_v17 = vadd.f32 1.4214138, %v4624_v29  ;;  %v4627_v26 = vmul.f32 %v8637_v57, %v4611_v51  ;;  %v8675_v31 = vpop.eup %6891 }
0x124f   : > { %v4715_v13 = vmul.f32 %v8539_v8, %v4699_v49  ;;  %v4657_v24 = vmul.f32 %v8601_v22, %v4641_v35  ;;  %v4626_v21 = vmul.f32 %v8626_v9, %v4610_v32  ;;  %v4597_v2 = vmul.f32 1.0614054, %v8666_v10 }
0x1250   : > { %v4701_v3 = vadd.f32 0.2548296, %v4685_v7  ;;  %v4671_v23 = vadd.f32 -0.28449672, %v4655_v19  ;;  %v4656_v20 = vmul.f32 %v8587_v14, %v4640_v17  ;;  %v4643_v52 = vadd.f32 1.4214138, %v4627_v26  ;;  %v8682_v55 = vpop.eup %6893 }
0x1251   : > { %v4795_v25 = vmul.f32 %v8546_v1, %v4715_v13  ;;  %v4673_v63 = vadd.f32 -0.28449672, %v4657_v24  ;;  %v4642_v29 = vadd.f32 1.4214138, %v4626_v21  ;;  %v4613_v8 = vadd.f32 -1.4531521, %v4597_v2 }
0x1252   : > { %v8686_v51 = vpop.eup %6895  ;;  %v4717_v32 = vmul.f32 %v8563_v15, %v4701_v3  ;;  %v4687_v49 = vmul.f32 %v8579_v38, %v4671_v23  ;;  %v4672_v35 = vadd.f32 -0.28449672, %v4656_v20  ;;  %v4659_v7 = vmul.f32 %v8637_v57, %v4643_v52 }
0x1253   : > { %v8691_v19 = vpop.eup %6897  ;;  %v4811_v26 = vsub.f32 1.0, %v4795_v25  ;;  %v4689_v17 = vmul.f32 %v8601_v22, %v4673_v63  ;;  %v4658_v54 = vmul.f32 %v8626_v9, %v4642_v29  ;;  %v4629_v1 = vmul.f32 %v8666_v10, %v4613_v8 }
0x1254   : > { %v4797_v13 = vmul.f32 %v8569_v43, %v4717_v32  ;;  %v4703_v24 = vadd.f32 0.2548296, %v4687_v49  ;;  %v4688_v21 = vmul.f32 %v8587_v14, %v4672_v35  ;;  %v4675_v15 = vadd.f32 -0.28449672, %v4659_v7  ;;  %v8698_v2 = vpop.eup %6899 }
0x1255   : > { %v4843_v3 = vsub.f32 0.0, %v4811_v26  ;;  %v4705_v23 = vadd.f32 0.2548296, %v4689_v17  ;;  %v4674_v20 = vadd.f32 -0.28449672, %v4658_v54  ;;  %6903 = vpow2.f32 %v8642_v59 }
0x1256   : > { %v4813_v52 = vsub.f32 1.0, %v4797_v13  ;;  %v4719_v25 = vmul.f32 %v8579_v38, %v4703_v24  ;;  %v4704_v63 = vadd.f32 0.2548296, %v4688_v21  ;;  %v4691_v43 = vmul.f32 %v8637_v57, %v4675_v15 }
0x1257   : > { %v4859_v29 = vsel %vm4827_vm5, %v4811_v26, %v4843_v3  ;;  %v4721_v8 = vmul.f32 %v8601_v22, %v4705_v23  ;;  %v4690_v18 = vmul.f32 %v8626_v9, %v4674_v20  ;;  %v4645_v32 = vadd.f32 1.4214138, %v4629_v1 }
0x1258   : > { %v4875_v49 = vadd.f32 1.0, %v4859_v29  ;;  %v4845_v54 = vsub.f32 0.0, %v4813_v52  ;;  %v4799_v35 = vmul.f32 %v8584_v0, %v4719_v25  ;;  %v4720_v7 = vmul.f32 %v8587_v14, %v4704_v63 }
0x1259   : > { %v4801_v38 = vmul.f32 %v8616_v16, %v4721_v8  ;;  %v4707_v17 = vadd.f32 0.2548296, %v4691_v43  ;;  %v4706_v13 = vadd.f32 0.2548296, %v4690_v18  ;;  %v4661_v24 = vmul.f32 %v8666_v10, %v4645_v32 }
0x125a   : > { %v4891_v12 = vmul.f32 %v4875_v49, %v8490_v62  ;;  %v4861_v22 = vsel %vm4829_vm6, %v4813_v52, %v4845_v54  ;;  %v4815_v26 = vsub.f32 1.0, %v4799_v35  ;;  %v4800_v0 = vmul.f32 %v8592_v4, %v4720_v7  ;;  %v8737_v45 = vpop.eup %6901 }
0x125b   : > { %v4877_v1 = vadd.f32 1.0, %v4861_v22  ;;  %v4817_v14 = vsub.f32 1.0, %v4801_v38  ;;  %v4723_v16 = vmul.f32 %v8637_v57, %v4707_v17  ;;  %v4722_v21 = vmul.f32 %v8626_v9, %v4706_v13 }
0x125c   : > { %5002 = vmatprep.mubr.f32.mxu0 %v4891_v12  ;;  %v4847_v15 = vsub.f32 0.0, %v4815_v26  ;;  %v4816_v3 = vsub.f32 1.0, %v4800_v0  ;;  %v4677_v23 = vadd.f32 -0.28449672, %v4661_v24  ;;  %v4596_v20 = vmul.f32 1.0614054, %v8646_v28 }
0x125d   : > { %5003 = vmatmul.mubr.f32.vlgmr.msra.gmra.mxu0 %v8635_v48  ;;  %v4893_v11 = vmul.f32 %v4877_v1, %v8504_v47  ;;  %v4849_v62 = vsub.f32 0.0, %v4817_v14  ;;  %v4803_v52 = vmul.f32 %v8652_v5, %v4723_v16  ;;  %v4802_v4 = vmul.f32 %v8632_v40, %v4722_v21 }
0x125e   : > { %v4863_v57 = vsel %vm4831_vm7, %v4815_v26, %v4847_v15  ;;  %v4848_v25 = vsub.f32 0.0, %v4816_v3  ;;  %v4693_v9 = vmul.f32 %v8666_v10, %v4677_v23  ;;  %v4612_v63 = vadd.f32 -1.4531521, %v4596_v20 }
0x125f   : > { %5007 = vmatprep.mubr.f32.mxu0 %v4893_v11  ;;  %v4879_v43 = vadd.f32 1.0, %v4863_v57  ;;  %v4865_v29 = vsel %vm4833_vm8, %v4817_v14, %v4849_v62  ;;  %v4819_v48 = vsub.f32 1.0, %v4803_v52  ;;  %v4818_v8 = vsub.f32 1.0, %v4802_v4 }
0x1260   : > { %v4881_v47 = vadd.f32 1.0, %v4865_v29  ;;  %v4864_v5 = vsel %vm4832_vm9, %v4816_v3, %v4848_v25  ;;  %v4709_v18 = vadd.f32 0.2548296, %v4693_v9  ;;  %v4628_v40 = vmul.f32 %v8646_v28, %v4612_v63 }
0x1261   : > { %5008 = vmatmul.mubr.f32.gmra.mxu0 %v8640_v61  ;;  %v4895_v56 = vmul.f32 %v4879_v43, %v8532_v50  ;;  %v4880_v32 = vadd.f32 1.0, %v4864_v5  ;;  %v4851_v49 = vsub.f32 0.0, %v4819_v48  ;;  %v4850_v54 = vsub.f32 0.0, %v4818_v8 }
0x1262   : > { %v4897_v35 = vmul.f32 %v4881_v47, %v8582_v30  ;;  %v4725_v7 = vmul.f32 %v8666_v10, %v4709_v18  ;;  %v4644_v58 = vadd.f32 1.4214138, %v4628_v40  ;;  %v4599_v38 = vmul.f32 1.0614054, %v8691_v19  ;;  %v6904_v18 = vpop.eup %6903 }
0x1263   : > { %5012 = vmatprep.mubr.f32.mxu1 %v4895_v56  ;;  %v4867_v61 = vsel %vm4835_vm11, %v4819_v48, %v4851_v49  ;;  %v4866_v50 = vsel %vm4834_vm10, %v4818_v8, %v4850_v54  ;;  %v4598_v17 = vmul.f32 1.0614054, %v8682_v55  ;;  %v4792_v13 = vmul.f32 1.442695, %v8669_v44 }
0x1264   : > { %5013 = vmatmul.mubr.f32.vlgmr.msra.gmra.mxu1 %v8658_v34  ;;  %v4883_v30 = vadd.f32 1.0, %v4867_v61  ;;  %v4805_v10 = vmul.f32 %v8675_v31, %v4725_v7  ;;  %v4660_v24 = vmul.f32 %v8646_v28, %v4644_v58  ;;  %v4896_v59 = vmul.f32 %v4880_v32, %v8549_v6 }
0x1265   : > { %5017 = vmatprep.mubr.f32.mxu1 %v4897_v35  ;;  %v4615_v12 = vadd.f32 -1.4531521, %v4599_v38  ;;  %v4614_v39 = vadd.f32 -1.4531521, %v4598_v17  ;;  %v4601_v22 = vmul.f32 1.0614054, %v8737_v45  ;;  %6905 = vpow2.f32 %v4792_v13 }
0x1266   : > { %v4899_v42 = vmul.f32 %v4883_v30, %v8619_v46  ;;  %v4882_v26 = vadd.f32 1.0, %v4866_v50  ;;  %v4821_v0 = vsub.f32 1.0, %v4805_v10  ;;  %v4676_v1 = vadd.f32 -0.28449672, %v4660_v24 }
0x1267   : > { %v4631_v44 = vmul.f32 %v8691_v19, %v4615_v12  ;;  %v4630_v34 = vmul.f32 %v8682_v55, %v4614_v39  ;;  %v4617_v14 = vadd.f32 -1.4531521, %v4601_v22  ;;  %v4600_v31 = vmul.f32 1.0614054, %v8698_v2 }
0x1268   : > { %v4790_v16 = vmul.f32 1.442695, %v8648_v27  ;;  %5018 = vmatmul.mubr.f32.gmra.mxu1 %v4896_v59  ;;  %v4853_v6 = vsub.f32 0.0, %v4821_v0  ;;  %v4692_v21 = vmul.f32 %v8646_v28, %v4676_v1  ;;  %v4485_v20 = vmul.f32 0.5, %v8544_v36  ;;  %v8968_v1 = vld [vmem:[#allocation23_spill] sm:$0xff] }
0x1269   : > { %5022 = vmatprep.mubr.f32.mxu1 %v4899_v42  ;;  %v4647_v15 = vadd.f32 1.4214138, %v4631_v44  ;;  %v4646_v46 = vadd.f32 1.4214138, %v4630_v34  ;;  %v4633_v3 = vmul.f32 %v8737_v45, %v4617_v14  ;;  %v4616_v23 = vadd.f32 -1.4531521, %v4600_v31 }
0x126a   : > { %v4898_v11 = vmul.f32 %v4882_v26, %v8596_v37  ;;  %v4869_v62 = vsel %vm4837_vm12, %v4821_v0, %v4853_v6  ;;  %v4708_v52 = vadd.f32 0.2548296, %v4692_v21  ;;  %6907 = vpow2.f32 %v4790_v16  ;;  %v8967_v0 = vld [vmem:[#allocation21_spill] sm:$0xff]  ;;  %v8970_v16 = vld [vmem:[#allocation27_spill] sm:$0xff] }
0x126b   : > { %v4885_v27 = vadd.f32 1.0, %v4869_v62  ;;  %v4663_v4 = vmul.f32 %v8691_v19, %v4647_v15  ;;  %v4662_v57 = vmul.f32 %v8682_v55, %v4646_v46  ;;  %v4649_v25 = vadd.f32 1.4214138, %v4633_v3  ;;  %v8971_v15 = vld [vmem:[#allocation20_spill] sm:$0xff] }
0x126c   : > { %5023 = vmatmul.mubr.f32.gmra.mxu1 %v4898_v11  ;;  %v4724_v9 = vmul.f32 %v8646_v28, %v4708_v52  ;;  %v4632_v63 = vmul.f32 %v8698_v2, %v4616_v23  ;;  %v4484_v38 = vmul.f32 0.5, %v8520_v33  ;;  %vm4838_vm14 = vcmp.ge.f32.partialorder %v8967_v0, 0.0  ;;  %v8972_v23 = vld [vmem:[#allocation26_spill] sm:$0xff] }
0x126d   : > { %v4901_v43 = vmul.f32 %v4885_v27, %v4485_v20  ;;  %v4679_v36 = vadd.f32 -0.28449672, %v4663_v4  ;;  %v4678_v29 = vadd.f32 -0.28449672, %v4662_v57  ;;  %v4665_v37 = vmul.f32 %v8737_v45, %v4649_v25  ;;  %v8973_v27 = vld [vmem:[#allocation25_spill] sm:$0xff] }
0x126e   : > { %v4804_v53 = vmul.f32 %v8655_v60, %v4724_v9  ;;  %v4648_v48 = vadd.f32 1.4214138, %v4632_v63  ;;  %vm4839_vm15 = vcmp.ge.f32.partialorder %v8968_v1, 0.0  ;;  %vm4841_vm1 = vcmp.ge.f32.partialorder %v8970_v16, 0.0  ;;  %v8974_v9 = vld [vmem:[#allocation24_spill] sm:$0xff] }
0x126f   : > { %5027 = vmatprep.mubr.f32.mxu1 %v4901_v43  ;;  %v4695_v8 = vmul.f32 %v8691_v19, %v4679_v36  ;;  %v4694_v47 = vmul.f32 %v8682_v55, %v4678_v29  ;;  %v4681_v5 = vadd.f32 -0.28449672, %v4665_v37  ;;  %v4486_v46 = vmul.f32 0.5, %v8971_v15 }
0x1270   : > { %v4820_v40 = vsub.f32 1.0, %v4804_v53  ;;  %v4664_v28 = vmul.f32 %v8698_v2, %v4648_v48  ;;  %v4489_v20 = vmul.f32 0.5, %v8972_v23  ;;  %vm4840_vm2 = vcmp.ge.f32.partialorder %v8973_v27, 0.0  ;;  %v5512_v48 = vld [vmem:[%s8975_s25] ss:$0 sm:$0xff] }
0x1271   : > { %v4711_v56 = vadd.f32 0.2548296, %v4695_v8  ;;  %v4710_v32 = vadd.f32 0.2548296, %v4694_v47  ;;  %v4697_v49 = vmul.f32 %v8737_v45, %v4681_v5  ;;  %v4488_v63 = vmul.f32 0.5, %v8974_v9  ;;  %v8976_v47 = vld [vmem:[#allocation13_spill] sm:$0xff] }
0x1272   : > { %v4852_v54 = vsub.f32 0.0, %v4820_v40  ;;  %v4680_v35 = vadd.f32 -0.28449672, %v4664_v28  ;;  %v6906_v17 = vpop.eup %6905 }
0x1273   : > { %v4727_v60 = vmul.f32 %v8691_v19, %v4711_v56  ;;  %v4726_v7 = vmul.f32 %v8682_v55, %v4710_v32  ;;  %v4713_v58 = vadd.f32 0.2548296, %v4697_v49  ;;  %v8977_v32 = vld [vmem:[#allocation12_spill] sm:$0xff] }
0x1274   : > { %v4868_v61 = vsel %vm4836_vm13, %v4820_v40, %v4852_v54  ;;  %v4696_v50 = vmul.f32 %v8698_v2, %v4680_v35 }
0x1275   : > { %v4884_v13 = vadd.f32 1.0, %v4868_v61  ;;  %v4807_v30 = vmul.f32 %v6904_v18, %v4727_v60  ;;  %v4806_v10 = vmul.f32 %v8686_v51, %v4726_v7  ;;  %v4729_v24 = vmul.f32 %v8737_v45, %v4713_v58  ;;  %v8969_v51 = vld [vmem:[#allocation22_spill] sm:$0xff]  ;;  %v8978_v58 = vld [vmem:[#allocation15_spill] sm:$0xff] }
0x1276   : > { %v4712_v59 = vadd.f32 0.2548296, %v4696_v50  ;;  %v4487_v34 = vmul.f32 0.5, %v8969_v51 }
0x1277   : > { %v4900_v12 = vmul.f32 %v4884_v13, %v4484_v38  ;;  %v4823_v41 = vsub.f32 1.0, %v4807_v30  ;;  %v4822_v39 = vsub.f32 1.0, %v4806_v10  ;;  %v4809_v19 = vmul.f32 %v6906_v17, %v4729_v24  ;;  %v6908_v22 = vpop.eup %6907  ;;  %v8980_v30 = vld [vmem:[#allocation14_spill] sm:$0xff] }
0x1278   : > { %v4728_v55 = vmul.f32 %v8698_v2, %v4712_v59 }
0x1279   : > { %5028 = vmatmul.mubr.f32.gmra.mxu1 %v4900_v12  ;;  %v4855_v33 = vsub.f32 0.0, %v4823_v41  ;;  %v4854_v42 = vsub.f32 0.0, %v4822_v39  ;;  %v4825_v26 = vsub.f32 1.0, %v4809_v19 }
0x127a   : > { %v4808_v44 = vmul.f32 %v6908_v22, %v4728_v55 }
0x127b   : > { %v4871_v45 = vsel %vm4839_vm15, %v4823_v41, %v4855_v33  ;;  %v4870_v14 = vsel %vm4838_vm14, %v4822_v39, %v4854_v42  ;;  %v4857_v31 = vsub.f32 0.0, %v4825_v26  ;;  %v8983_v41 = vld [vmem:[#allocation17_spill] sm:$0xff]  ;;  %v8984_v42 = vld [vmem:[#allocation16_spill] sm:$0xff] }
0x127c   : > { %v4887_v6 = vadd.f32 1.0, %v4871_v45  ;;  %v4886_v21 = vadd.f32 1.0, %v4870_v14  ;;  %v4824_v2 = vsub.f32 1.0, %v4808_v44  ;;  %v8985_v45 = vld [vmem:[#allocation19_spill] sm:$0xff] }
0x127d   : > { %v4873_v3 = vsel %vm4841_vm1, %v4825_v26, %v4857_v31 }
0x127e   : > { %v4903_v11 = vmul.f32 %v4887_v6, %v4487_v34  ;;  %v4889_v62 = vadd.f32 1.0, %v4873_v3  ;;  %v4856_v52 = vsub.f32 0.0, %v4824_v2  ;;  %v4902_v4 = vmul.f32 %v4886_v21, %v4486_v46  ;;  %v8986_v21 = vld [vmem:[#allocation18_spill] sm:$0xff] }
0x1280   : > { %5032 = vmatprep.mubr.f32.mxu1 %v4903_v11  ;;  %v4905_v57 = vmul.f32 %v4889_v62, %v4489_v20  ;;  %v4872_v25 = vsel %vm4840_vm2, %v4824_v2, %v4856_v52 }
0x1281   : > { %5033 = vmatmul.mubr.f32.gmra.mxu1 %v4902_v4  ;;  %v4888_v43 = vadd.f32 1.0, %v4872_v25 }
0x1282   : > { %5037 = vmatprep.mubr.f32.mxu1 %v4905_v57 }
0x1283   : > { %v4904_v36 = vmul.f32 %v4888_v43, %v4488_v63 }
0x1285   : > { %5038 = vmatmul.mubr.f32.gmra.mxu1 %v4904_v36 }
0x131d   : > { %v5914_v29 = vpop.f32.mrf.mxu0 }
0x131f   : > { %v5915_v37 = vpop.f32.mrf.mxu0 }
0x1320   : > { %v5916_v53 = vadd.f32 %v5915_v37, %v5914_v29 }
0x1321   : > { %v5917_v8 = vpop.f32.mrf.mxu0 }
0x1322   : > { %v5043_v5 = vadd.f32 %v5916_v53, %v8976_v47 }
0x1323   : > { %v5918_v18 = vpop.f32.mrf.mxu0 }
0x1324   : > { %v5058_v40 = vadd.f32 %v5512_v48, %v5043_v5  ;;  %v5919_v28 = vadd.f32 %v5918_v18, %v5917_v8  ;;  %v5920_v56 = vpop.f32.mrf.mxu1 }
0x1326   : > { %5066 = vst.msk [vmem:[%s8796_s0] sm:$0xff] %vm573_vm0, %v5058_v40  ;;  %v5044_v49 = vadd.f32 %v5919_v28, %v8977_v32  ;;  %v5921_v54 = vpop.f32.mrf.mxu1 }
0x1327   : > { %v5922_v35 = vadd.f32 %v5921_v54, %v5920_v56 }
0x1328   : > { %v5059_v60 = vadd.f32 %v5512_v48, %v5044_v49  ;;  %v5923_v7 = vpop.f32.mrf.mxu1 }
0x1329   : > { %v5045_v38 = vadd.f32 %v5922_v35, %v8978_v58 }
0x132a   : > { %5067 = vst.msk [vmem:[%s8796_s0 + $0x8] sm:$0xff] %vm573_vm0, %v5059_v60  ;;  %v5924_v61 = vpop.f32.mrf.mxu1 }
0x132b   : > { %v5060_v50 = vadd.f32 %v5512_v48, %v5045_v38  ;;  %v5925_v17 = vadd.f32 %v5924_v61, %v5923_v7 }
0x132c   : > { %v5926_v13 = vpop.f32.mrf.mxu1 }
0x132d   : > { %5068 = vst.msk [vmem:[%s8796_s0 + $0x10] sm:$0xff] %vm573_vm0, %v5060_v50  ;;  %v5046_v10 = vadd.f32 %v5925_v17, %v8980_v30 }
0x132e   : > { %v5927_v24 = vpop.f32.mrf.mxu1 }
0x132f   : > { %v5061_v59 = vadd.f32 %v5512_v48, %v5046_v10  ;;  %v5928_v12 = vadd.f32 %v5927_v24, %v5926_v13 }
0x1331   : > { %5069 = vst.msk [vmem:[%s8796_s0 + $0x18] sm:$0xff] %vm573_vm0, %v5061_v59  ;;  %v5047_v39 = vadd.f32 %v5928_v12, %v8983_v41 }
0x1333   : > { %v5062_v19 = vadd.f32 %v5512_v48, %v5047_v39 }
0x1335   : > { %5070 = vst.msk [vmem:[%s8796_s0 + $0x20] sm:$0xff] %vm573_vm0, %v5062_v19 }
0x1339   : > { %v5929_v55 = vpop.f32.mrf.mxu1 }
0x133b   : > { %v5930_v22 = vpop.f32.mrf.mxu1 }
0x133c   : > { %v5931_v33 = vadd.f32 %v5930_v22, %v5929_v55 }
0x133e   : > { %v5048_v26 = vadd.f32 %v5931_v33, %v8984_v42 }
0x1340   : > { %v5063_v0 = vadd.f32 %v5512_v48, %v5048_v26 }
0x1341   : > { %v5932_v1 = vpop.f32.mrf.mxu1 }
0x1342   : > { %5071 = vst.msk [vmem:[%s8796_s0 + $0x28] sm:$0xff] %vm573_vm0, %v5063_v0 }
0x1343   : > { %v5933_v44 = vpop.f32.mrf.mxu1 }
0x1344   : > { %v5934_v51 = vadd.f32 %v5933_v44, %v5932_v1 }
0x1345   : > { %v5935_v34 = vpop.f32.mrf.mxu1 }
0x1346   : > { %v5049_v14 = vadd.f32 %v5934_v51, %v8985_v45 }
0x1347   : > { %v5936_v31 = vpop.f32.mrf.mxu1 }
0x1348   : > { %v5064_v16 = vadd.f32 %v5512_v48, %v5049_v14  ;;  %v5937_v6 = vadd.f32 %v5936_v31, %v5935_v34 }
0x134a   : > { %5072 = vst.msk [vmem:[%s8796_s0 + $0x30] sm:$0xff] %vm573_vm0, %v5064_v16  ;;  %v5050_v2 = vadd.f32 %v5937_v6, %v8986_v21 }
0x134c   : > { %v5065_v15 = vadd.f32 %v5512_v48, %v5050_v2 }
0x134e   : > { %5073 = vst.msk [vmem:[%s8796_s0 + $0x38] sm:$0xff] %vm573_vm0, %v5065_v15 }
0x134f   : > { %6930 = shalt.err (!%p6927_p9)
}
0x1350   : > { %s6931_s0 = scalar_lea.hbm %s8828_s27, 1024  ;;  %s6935_s24 = scalar_lea.hbm %s8987_s28, 8192 }
0x1351   : > { %p6932_p11 = scmp.ne.s32.totalorder %s8828_s27, %s6931_s0  ;;  %p6936_p0 = scmp.lt.s32.totalorder %s8828_s27, %s8987_s28 }
0x1352   : > { %p6937_p1 = scmp.lt.s32.totalorder %s6935_s24, %s6931_s0 }
0x1353   : > { %p6933_p12 = pnand %p6932_p11, %p7175_p6 }
0x1354   : > { %p6938_p2 = por %p6937_p1, %p6936_p0 }
0x1355   : > { %p6934_p13 = pneg %p6933_p12 }
0x1357   : > { %p6939_p3 = pnand %p6938_p2, %p6934_p13 }
0x1359   : > { %6942 = shalt.err (!%p6939_p3)
}
0x135a   : > { %s7029_s1 = smov 128   ;;  %s7030_s2 = smov 256  }
0x135b   : > { %s7031_s18 = smov 8  }
0x135c   : > { %6594 = dma.vmem_to_hbm [thread:$0]  (%p7175_p6), %s8820_s23, 1024, %s8828_s27, %s8834_s13, %s7029_s1, %s7030_s2, %s7031_s18  }
0x135d PF: > { %p6600_p4 = scmp.ge.s32.totalorder %s7025_s22, 2  ;;  %s5107_s26 = sand.u32 1, %s6989_s29  }
0x135e   : > { %s5108_s0 = scalar_lea.sflag [#allocation4], %s5107_s26 }
0x135f   : > { %p6597_p5 = pnand %p6600_p4, %p7187_p10 }
0x1361   : > { %p6598_p7 = pneg %p6597_p5 }
0x1363   : > { %6984 = dma.done.wait (%p6598_p7), %s5108_s0, 1024  }
0x1364   : > { %6986 = vsyncadd (%p6598_p7), %s5108_s0, 4294966272  ;;  %s27_s22 = sadd.s32 1, %s7025_s22   ;;  %s8989_s14 = sld [smem:[#allocation9_spill]] }
0x1365   : > { %p24_p8 = scmp.ge.s32.totalorder %s27_s22, 10   ;;  %s8990_s23 = sld [smem:[#allocation10_spill]] }
0x1366   : > { %s8991_s27 = sld [smem:[#allocation11_spill]]  ;;  %s8992_s29 = smov %s6993_s30 }
0x1367   : > { %s8993_s30 = smov %s6997_s15  ;;  %s8994_s15 = smov %s7195_s9 }
0x1368   : > { %s8995_s16 = smov %s7013_s19  ;;  %s8996_s17 = smov %s7017_s20 }
0x1369   : > { %s8997_s18 = smov %s7021_s21  ;;  %26 = sbr.rel (!%p24_p8) target bundleno = 15 (0xf), region = 166 }
0x136a   : > { %s8998_s19 = smov %s8989_s14 }
0x136b   : > { %s8999_s20 = smov %s8990_s23 }
0x136c   : > { %s9000_s21 = smov %s8991_s27 }
0x136e   :  { %5113 = vsyncpa [#allocation4], 1 }
0x136f   :  { %5115 = vsyncpa [#allocation4 + $0x1], 1 }

</bundles_post_ra>
